<compile_context>
chip_gen: v7x
topology: tpu7x:2x2x1
jax: 0.10.0
libtpu: 0.0.40
codegen_flags: <defaults>
</compile_context>

<pallas_src>
import functools

import jax
import jax.numpy as jnp
from jax import lax
from jax.experimental import pallas as pl
from jax.experimental.pallas import tpu as pltpu


L_IN = 200                       # input length (forced by fc1 = Linear(32*50, 128))
C1, C2, K = 16, 32, 3
L1, L2 = L_IN // 2, L_IN // 4    # 100, 50
FC_IN, FC_OUT = C2 * L2, 128     # 1600, 128


def _shift_rows(v, direction, seg_len):
    """Shift rows of v by one within independent segments of length seg_len.

    direction="down": out[i] = v[i-1], zero where (i % seg_len) == 0
    direction="up":   out[i] = v[i+1], zero where (i % seg_len) == seg_len-1
    Implements Conv1d padding=1 semantics per batch segment (batches are
    stacked along the sublane/row axis).
    """
    n, c = v.shape
    zero_row = jnp.zeros((1, c), v.dtype)
    if direction == "down":
        shifted = jnp.concatenate([zero_row, v[:-1, :]], axis=0)
        bad_rows = list(range(seg_len, n, seg_len))            # interior segment starts
    else:
        shifted = jnp.concatenate([v[1:, :], zero_row], axis=0)
        bad_rows = [r - 1 for r in range(seg_len, n, seg_len)]  # interior segment ends
    if bad_rows:
        idx = lax.broadcasted_iota(jnp.int32, (n, 1), 0)
        mask = functools.reduce(jnp.logical_or, [idx == r for r in bad_rows])
        shifted = jnp.where(mask, jnp.zeros_like(shifted), shifted)
    return shifted


def _time_encoder_kernel(x_ref, w1_ref, b1_ref, w2_ref, b2_ref, w3_ref, bfc_ref,
                         out_ref, h1_scr, h2_scr, p2_scr):
    # x_ref:  (B*L_IN, 1)       slab: row = b*L_IN + t, batch-major / position-minor
    # w1_ref: (K, C1)           w1r[k, c] = conv1.weight[c, 0, k]
    # b1_ref: (1, C1)
    # w2_ref: (K, C1, C2)       w2r[k, cin, cout] = conv2.weight[cout, cin, k]
    # b2_ref: (1, C2)
    # w3_ref: (L2, C2, FC_OUT)  w3[t, c, o] = fc1.weight[o, c*L2 + t]
    # bfc_ref:(1, FC_OUT)
    # out_ref:(B, FC_OUT)       lane-dense final output
    BL = x_ref.shape[0]
    B = BL // L_IN

    # ---- conv1 (Cin=1 -> C1, k=3, pad=1): tap-wise FMAs on the VPU ----------
    x = x_ref[...]                                   # (B*L_IN, 1)
    xm1 = _shift_rows(x, "down", L_IN)               # x[t-1] (zero-padded per batch)
    xp1 = _shift_rows(x, "up", L_IN)                 # x[t+1]
    w1 = w1_ref[...]                                 # (K, C1)
    h1 = xm1 * w1[0:1, :] + x * w1[1:2, :] + xp1 * w1[2:3, :] + b1_ref[...]
    h1 = jnp.maximum(h1, 0.0)                        # (B*L_IN, C1)

    # ---- MaxPool1d(2,2): sublane-strided reads of VMEM scratch ---------------
    h1_scr[...] = h1
    p1 = jnp.maximum(h1_scr[pl.ds(0, B * L1, stride=2), :],
                     h1_scr[pl.ds(1, B * L1, stride=2), :])     # (B*L1, C1)

    # ---- conv2 (C1 -> C2, k=3, pad=1): three batched MXU matmuls -------------
    pm1 = _shift_rows(p1, "down", L1)
    pp1 = _shift_rows(p1, "up", L1)
    h2 = (jnp.dot(pm1, w2_ref[0], preferred_element_type=jnp.float32)
          + jnp.dot(p1, w2_ref[1], preferred_element_type=jnp.float32)
          + jnp.dot(pp1, w2_ref[2], preferred_element_type=jnp.float32)
          + b2_ref[...])
    h2 = jnp.maximum(h2, 0.0)                        # (B*L1, C2)

    # ---- MaxPool1d(2,2) again -------------------------------------------------
    h2_scr[...] = h2
    p2_scr[...] = jnp.maximum(h2_scr[pl.ds(0, B * L2, stride=2), :],
                              h2_scr[pl.ds(1, B * L2, stride=2), :])  # (B*L2, C2)

    # ---- fc1 + ReLU: accumulate 50 per-position (B,C2)@(C2,128) matmuls ------
    # rows {b*L2 + t : b} gathered with one sublane-strided read per position;
    # equivalent to (B, 1600) @ (1600, 128) with the PyTorch flatten order.
    acc = jnp.zeros((B, FC_OUT), jnp.float32)
    for t in range(L2):                              # static unroll
        rows = p2_scr[pl.ds(t, B, stride=L2), :]     # (B, C2)
        acc = acc + jnp.dot(rows, w3_ref[t], preferred_element_type=jnp.float32)
    out_ref[...] = jnp.maximum(acc + bfc_ref[...], 0.0)


def prepare_params(w1, b1, w2, b2, wfc, bfc):
    """One-time weight re-layout (hoisted out of the per-call forward path)."""
    w1r = jnp.transpose(w1.reshape(C1, K))                       # (K, C1)
    b1r = b1.reshape(1, C1)
    w2r = jnp.transpose(w2, (2, 1, 0))                           # (K, C1, C2)
    b2r = b2.reshape(1, C2)
    # fc weight as (L2, C2, FC_OUT): w3[t, c, o] = wfc[o, c*L2 + t]
    w3 = jnp.transpose(wfc.reshape(FC_OUT, C2, L2), (2, 1, 0))   # (L2, C2, FC_OUT)
    bfcr = bfc.reshape(1, FC_OUT)
    return w1r, b1r, w2r, b2r, w3, bfcr


@jax.jit
def time_encoder_forward(x, w1r, b1r, w2r, b2r, w3, bfcr):
    """x: (B, 1, 200) f32; weights already prepared by prepare_params().
    Returns (B, 128) f32."""
    B = x.shape[0]
    x_slab = x.reshape(B * L_IN, 1)          # row = b*L_IN + t

    return pl.pallas_call(
        _time_encoder_kernel,
        out_shape=jax.ShapeDtypeStruct((B, FC_OUT), jnp.float32),
        in_specs=[
            pl.BlockSpec((B * L_IN, 1), lambda: (0, 0)),
            pl.BlockSpec((K, C1), lambda: (0, 0)),
            pl.BlockSpec((1, C1), lambda: (0, 0)),
            pl.BlockSpec((K, C1, C2), lambda: (0, 0, 0)),
            pl.BlockSpec((1, C2), lambda: (0, 0)),
            pl.BlockSpec((L2, C2, FC_OUT), lambda: (0, 0, 0)),
            pl.BlockSpec((1, FC_OUT), lambda: (0, 0)),
        ],
        out_specs=pl.BlockSpec((B, FC_OUT), lambda: (0, 0)),
        scratch_shapes=[
            pltpu.VMEM((B * L_IN, C1), jnp.float32),   # conv1 activations (pool1 src)
            pltpu.VMEM((B * L1, C2), jnp.float32),     # conv2 activations (pool2 src)
            pltpu.VMEM((B * L2, C2), jnp.float32),     # pooled activations (fc src)
        ],
    )(x_slab, w1r, b1r, w2r, b2r, w3, bfcr)


def _reference(x, w1, b1, w2, b2, wfc, bfc):
    """Pure-JAX mirror of the PyTorch TimeEncoder.forward."""
    def conv1d(x, w, b):
        y = lax.conv_general_dilated(
            x, w, window_strides=(1,), padding=((1, 1),),
            dimension_numbers=("NCH", "OIH", "NCH"))
        return y + b[None, :, None]

    def maxpool2(x):
        bb, cc, ll = x.shape
        return x.reshape(bb, cc, ll // 2, 2).max(axis=-1)

    h = maxpool2(jnp.maximum(conv1d(x, w1, b1), 0.0))
    h = maxpool2(jnp.maximum(conv1d(h, w2, b2), 0.0))
    h = h.reshape(x.shape[0], -1)
    return jnp.maximum(h @ wfc.T + bfc, 0.0)


if __name__ == "__main__":
    key = jax.random.PRNGKey(0)
    ks = jax.random.split(key, 7)
    B = 2

    x = jax.random.normal(ks[0], (B, 1, L_IN), dtype=jnp.float32)
    w1 = jax.random.normal(ks[1], (C1, 1, K), dtype=jnp.float32) * 0.5
    b1 = jax.random.normal(ks[2], (C1,), dtype=jnp.float32) * 0.1
    w2 = jax.random.normal(ks[3], (C2, C1, K), dtype=jnp.float32) * 0.15
    b2 = jax.random.normal(ks[4], (C2,), dtype=jnp.float32) * 0.1
    wfc = jax.random.normal(ks[5], (FC_OUT, FC_IN), dtype=jnp.float32) * 0.02
    bfc = jax.random.normal(ks[6], (FC_OUT,), dtype=jnp.float32) * 0.1

    # One-time weight layout prep (outside the per-call jitted forward).
    params = prepare_params(w1, b1, w2, b2, wfc, bfc)
    params = jax.tree_util.tree_map(jax.block_until_ready, params)

    out = jax.block_until_ready(time_encoder_forward(x, *params))
    ref = jax.block_until_ready(_reference(x, w1, b1, w2, b2, wfc, bfc))

    assert out.shape == (B, FC_OUT), out.shape
    assert jnp.allclose(out, ref, atol=2e-4, rtol=2e-4), float(
        jnp.max(jnp.abs(out - ref)))

    print("KERNEL_OK")
</pallas_src>

<mosaic_0001>
module attributes {stable_mosaic.version = 11 : i64} {
  func.func @_time_encoder_kernel(%arg0: memref<400x1xf32, #tpu.memory_space<vmem>>, %arg1: memref<3x16xf32, #tpu.memory_space<vmem>>, %arg2: memref<1x16xf32, #tpu.memory_space<vmem>>, %arg3: memref<3x16x32xf32, #tpu.memory_space<vmem>>, %arg4: memref<1x32xf32, #tpu.memory_space<vmem>>, %arg5: memref<50x32x128xf32, #tpu.memory_space<vmem>>, %arg6: memref<1x128xf32, #tpu.memory_space<vmem>>, %arg7: memref<2x128xf32, #tpu.memory_space<vmem>>, %arg8: memref<400x16xf32, #tpu.memory_space<vmem>>, %arg9: memref<200x32xf32, #tpu.memory_space<vmem>>, %arg10: memref<100x32xf32, #tpu.memory_space<vmem>>) attributes {dimension_semantics = [], scalar_prefetch = 0 : i64, scratch_operands = 3 : i64, tpu.core_type = #tpu.core_type<tc>} {
    %c0 = arith.constant 0 : index
    %c0_0 = arith.constant 0 : index
    %0 = vector.load %arg0[%c0, %c0_0] : memref<400x1xf32, #tpu.memory_space<vmem>>, vector<400x1xf32>
    %cst = arith.constant 0.000000e+00 : f32
    %1 = vector.broadcast %cst : f32 to vector<1x1xf32>
    %2 = vector.extract_strided_slice %0 {offsets = [0, 0], sizes = [399, 1], strides = [1, 1]} : vector<400x1xf32> to vector<399x1xf32>
    %3 = tpu.concatenate %1, %2 in 0 : vector<1x1xf32>, vector<399x1xf32> -> vector<400x1xf32>
    %4 = tpu.iota {dimensions = array<i32: 0>} : vector<400x1xi32>
    %c200_i32 = arith.constant 200 : i32
    %5 = vector.broadcast %c200_i32 : i32 to vector<400x1xi32>
    %6 = arith.cmpi eq, %4, %5 : vector<400x1xi32>
    %cst_1 = arith.constant 0.000000e+00 : f32
    %7 = vector.broadcast %cst_1 : f32 to vector<400x1xf32>
    %8 = arith.select %6, %7, %3 : vector<400x1xi1>, vector<400x1xf32>
    %cst_2 = arith.constant 0.000000e+00 : f32
    %9 = vector.broadcast %cst_2 : f32 to vector<1x1xf32>
    %10 = vector.extract_strided_slice %0 {offsets = [1, 0], sizes = [399, 1], strides = [1, 1]} : vector<400x1xf32> to vector<399x1xf32>
    %11 = tpu.concatenate %10, %9 in 0 : vector<399x1xf32>, vector<1x1xf32> -> vector<400x1xf32>
    %12 = tpu.iota {dimensions = array<i32: 0>} : vector<400x1xi32>
    %c199_i32 = arith.constant 199 : i32
    %13 = vector.broadcast %c199_i32 : i32 to vector<400x1xi32>
    %14 = arith.cmpi eq, %12, %13 : vector<400x1xi32>
    %cst_3 = arith.constant 0.000000e+00 : f32
    %15 = vector.broadcast %cst_3 : f32 to vector<400x1xf32>
    %16 = arith.select %14, %15, %11 : vector<400x1xi1>, vector<400x1xf32>
    %c0_4 = arith.constant 0 : index
    %c0_5 = arith.constant 0 : index
    %17 = vector.load %arg1[%c0_4, %c0_5] : memref<3x16xf32, #tpu.memory_space<vmem>>, vector<3x16xf32>
    %18 = vector.extract_strided_slice %17 {offsets = [0, 0], sizes = [1, 16], strides = [1, 1]} : vector<3x16xf32> to vector<1x16xf32>
    %19 = vector.broadcast %8 : vector<400x1xf32> to vector<400x16xf32>
    %20 = vector.broadcast %18 : vector<1x16xf32> to vector<400x16xf32>
    %21 = arith.mulf %19, %20 : vector<400x16xf32>
    %22 = vector.extract_strided_slice %17 {offsets = [1, 0], sizes = [1, 16], strides = [1, 1]} : vector<3x16xf32> to vector<1x16xf32>
    %23 = vector.broadcast %0 : vector<400x1xf32> to vector<400x16xf32>
    %24 = vector.broadcast %22 : vector<1x16xf32> to vector<400x16xf32>
    %25 = arith.mulf %23, %24 : vector<400x16xf32>
    %26 = arith.addf %21, %25 : vector<400x16xf32>
    %27 = vector.extract_strided_slice %17 {offsets = [2, 0], sizes = [1, 16], strides = [1, 1]} : vector<3x16xf32> to vector<1x16xf32>
    %28 = vector.broadcast %16 : vector<400x1xf32> to vector<400x16xf32>
    %29 = vector.broadcast %27 : vector<1x16xf32> to vector<400x16xf32>
    %30 = arith.mulf %28, %29 : vector<400x16xf32>
    %31 = arith.addf %26, %30 : vector<400x16xf32>
    %c0_6 = arith.constant 0 : index
    %c0_7 = arith.constant 0 : index
    %32 = vector.load %arg2[%c0_6, %c0_7] : memref<1x16xf32, #tpu.memory_space<vmem>>, vector<1x16xf32>
    %33 = vector.broadcast %32 : vector<1x16xf32> to vector<400x16xf32>
    %34 = arith.addf %31, %33 : vector<400x16xf32>
    %cst_8 = arith.constant 0.000000e+00 : f32
    %35 = vector.broadcast %cst_8 : f32 to vector<400x16xf32>
    %36 = arith.maximumf %34, %35 : vector<400x16xf32>
    %c0_9 = arith.constant 0 : index
    %c0_10 = arith.constant 0 : index
    %37 = vector.load %arg8[%c0_9, %c0_10] : memref<400x16xf32, #tpu.memory_space<vmem>>, vector<400x16xf32>
    tpu.vector_store %arg8[%c0_9, %c0_10], %36 {strides = array<i32>} : memref<400x16xf32, #tpu.memory_space<vmem>>, vector<400x16xf32>,
    %c0_11 = arith.constant 0 : index
    %c0_12 = arith.constant 0 : index
    %38 = tpu.strided_load %arg8[%c0_11, %c0_12] {strides = array<i32: 2, 1>} : memref<400x16xf32, #tpu.memory_space<vmem>>, vector<200x16xf32>
    %c1 = arith.constant 1 : index
    %c0_13 = arith.constant 0 : index
    %39 = tpu.strided_load %arg8[%c1, %c0_13] {strides = array<i32: 2, 1>} : memref<400x16xf32, #tpu.memory_space<vmem>>, vector<200x16xf32>
    %40 = arith.maximumf %38, %39 : vector<200x16xf32>
    %cst_14 = arith.constant 0.000000e+00 : f32
    %41 = vector.broadcast %cst_14 : f32 to vector<1x16xf32>
    %42 = vector.extract_strided_slice %40 {offsets = [0, 0], sizes = [199, 16], strides = [1, 1]} : vector<200x16xf32> to vector<199x16xf32>
    %43 = tpu.concatenate %41, %42 in 0 : vector<1x16xf32>, vector<199x16xf32> -> vector<200x16xf32>
    %44 = tpu.iota {dimensions = array<i32: 0>} : vector<200x1xi32>
    %c100_i32 = arith.constant 100 : i32
    %45 = vector.broadcast %c100_i32 : i32 to vector<200x1xi32>
    %46 = arith.cmpi eq, %44, %45 : vector<200x1xi32>
    %cst_15 = arith.constant 0.000000e+00 : f32
    %47 = vector.broadcast %cst_15 : f32 to vector<200x16xf32>
    %48 = vector.shape_cast %46 : vector<200x1xi1> to vector<200x1xi1>
    %49 = vector.broadcast %48 : vector<200x1xi1> to vector<200x16xi1>
    %50 = arith.select %49, %47, %43 : vector<200x16xi1>, vector<200x16xf32>
    %cst_16 = arith.constant 0.000000e+00 : f32
    %51 = vector.broadcast %cst_16 : f32 to vector<1x16xf32>
    %52 = vector.extract_strided_slice %40 {offsets = [1, 0], sizes = [199, 16], strides = [1, 1]} : vector<200x16xf32> to vector<199x16xf32>
    %53 = tpu.concatenate %52, %51 in 0 : vector<199x16xf32>, vector<1x16xf32> -> vector<200x16xf32>
    %54 = tpu.iota {dimensions = array<i32: 0>} : vector<200x1xi32>
    %c99_i32 = arith.constant 99 : i32
    %55 = vector.broadcast %c99_i32 : i32 to vector<200x1xi32>
    %56 = arith.cmpi eq, %54, %55 : vector<200x1xi32>
    %cst_17 = arith.constant 0.000000e+00 : f32
    %57 = vector.broadcast %cst_17 : f32 to vector<200x16xf32>
    %58 = vector.shape_cast %56 : vector<200x1xi1> to vector<200x1xi1>
    %59 = vector.broadcast %58 : vector<200x1xi1> to vector<200x16xi1>
    %60 = arith.select %59, %57, %53 : vector<200x16xi1>, vector<200x16xf32>
    %c0_18 = arith.constant 0 : index
    %c0_19 = arith.constant 0 : index
    %c0_20 = arith.constant 0 : index
    %61 = vector.load %arg3[%c0_18, %c0_19, %c0_20] : memref<3x16x32xf32, #tpu.memory_space<vmem>>, vector<1x16x32xf32>
    %62 = vector.shape_cast %61 : vector<1x16x32xf32> to vector<16x32xf32>
    %cst_21 = arith.constant dense<0.000000e+00> : vector<200x32xf32>
    %63 = tpu.matmul %50, %62, %cst_21 {dimension_numbers = #tpu.dot_dimension_numbers<[1], [0], [0], [1], [0, 0, 1, 1], [], []>} : vector<200x16xf32>, vector<16x32xf32>, vector<200x32xf32> -> vector<200x32xf32>
    %c1_22 = arith.constant 1 : index
    %c0_23 = arith.constant 0 : index
    %c0_24 = arith.constant 0 : index
    %64 = vector.load %arg3[%c1_22, %c0_23, %c0_24] : memref<3x16x32xf32, #tpu.memory_space<vmem>>, vector<1x16x32xf32>
    %65 = vector.shape_cast %64 : vector<1x16x32xf32> to vector<16x32xf32>
    %cst_25 = arith.constant dense<0.000000e+00> : vector<200x32xf32>
    %66 = tpu.matmul %40, %65, %cst_25 {dimension_numbers = #tpu.dot_dimension_numbers<[1], [0], [0], [1], [0, 0, 1, 1], [], []>} : vector<200x16xf32>, vector<16x32xf32>, vector<200x32xf32> -> vector<200x32xf32>
    %67 = arith.addf %63, %66 : vector<200x32xf32>
    %c2 = arith.constant 2 : index
    %c0_26 = arith.constant 0 : index
    %c0_27 = arith.constant 0 : index
    %68 = vector.load %arg3[%c2, %c0_26, %c0_27] : memref<3x16x32xf32, #tpu.memory_space<vmem>>, vector<1x16x32xf32>
    %69 = vector.shape_cast %68 : vector<1x16x32xf32> to vector<16x32xf32>
    %cst_28 = arith.constant dense<0.000000e+00> : vector<200x32xf32>
    %70 = tpu.matmul %60, %69, %cst_28 {dimension_numbers = #tpu.dot_dimension_numbers<[1], [0], [0], [1], [0, 0, 1, 1], [], []>} : vector<200x16xf32>, vector<16x32xf32>, vector<200x32xf32> -> vector<200x32xf32>
    %71 = arith.addf %67, %70 : vector<200x32xf32>
    %c0_29 = arith.constant 0 : index
    %c0_30 = arith.constant 0 : index
    %72 = vector.load %arg4[%c0_29, %c0_30] : memref<1x32xf32, #tpu.memory_space<vmem>>, vector<1x32xf32>
    %73 = vector.broadcast %72 : vector<1x32xf32> to vector<200x32xf32>
    %74 = arith.addf %71, %73 : vector<200x32xf32>
    %cst_31 = arith.constant 0.000000e+00 : f32
    %75 = vector.broadcast %cst_31 : f32 to vector<200x32xf32>
    %76 = arith.maximumf %74, %75 : vector<200x32xf32>
    %c0_32 = arith.constant 0 : index
    %c0_33 = arith.constant 0 : index
    %77 = vector.load %arg9[%c0_32, %c0_33] : memref<200x32xf32, #tpu.memory_space<vmem>>, vector<200x32xf32>
    tpu.vector_store %arg9[%c0_32, %c0_33], %76 {strides = array<i32>} : memref<200x32xf32, #tpu.memory_space<vmem>>, vector<200x32xf32>,
    %c0_34 = arith.constant 0 : index
    %c0_35 = arith.constant 0 : index
    %78 = tpu.strided_load %arg9[%c0_34, %c0_35] {strides = array<i32: 2, 1>} : memref<200x32xf32, #tpu.memory_space<vmem>>, vector<100x32xf32>
    %c1_36 = arith.constant 1 : index
    %c0_37 = arith.constant 0 : index
    %79 = tpu.strided_load %arg9[%c1_36, %c0_37] {strides = array<i32: 2, 1>} : memref<200x32xf32, #tpu.memory_space<vmem>>, vector<100x32xf32>
    %80 = arith.maximumf %78, %79 : vector<100x32xf32>
    %c0_38 = arith.constant 0 : index
    %c0_39 = arith.constant 0 : index
    %81 = vector.load %arg10[%c0_38, %c0_39] : memref<100x32xf32, #tpu.memory_space<vmem>>, vector<100x32xf32>
    tpu.vector_store %arg10[%c0_38, %c0_39], %80 {strides = array<i32>} : memref<100x32xf32, #tpu.memory_space<vmem>>, vector<100x32xf32>,
    %cst_40 = arith.constant 0.000000e+00 : f32
    %82 = vector.broadcast %cst_40 : f32 to vector<2x128xf32>
    %c0_41 = arith.constant 0 : index
    %c0_42 = arith.constant 0 : index
    %83 = tpu.strided_load %arg10[%c0_41, %c0_42] {strides = array<i32: 50, 1>} : memref<100x32xf32, #tpu.memory_space<vmem>>, vector<2x32xf32>
    %c0_43 = arith.constant 0 : index
    %c0_44 = arith.constant 0 : index
    %c0_45 = arith.constant 0 : index
    %84 = vector.load %arg5[%c0_43, %c0_44, %c0_45] : memref<50x32x128xf32, #tpu.memory_space<vmem>>, vector<1x32x128xf32>
    %85 = vector.shape_cast %84 : vector<1x32x128xf32> to vector<32x128xf32>
    %cst_46 = arith.constant dense<0.000000e+00> : vector<2x128xf32>
    %86 = tpu.matmul %83, %85, %cst_46 {dimension_numbers = #tpu.dot_dimension_numbers<[1], [0], [0], [1], [0, 0, 1, 1], [], []>} : vector<2x32xf32>, vector<32x128xf32>, vector<2x128xf32> -> vector<2x128xf32>
    %87 = arith.addf %82, %86 : vector<2x128xf32>
    %c1_47 = arith.constant 1 : index
    %c0_48 = arith.constant 0 : index
    %88 = tpu.strided_load %arg10[%c1_47, %c0_48] {strides = array<i32: 50, 1>} : memref<100x32xf32, #tpu.memory_space<vmem>>, vector<2x32xf32>
    %c1_49 = arith.constant 1 : index
    %c0_50 = arith.constant 0 : index
    %c0_51 = arith.constant 0 : index
    %89 = vector.load %arg5[%c1_49, %c0_50, %c0_51] : memref<50x32x128xf32, #tpu.memory_space<vmem>>, vector<1x32x128xf32>
    %90 = vector.shape_cast %89 : vector<1x32x128xf32> to vector<32x128xf32>
    %cst_52 = arith.constant dense<0.000000e+00> : vector<2x128xf32>
    %91 = tpu.matmul %88, %90, %cst_52 {dimension_numbers = #tpu.dot_dimension_numbers<[1], [0], [0], [1], [0, 0, 1, 1], [], []>} : vector<2x32xf32>, vector<32x128xf32>, vector<2x128xf32> -> vector<2x128xf32>
    %92 = arith.addf %87, %91 : vector<2x128xf32>
    %c2_53 = arith.constant 2 : index
    %c0_54 = arith.constant 0 : index
    %93 = tpu.strided_load %arg10[%c2_53, %c0_54] {strides = array<i32: 50, 1>} : memref<100x32xf32, #tpu.memory_space<vmem>>, vector<2x32xf32>
    %c2_55 = arith.constant 2 : index
    %c0_56 = arith.constant 0 : index
    %c0_57 = arith.constant 0 : index
    %94 = vector.load %arg5[%c2_55, %c0_56, %c0_57] : memref<50x32x128xf32, #tpu.memory_space<vmem>>, vector<1x32x128xf32>
    %95 = vector.shape_cast %94 : vector<1x32x128xf32> to vector<32x128xf32>
    %cst_58 = arith.constant dense<0.000000e+00> : vector<2x128xf32>
    %96 = tpu.matmul %93, %95, %cst_58 {dimension_numbers = #tpu.dot_dimension_numbers<[1], [0], [0], [1], [0, 0, 1, 1], [], []>} : vector<2x32xf32>, vector<32x128xf32>, vector<2x128xf32> -> vector<2x128xf32>
    %97 = arith.addf %92, %96 : vector<2x128xf32>
    %c3 = arith.constant 3 : index
    %c0_59 = arith.constant 0 : index
    %98 = tpu.strided_load %arg10[%c3, %c0_59] {strides = array<i32: 50, 1>} : memref<100x32xf32, #tpu.memory_space<vmem>>, vector<2x32xf32>
    %c3_60 = arith.constant 3 : index
    %c0_61 = arith.constant 0 : index
    %c0_62 = arith.constant 0 : index
    %99 = vector.load %arg5[%c3_60, %c0_61, %c0_62] : memref<50x32x128xf32, #tpu.memory_space<vmem>>, vector<1x32x128xf32>
    %100 = vector.shape_cast %99 : vector<1x32x128xf32> to vector<32x128xf32>
    %cst_63 = arith.constant dense<0.000000e+00> : vector<2x128xf32>
    %101 = tpu.matmul %98, %100, %cst_63 {dimension_numbers = #tpu.dot_dimension_numbers<[1], [0], [0], [1], [0, 0, 1, 1], [], []>} : vector<2x32xf32>, vector<32x128xf32>, vector<2x128xf32> -> vector<2x128xf32>
    %102 = arith.addf %97, %101 : vector<2x128xf32>
    %c4 = arith.constant 4 : index
    %c0_64 = arith.constant 0 : index
    %103 = tpu.strided_load %arg10[%c4, %c0_64] {strides = array<i32: 50, 1>} : memref<100x32xf32, #tpu.memory_space<vmem>>, vector<2x32xf32>
    %c4_65 = arith.constant 4 : index
    %c0_66 = arith.constant 0 : index
    %c0_67 = arith.constant 0 : index
    %104 = vector.load %arg5[%c4_65, %c0_66, %c0_67] : memref<50x32x128xf32, #tpu.memory_space<vmem>>, vector<1x32x128xf32>
    %105 = vector.shape_cast %104 : vector<1x32x128xf32> to vector<32x128xf32>
    %cst_68 = arith.constant dense<0.000000e+00> : vector<2x128xf32>
    %106 = tpu.matmul %103, %105, %cst_68 {dimension_numbers = #tpu.dot_dimension_numbers<[1], [0], [0], [1], [0, 0, 1, 1], [], []>} : vector<2x32xf32>, vector<32x128xf32>, vector<2x128xf32> -> vector<2x128xf32>
    %107 = arith.addf %102, %106 : vector<2x128xf32>
    %c5 = arith.constant 5 : index
    %c0_69 = arith.constant 0 : index
    %108 = tpu.strided_load %arg10[%c5, %c0_69] {strides = array<i32: 50, 1>} : memref<100x32xf32, #tpu.memory_space<vmem>>, vector<2x32xf32>
    %c5_70 = arith.constant 5 : index
    %c0_71 = arith.constant 0 : index
    %c0_72 = arith.constant 0 : index
    %109 = vector.load %arg5[%c5_70, %c0_71, %c0_72] : memref<50x32x128xf32, #tpu.memory_space<vmem>>, vector<1x32x128xf32>
    %110 = vector.shape_cast %109 : vector<1x32x128xf32> to vector<32x128xf32>
    %cst_73 = arith.constant dense<0.000000e+00> : vector<2x128xf32>
    %111 = tpu.matmul %108, %110, %cst_73 {dimension_numbers = #tpu.dot_dimension_numbers<[1], [0], [0], [1], [0, 0, 1, 1], [], []>} : vector<2x32xf32>, vector<32x128xf32>, vector<2x128xf32> -> vector<2x128xf32>
    %112 = arith.addf %107, %111 : vector<2x128xf32>
    %c6 = arith.constant 6 : index
    %c0_74 = arith.constant 0 : index
    %113 = tpu.strided_load %arg10[%c6, %c0_74] {strides = array<i32: 50, 1>} : memref<100x32xf32, #tpu.memory_space<vmem>>, vector<2x32xf32>
    %c6_75 = arith.constant 6 : index
    %c0_76 = arith.constant 0 : index
    %c0_77 = arith.constant 0 : index
    %114 = vector.load %arg5[%c6_75, %c0_76, %c0_77] : memref<50x32x128xf32, #tpu.memory_space<vmem>>, vector<1x32x128xf32>
    %115 = vector.shape_cast %114 : vector<1x32x128xf32> to vector<32x128xf32>
    %cst_78 = arith.constant dense<0.000000e+00> : vector<2x128xf32>
    %116 = tpu.matmul %113, %115, %cst_78 {dimension_numbers = #tpu.dot_dimension_numbers<[1], [0], [0], [1], [0, 0, 1, 1], [], []>} : vector<2x32xf32>, vector<32x128xf32>, vector<2x128xf32> -> vector<2x128xf32>
    %117 = arith.addf %112, %116 : vector<2x128xf32>
    %c7 = arith.constant 7 : index
    %c0_79 = arith.constant 0 : index
    %118 = tpu.strided_load %arg10[%c7, %c0_79] {strides = array<i32: 50, 1>} : memref<100x32xf32, #tpu.memory_space<vmem>>, vector<2x32xf32>
    %c7_80 = arith.constant 7 : index
    %c0_81 = arith.constant 0 : index
    %c0_82 = arith.constant 0 : index
    %119 = vector.load %arg5[%c7_80, %c0_81, %c0_82] : memref<50x32x128xf32, #tpu.memory_space<vmem>>, vector<1x32x128xf32>
    %120 = vector.shape_cast %119 : vector<1x32x128xf32> to vector<32x128xf32>
    %cst_83 = arith.constant dense<0.000000e+00> : vector<2x128xf32>
    %121 = tpu.matmul %118, %120, %cst_83 {dimension_numbers = #tpu.dot_dimension_numbers<[1], [0], [0], [1], [0, 0, 1, 1], [], []>} : vector<2x32xf32>, vector<32x128xf32>, vector<2x128xf32> -> vector<2x128xf32>
    %122 = arith.addf %117, %121 : vector<2x128xf32>
    %c8 = arith.constant 8 : index
    %c0_84 = arith.constant 0 : index
    %123 = tpu.strided_load %arg10[%c8, %c0_84] {strides = array<i32: 50, 1>} : memref<100x32xf32, #tpu.memory_space<vmem>>, vector<2x32xf32>
    %c8_85 = arith.constant 8 : index
    %c0_86 = arith.constant 0 : index
    %c0_87 = arith.constant 0 : index
    %124 = vector.load %arg5[%c8_85, %c0_86, %c0_87] : memref<50x32x128xf32, #tpu.memory_space<vmem>>, vector<1x32x128xf32>
    %125 = vector.shape_cast %124 : vector<1x32x128xf32> to vector<32x128xf32>
    %cst_88 = arith.constant dense<0.000000e+00> : vector<2x128xf32>
    %126 = tpu.matmul %123, %125, %cst_88 {dimension_numbers = #tpu.dot_dimension_numbers<[1], [0], [0], [1], [0, 0, 1, 1], [], []>} : vector<2x32xf32>, vector<32x128xf32>, vector<2x128xf32> -> vector<2x128xf32>
    %127 = arith.addf %122, %126 : vector<2x128xf32>
    %c9 = arith.constant 9 : index
    %c0_89 = arith.constant 0 : index
    %128 = tpu.strided_load %arg10[%c9, %c0_89] {strides = array<i32: 50, 1>} : memref<100x32xf32, #tpu.memory_space<vmem>>, vector<2x32xf32>
    %c9_90 = arith.constant 9 : index
    %c0_91 = arith.constant 0 : index
    %c0_92 = arith.constant 0 : index
    %129 = vector.load %arg5[%c9_90, %c0_91, %c0_92] : memref<50x32x128xf32, #tpu.memory_space<vmem>>, vector<1x32x128xf32>
    %130 = vector.shape_cast %129 : vector<1x32x128xf32> to vector<32x128xf32>
    %cst_93 = arith.constant dense<0.000000e+00> : vector<2x128xf32>
    %131 = tpu.matmul %128, %130, %cst_93 {dimension_numbers = #tpu.dot_dimension_numbers<[1], [0], [0], [1], [0, 0, 1, 1], [], []>} : vector<2x32xf32>, vector<32x128xf32>, vector<2x128xf32> -> vector<2x128xf32>
    %132 = arith.addf %127, %131 : vector<2x128xf32>
    %c10 = arith.constant 10 : index
    %c0_94 = arith.constant 0 : index
    %133 = tpu.strided_load %arg10[%c10, %c0_94] {strides = array<i32: 50, 1>} : memref<100x32xf32, #tpu.memory_space<vmem>>, vector<2x32xf32>
    %c10_95 = arith.constant 10 : index
    %c0_96 = arith.constant 0 : index
    %c0_97 = arith.constant 0 : index
    %134 = vector.load %arg5[%c10_95, %c0_96, %c0_97] : memref<50x32x128xf32, #tpu.memory_space<vmem>>, vector<1x32x128xf32>
    %135 = vector.shape_cast %134 : vector<1x32x128xf32> to vector<32x128xf32>
    %cst_98 = arith.constant dense<0.000000e+00> : vector<2x128xf32>
    %136 = tpu.matmul %133, %135, %cst_98 {dimension_numbers = #tpu.dot_dimension_numbers<[1], [0], [0], [1], [0, 0, 1, 1], [], []>} : vector<2x32xf32>, vector<32x128xf32>, vector<2x128xf32> -> vector<2x128xf32>
    %137 = arith.addf %132, %136 : vector<2x128xf32>
    %c11 = arith.constant 11 : index
    %c0_99 = arith.constant 0 : index
    %138 = tpu.strided_load %arg10[%c11, %c0_99] {strides = array<i32: 50, 1>} : memref<100x32xf32, #tpu.memory_space<vmem>>, vector<2x32xf32>
    %c11_100 = arith.constant 11 : index
    %c0_101 = arith.constant 0 : index
    %c0_102 = arith.constant 0 : index
    %139 = vector.load %arg5[%c11_100, %c0_101, %c0_102] : memref<50x32x128xf32, #tpu.memory_space<vmem>>, vector<1x32x128xf32>
    %140 = vector.shape_cast %139 : vector<1x32x128xf32> to vector<32x128xf32>
    %cst_103 = arith.constant dense<0.000000e+00> : vector<2x128xf32>
    %141 = tpu.matmul %138, %140, %cst_103 {dimension_numbers = #tpu.dot_dimension_numbers<[1], [0], [0], [1], [0, 0, 1, 1], [], []>} : vector<2x32xf32>, vector<32x128xf32>, vector<2x128xf32> -> vector<2x128xf32>
    %142 = arith.addf %137, %141 : vector<2x128xf32>
    %c12 = arith.constant 12 : index
    %c0_104 = arith.constant 0 : index
    %143 = tpu.strided_load %arg10[%c12, %c0_104] {strides = array<i32: 50, 1>} : memref<100x32xf32, #tpu.memory_space<vmem>>, vector<2x32xf32>
    %c12_105 = arith.constant 12 : index
    %c0_106 = arith.constant 0 : index
    %c0_107 = arith.constant 0 : index
    %144 = vector.load %arg5[%c12_105, %c0_106, %c0_107] : memref<50x32x128xf32, #tpu.memory_space<vmem>>, vector<1x32x128xf32>
    %145 = vector.shape_cast %144 : vector<1x32x128xf32> to vector<32x128xf32>
    %cst_108 = arith.constant dense<0.000000e+00> : vector<2x128xf32>
    %146 = tpu.matmul %143, %145, %cst_108 {dimension_numbers = #tpu.dot_dimension_numbers<[1], [0], [0], [1], [0, 0, 1, 1], [], []>} : vector<2x32xf32>, vector<32x128xf32>, vector<2x128xf32> -> vector<2x128xf32>
    %147 = arith.addf %142, %146 : vector<2x128xf32>
    %c13 = arith.constant 13 : index
    %c0_109 = arith.constant 0 : index
    %148 = tpu.strided_load %arg10[%c13, %c0_109] {strides = array<i32: 50, 1>} : memref<100x32xf32, #tpu.memory_space<vmem>>, vector<2x32xf32>
    %c13_110 = arith.constant 13 : index
    %c0_111 = arith.constant 0 : index
    %c0_112 = arith.constant 0 : index
    %149 = vector.load %arg5[%c13_110, %c0_111, %c0_112] : memref<50x32x128xf32, #tpu.memory_space<vmem>>, vector<1x32x128xf32>
    %150 = vector.shape_cast %149 : vector<1x32x128xf32> to vector<32x128xf32>
    %cst_113 = arith.constant dense<0.000000e+00> : vector<2x128xf32>
    %151 = tpu.matmul %148, %150, %cst_113 {dimension_numbers = #tpu.dot_dimension_numbers<[1], [0], [0], [1], [0, 0, 1, 1], [], []>} : vector<2x32xf32>, vector<32x128xf32>, vector<2x128xf32> -> vector<2x128xf32>
    %152 = arith.addf %147, %151 : vector<2x128xf32>
    %c14 = arith.constant 14 : index
    %c0_114 = arith.constant 0 : index
    %153 = tpu.strided_load %arg10[%c14, %c0_114] {strides = array<i32: 50, 1>} : memref<100x32xf32, #tpu.memory_space<vmem>>, vector<2x32xf32>
    %c14_115 = arith.constant 14 : index
    %c0_116 = arith.constant 0 : index
    %c0_117 = arith.constant 0 : index
    %154 = vector.load %arg5[%c14_115, %c0_116, %c0_117] : memref<50x32x128xf32, #tpu.memory_space<vmem>>, vector<1x32x128xf32>
    %155 = vector.shape_cast %154 : vector<1x32x128xf32> to vector<32x128xf32>
    %cst_118 = arith.constant dense<0.000000e+00> : vector<2x128xf32>
    %156 = tpu.matmul %153, %155, %cst_118 {dimension_numbers = #tpu.dot_dimension_numbers<[1], [0], [0], [1], [0, 0, 1, 1], [], []>} : vector<2x32xf32>, vector<32x128xf32>, vector<2x128xf32> -> vector<2x128xf32>
    %157 = arith.addf %152, %156 : vector<2x128xf32>
    %c15 = arith.constant 15 : index
    %c0_119 = arith.constant 0 : index
    %158 = tpu.strided_load %arg10[%c15, %c0_119] {strides = array<i32: 50, 1>} : memref<100x32xf32, #tpu.memory_space<vmem>>, vector<2x32xf32>
    %c15_120 = arith.constant 15 : index
    %c0_121 = arith.constant 0 : index
    %c0_122 = arith.constant 0 : index
    %159 = vector.load %arg5[%c15_120, %c0_121, %c0_122] : memref<50x32x128xf32, #tpu.memory_space<vmem>>, vector<1x32x128xf32>
    %160 = vector.shape_cast %159 : vector<1x32x128xf32> to vector<32x128xf32>
    %cst_123 = arith.constant dense<0.000000e+00> : vector<2x128xf32>
    %161 = tpu.matmul %158, %160, %cst_123 {dimension_numbers = #tpu.dot_dimension_numbers<[1], [0], [0], [1], [0, 0, 1, 1], [], []>} : vector<2x32xf32>, vector<32x128xf32>, vector<2x128xf32> -> vector<2x128xf32>
    %162 = arith.addf %157, %161 : vector<2x128xf32>
    %c16 = arith.constant 16 : index
    %c0_124 = arith.constant 0 : index
    %163 = tpu.strided_load %arg10[%c16, %c0_124] {strides = array<i32: 50, 1>} : memref<100x32xf32, #tpu.memory_space<vmem>>, vector<2x32xf32>
    %c16_125 = arith.constant 16 : index
    %c0_126 = arith.constant 0 : index
    %c0_127 = arith.constant 0 : index
    %164 = vector.load %arg5[%c16_125, %c0_126, %c0_127] : memref<50x32x128xf32, #tpu.memory_space<vmem>>, vector<1x32x128xf32>
    %165 = vector.shape_cast %164 : vector<1x32x128xf32> to vector<32x128xf32>
    %cst_128 = arith.constant dense<0.000000e+00> : vector<2x128xf32>
    %166 = tpu.matmul %163, %165, %cst_128 {dimension_numbers = #tpu.dot_dimension_numbers<[1], [0], [0], [1], [0, 0, 1, 1], [], []>} : vector<2x32xf32>, vector<32x128xf32>, vector<2x128xf32> -> vector<2x128xf32>
    %167 = arith.addf %162, %166 : vector<2x128xf32>
    %c17 = arith.constant 17 : index
    %c0_129 = arith.constant 0 : index
    %168 = tpu.strided_load %arg10[%c17, %c0_129] {strides = array<i32: 50, 1>} : memref<100x32xf32, #tpu.memory_space<vmem>>, vector<2x32xf32>
    %c17_130 = arith.constant 17 : index
    %c0_131 = arith.constant 0 : index
    %c0_132 = arith.constant 0 : index
    %169 = vector.load %arg5[%c17_130, %c0_131, %c0_132] : memref<50x32x128xf32, #tpu.memory_space<vmem>>, vector<1x32x128xf32>
    %170 = vector.shape_cast %169 : vector<1x32x128xf32> to vector<32x128xf32>
    %cst_133 = arith.constant dense<0.000000e+00> : vector<2x128xf32>
    %171 = tpu.matmul %168, %170, %cst_133 {dimension_numbers = #tpu.dot_dimension_numbers<[1], [0], [0], [1], [0, 0, 1, 1], [], []>} : vector<2x32xf32>, vector<32x128xf32>, vector<2x128xf32> -> vector<2x128xf32>
    %172 = arith.addf %167, %171 : vector<2x128xf32>
    %c18 = arith.constant 18 : index
    %c0_134 = arith.constant 0 : index
    %173 = tpu.strided_load %arg10[%c18, %c0_134] {strides = array<i32: 50, 1>} : memref<100x32xf32, #tpu.memory_space<vmem>>, vector<2x32xf32>
    %c18_135 = arith.constant 18 : index
    %c0_136 = arith.constant 0 : index
    %c0_137 = arith.constant 0 : index
    %174 = vector.load %arg5[%c18_135, %c0_136, %c0_137] : memref<50x32x128xf32, #tpu.memory_space<vmem>>, vector<1x32x128xf32>
    %175 = vector.shape_cast %174 : vector<1x32x128xf32> to vector<32x128xf32>
    %cst_138 = arith.constant dense<0.000000e+00> : vector<2x128xf32>
    %176 = tpu.matmul %173, %175, %cst_138 {dimension_numbers = #tpu.dot_dimension_numbers<[1], [0], [0], [1], [0, 0, 1, 1], [], []>} : vector<2x32xf32>, vector<32x128xf32>, vector<2x128xf32> -> vector<2x128xf32>
    %177 = arith.addf %172, %176 : vector<2x128xf32>
    %c19 = arith.constant 19 : index
    %c0_139 = arith.constant 0 : index
    %178 = tpu.strided_load %arg10[%c19, %c0_139] {strides = array<i32: 50, 1>} : memref<100x32xf32, #tpu.memory_space<vmem>>, vector<2x32xf32>
    %c19_140 = arith.constant 19 : index
    %c0_141 = arith.constant 0 : index
    %c0_142 = arith.constant 0 : index
    %179 = vector.load %arg5[%c19_140, %c0_141, %c0_142] : memref<50x32x128xf32, #tpu.memory_space<vmem>>, vector<1x32x128xf32>
    %180 = vector.shape_cast %179 : vector<1x32x128xf32> to vector<32x128xf32>
    %cst_143 = arith.constant dense<0.000000e+00> : vector<2x128xf32>
    %181 = tpu.matmul %178, %180, %cst_143 {dimension_numbers = #tpu.dot_dimension_numbers<[1], [0], [0], [1], [0, 0, 1, 1], [], []>} : vector<2x32xf32>, vector<32x128xf32>, vector<2x128xf32> -> vector<2x128xf32>
    %182 = arith.addf %177, %181 : vector<2x128xf32>
    %c20 = arith.constant 20 : index
    %c0_144 = arith.constant 0 : index
    %183 = tpu.strided_load %arg10[%c20, %c0_144] {strides = array<i32: 50, 1>} : memref<100x32xf32, #tpu.memory_space<vmem>>, vector<2x32xf32>
    %c20_145 = arith.constant 20 : index
    %c0_146 = arith.constant 0 : index
    %c0_147 = arith.constant 0 : index
    %184 = vector.load %arg5[%c20_145, %c0_146, %c0_147] : memref<50x32x128xf32, #tpu.memory_space<vmem>>, vector<1x32x128xf32>
    %185 = vector.shape_cast %184 : vector<1x32x128xf32> to vector<32x128xf32>
    %cst_148 = arith.constant dense<0.000000e+00> : vector<2x128xf32>
    %186 = tpu.matmul %183, %185, %cst_148 {dimension_numbers = #tpu.dot_dimension_numbers<[1], [0], [0], [1], [0, 0, 1, 1], [], []>} : vector<2x32xf32>, vector<32x128xf32>, vector<2x128xf32> -> vector<2x128xf32>
    %187 = arith.addf %182, %186 : vector<2x128xf32>
    %c21 = arith.constant 21 : index
    %c0_149 = arith.constant 0 : index
    %188 = tpu.strided_load %arg10[%c21, %c0_149] {strides = array<i32: 50, 1>} : memref<100x32xf32, #tpu.memory_space<vmem>>, vector<2x32xf32>
    %c21_150 = arith.constant 21 : index
    %c0_151 = arith.constant 0 : index
    %c0_152 = arith.constant 0 : index
    %189 = vector.load %arg5[%c21_150, %c0_151, %c0_152] : memref<50x32x128xf32, #tpu.memory_space<vmem>>, vector<1x32x128xf32>
    %190 = vector.shape_cast %189 : vector<1x32x128xf32> to vector<32x128xf32>
    %cst_153 = arith.constant dense<0.000000e+00> : vector<2x128xf32>
    %191 = tpu.matmul %188, %190, %cst_153 {dimension_numbers = #tpu.dot_dimension_numbers<[1], [0], [0], [1], [0, 0, 1, 1], [], []>} : vector<2x32xf32>, vector<32x128xf32>, vector<2x128xf32> -> vector<2x128xf32>
    %192 = arith.addf %187, %191 : vector<2x128xf32>
    %c22 = arith.constant 22 : index
    %c0_154 = arith.constant 0 : index
    %193 = tpu.strided_load %arg10[%c22, %c0_154] {strides = array<i32: 50, 1>} : memref<100x32xf32, #tpu.memory_space<vmem>>, vector<2x32xf32>
    %c22_155 = arith.constant 22 : index
    %c0_156 = arith.constant 0 : index
    %c0_157 = arith.constant 0 : index
    %194 = vector.load %arg5[%c22_155, %c0_156, %c0_157] : memref<50x32x128xf32, #tpu.memory_space<vmem>>, vector<1x32x128xf32>
    %195 = vector.shape_cast %194 : vector<1x32x128xf32> to vector<32x128xf32>
    %cst_158 = arith.constant dense<0.000000e+00> : vector<2x128xf32>
    %196 = tpu.matmul %193, %195, %cst_158 {dimension_numbers = #tpu.dot_dimension_numbers<[1], [0], [0], [1], [0, 0, 1, 1], [], []>} : vector<2x32xf32>, vector<32x128xf32>, vector<2x128xf32> -> vector<2x128xf32>
    %197 = arith.addf %192, %196 : vector<2x128xf32>
    %c23 = arith.constant 23 : index
    %c0_159 = arith.constant 0 : index
    %198 = tpu.strided_load %arg10[%c23, %c0_159] {strides = array<i32: 50, 1>} : memref<100x32xf32, #tpu.memory_space<vmem>>, vector<2x32xf32>
    %c23_160 = arith.constant 23 : index
    %c0_161 = arith.constant 0 : index
    %c0_162 = arith.constant 0 : index
    %199 = vector.load %arg5[%c23_160, %c0_161, %c0_162] : memref<50x32x128xf32, #tpu.memory_space<vmem>>, vector<1x32x128xf32>
    %200 = vector.shape_cast %199 : vector<1x32x128xf32> to vector<32x128xf32>
    %cst_163 = arith.constant dense<0.000000e+00> : vector<2x128xf32>
    %201 = tpu.matmul %198, %200, %cst_163 {dimension_numbers = #tpu.dot_dimension_numbers<[1], [0], [0], [1], [0, 0, 1, 1], [], []>} : vector<2x32xf32>, vector<32x128xf32>, vector<2x128xf32> -> vector<2x128xf32>
    %202 = arith.addf %197, %201 : vector<2x128xf32>
    %c24 = arith.constant 24 : index
    %c0_164 = arith.constant 0 : index
    %203 = tpu.strided_load %arg10[%c24, %c0_164] {strides = array<i32: 50, 1>} : memref<100x32xf32, #tpu.memory_space<vmem>>, vector<2x32xf32>
    %c24_165 = arith.constant 24 : index
    %c0_166 = arith.constant 0 : index
    %c0_167 = arith.constant 0 : index
    %204 = vector.load %arg5[%c24_165, %c0_166, %c0_167] : memref<50x32x128xf32, #tpu.memory_space<vmem>>, vector<1x32x128xf32>
    %205 = vector.shape_cast %204 : vector<1x32x128xf32> to vector<32x128xf32>
    %cst_168 = arith.constant dense<0.000000e+00> : vector<2x128xf32>
    %206 = tpu.matmul %203, %205, %cst_168 {dimension_numbers = #tpu.dot_dimension_numbers<[1], [0], [0], [1], [0, 0, 1, 1], [], []>} : vector<2x32xf32>, vector<32x128xf32>, vector<2x128xf32> -> vector<2x128xf32>
    %207 = arith.addf %202, %206 : vector<2x128xf32>
    %c25 = arith.constant 25 : index
    %c0_169 = arith.constant 0 : index
    %208 = tpu.strided_load %arg10[%c25, %c0_169] {strides = array<i32: 50, 1>} : memref<100x32xf32, #tpu.memory_space<vmem>>, vector<2x32xf32>
    %c25_170 = arith.constant 25 : index
    %c0_171 = arith.constant 0 : index
    %c0_172 = arith.constant 0 : index
    %209 = vector.load %arg5[%c25_170, %c0_171, %c0_172] : memref<50x32x128xf32, #tpu.memory_space<vmem>>, vector<1x32x128xf32>
    %210 = vector.shape_cast %209 : vector<1x32x128xf32> to vector<32x128xf32>
    %cst_173 = arith.constant dense<0.000000e+00> : vector<2x128xf32>
    %211 = tpu.matmul %208, %210, %cst_173 {dimension_numbers = #tpu.dot_dimension_numbers<[1], [0], [0], [1], [0, 0, 1, 1], [], []>} : vector<2x32xf32>, vector<32x128xf32>, vector<2x128xf32> -> vector<2x128xf32>
    %212 = arith.addf %207, %211 : vector<2x128xf32>
    %c26 = arith.constant 26 : index
    %c0_174 = arith.constant 0 : index
    %213 = tpu.strided_load %arg10[%c26, %c0_174] {strides = array<i32: 50, 1>} : memref<100x32xf32, #tpu.memory_space<vmem>>, vector<2x32xf32>
    %c26_175 = arith.constant 26 : index
    %c0_176 = arith.constant 0 : index
    %c0_177 = arith.constant 0 : index
    %214 = vector.load %arg5[%c26_175, %c0_176, %c0_177] : memref<50x32x128xf32, #tpu.memory_space<vmem>>, vector<1x32x128xf32>
    %215 = vector.shape_cast %214 : vector<1x32x128xf32> to vector<32x128xf32>
    %cst_178 = arith.constant dense<0.000000e+00> : vector<2x128xf32>
    %216 = tpu.matmul %213, %215, %cst_178 {dimension_numbers = #tpu.dot_dimension_numbers<[1], [0], [0], [1], [0, 0, 1, 1], [], []>} : vector<2x32xf32>, vector<32x128xf32>, vector<2x128xf32> -> vector<2x128xf32>
    %217 = arith.addf %212, %216 : vector<2x128xf32>
    %c27 = arith.constant 27 : index
    %c0_179 = arith.constant 0 : index
    %218 = tpu.strided_load %arg10[%c27, %c0_179] {strides = array<i32: 50, 1>} : memref<100x32xf32, #tpu.memory_space<vmem>>, vector<2x32xf32>
    %c27_180 = arith.constant 27 : index
    %c0_181 = arith.constant 0 : index
    %c0_182 = arith.constant 0 : index
    %219 = vector.load %arg5[%c27_180, %c0_181, %c0_182] : memref<50x32x128xf32, #tpu.memory_space<vmem>>, vector<1x32x128xf32>
    %220 = vector.shape_cast %219 : vector<1x32x128xf32> to vector<32x128xf32>
    %cst_183 = arith.constant dense<0.000000e+00> : vector<2x128xf32>
    %221 = tpu.matmul %218, %220, %cst_183 {dimension_numbers = #tpu.dot_dimension_numbers<[1], [0], [0], [1], [0, 0, 1, 1], [], []>} : vector<2x32xf32>, vector<32x128xf32>, vector<2x128xf32> -> vector<2x128xf32>
    %222 = arith.addf %217, %221 : vector<2x128xf32>
    %c28 = arith.constant 28 : index
    %c0_184 = arith.constant 0 : index
    %223 = tpu.strided_load %arg10[%c28, %c0_184] {strides = array<i32: 50, 1>} : memref<100x32xf32, #tpu.memory_space<vmem>>, vector<2x32xf32>
    %c28_185 = arith.constant 28 : index
    %c0_186 = arith.constant 0 : index
    %c0_187 = arith.constant 0 : index
    %224 = vector.load %arg5[%c28_185, %c0_186, %c0_187] : memref<50x32x128xf32, #tpu.memory_space<vmem>>, vector<1x32x128xf32>
    %225 = vector.shape_cast %224 : vector<1x32x128xf32> to vector<32x128xf32>
    %cst_188 = arith.constant dense<0.000000e+00> : vector<2x128xf32>
    %226 = tpu.matmul %223, %225, %cst_188 {dimension_numbers = #tpu.dot_dimension_numbers<[1], [0], [0], [1], [0, 0, 1, 1], [], []>} : vector<2x32xf32>, vector<32x128xf32>, vector<2x128xf32> -> vector<2x128xf32>
    %227 = arith.addf %222, %226 : vector<2x128xf32>
    %c29 = arith.constant 29 : index
    %c0_189 = arith.constant 0 : index
    %228 = tpu.strided_load %arg10[%c29, %c0_189] {strides = array<i32: 50, 1>} : memref<100x32xf32, #tpu.memory_space<vmem>>, vector<2x32xf32>
    %c29_190 = arith.constant 29 : index
    %c0_191 = arith.constant 0 : index
    %c0_192 = arith.constant 0 : index
    %229 = vector.load %arg5[%c29_190, %c0_191, %c0_192] : memref<50x32x128xf32, #tpu.memory_space<vmem>>, vector<1x32x128xf32>
    %230 = vector.shape_cast %229 : vector<1x32x128xf32> to vector<32x128xf32>
    %cst_193 = arith.constant dense<0.000000e+00> : vector<2x128xf32>
    %231 = tpu.matmul %228, %230, %cst_193 {dimension_numbers = #tpu.dot_dimension_numbers<[1], [0], [0], [1], [0, 0, 1, 1], [], []>} : vector<2x32xf32>, vector<32x128xf32>, vector<2x128xf32> -> vector<2x128xf32>
    %232 = arith.addf %227, %231 : vector<2x128xf32>
    %c30 = arith.constant 30 : index
    %c0_194 = arith.constant 0 : index
    %233 = tpu.strided_load %arg10[%c30, %c0_194] {strides = array<i32: 50, 1>} : memref<100x32xf32, #tpu.memory_space<vmem>>, vector<2x32xf32>
    %c30_195 = arith.constant 30 : index
    %c0_196 = arith.constant 0 : index
    %c0_197 = arith.constant 0 : index
    %234 = vector.load %arg5[%c30_195, %c0_196, %c0_197] : memref<50x32x128xf32, #tpu.memory_space<vmem>>, vector<1x32x128xf32>
    %235 = vector.shape_cast %234 : vector<1x32x128xf32> to vector<32x128xf32>
    %cst_198 = arith.constant dense<0.000000e+00> : vector<2x128xf32>
    %236 = tpu.matmul %233, %235, %cst_198 {dimension_numbers = #tpu.dot_dimension_numbers<[1], [0], [0], [1], [0, 0, 1, 1], [], []>} : vector<2x32xf32>, vector<32x128xf32>, vector<2x128xf32> -> vector<2x128xf32>
    %237 = arith.addf %232, %236 : vector<2x128xf32>
    %c31 = arith.constant 31 : index
    %c0_199 = arith.constant 0 : index
    %238 = tpu.strided_load %arg10[%c31, %c0_199] {strides = array<i32: 50, 1>} : memref<100x32xf32, #tpu.memory_space<vmem>>, vector<2x32xf32>
    %c31_200 = arith.constant 31 : index
    %c0_201 = arith.constant 0 : index
    %c0_202 = arith.constant 0 : index
    %239 = vector.load %arg5[%c31_200, %c0_201, %c0_202] : memref<50x32x128xf32, #tpu.memory_space<vmem>>, vector<1x32x128xf32>
    %240 = vector.shape_cast %239 : vector<1x32x128xf32> to vector<32x128xf32>
    %cst_203 = arith.constant dense<0.000000e+00> : vector<2x128xf32>
    %241 = tpu.matmul %238, %240, %cst_203 {dimension_numbers = #tpu.dot_dimension_numbers<[1], [0], [0], [1], [0, 0, 1, 1], [], []>} : vector<2x32xf32>, vector<32x128xf32>, vector<2x128xf32> -> vector<2x128xf32>
    %242 = arith.addf %237, %241 : vector<2x128xf32>
    %c32 = arith.constant 32 : index
    %c0_204 = arith.constant 0 : index
    %243 = tpu.strided_load %arg10[%c32, %c0_204] {strides = array<i32: 50, 1>} : memref<100x32xf32, #tpu.memory_space<vmem>>, vector<2x32xf32>
    %c32_205 = arith.constant 32 : index
    %c0_206 = arith.constant 0 : index
    %c0_207 = arith.constant 0 : index
    %244 = vector.load %arg5[%c32_205, %c0_206, %c0_207] : memref<50x32x128xf32, #tpu.memory_space<vmem>>, vector<1x32x128xf32>
    %245 = vector.shape_cast %244 : vector<1x32x128xf32> to vector<32x128xf32>
    %cst_208 = arith.constant dense<0.000000e+00> : vector<2x128xf32>
    %246 = tpu.matmul %243, %245, %cst_208 {dimension_numbers = #tpu.dot_dimension_numbers<[1], [0], [0], [1], [0, 0, 1, 1], [], []>} : vector<2x32xf32>, vector<32x128xf32>, vector<2x128xf32> -> vector<2x128xf32>
    %247 = arith.addf %242, %246 : vector<2x128xf32>
    %c33 = arith.constant 33 : index
    %c0_209 = arith.constant 0 : index
    %248 = tpu.strided_load %arg10[%c33, %c0_209] {strides = array<i32: 50, 1>} : memref<100x32xf32, #tpu.memory_space<vmem>>, vector<2x32xf32>
    %c33_210 = arith.constant 33 : index
    %c0_211 = arith.constant 0 : index
    %c0_212 = arith.constant 0 : index
    %249 = vector.load %arg5[%c33_210, %c0_211, %c0_212] : memref<50x32x128xf32, #tpu.memory_space<vmem>>, vector<1x32x128xf32>
    %250 = vector.shape_cast %249 : vector<1x32x128xf32> to vector<32x128xf32>
    %cst_213 = arith.constant dense<0.000000e+00> : vector<2x128xf32>
    %251 = tpu.matmul %248, %250, %cst_213 {dimension_numbers = #tpu.dot_dimension_numbers<[1], [0], [0], [1], [0, 0, 1, 1], [], []>} : vector<2x32xf32>, vector<32x128xf32>, vector<2x128xf32> -> vector<2x128xf32>
    %252 = arith.addf %247, %251 : vector<2x128xf32>
    %c34 = arith.constant 34 : index
    %c0_214 = arith.constant 0 : index
    %253 = tpu.strided_load %arg10[%c34, %c0_214] {strides = array<i32: 50, 1>} : memref<100x32xf32, #tpu.memory_space<vmem>>, vector<2x32xf32>
    %c34_215 = arith.constant 34 : index
    %c0_216 = arith.constant 0 : index
    %c0_217 = arith.constant 0 : index
    %254 = vector.load %arg5[%c34_215, %c0_216, %c0_217] : memref<50x32x128xf32, #tpu.memory_space<vmem>>, vector<1x32x128xf32>
    %255 = vector.shape_cast %254 : vector<1x32x128xf32> to vector<32x128xf32>
    %cst_218 = arith.constant dense<0.000000e+00> : vector<2x128xf32>
    %256 = tpu.matmul %253, %255, %cst_218 {dimension_numbers = #tpu.dot_dimension_numbers<[1], [0], [0], [1], [0, 0, 1, 1], [], []>} : vector<2x32xf32>, vector<32x128xf32>, vector<2x128xf32> -> vector<2x128xf32>
    %257 = arith.addf %252, %256 : vector<2x128xf32>
    %c35 = arith.constant 35 : index
    %c0_219 = arith.constant 0 : index
    %258 = tpu.strided_load %arg10[%c35, %c0_219] {strides = array<i32: 50, 1>} : memref<100x32xf32, #tpu.memory_space<vmem>>, vector<2x32xf32>
    %c35_220 = arith.constant 35 : index
    %c0_221 = arith.constant 0 : index
    %c0_222 = arith.constant 0 : index
    %259 = vector.load %arg5[%c35_220, %c0_221, %c0_222] : memref<50x32x128xf32, #tpu.memory_space<vmem>>, vector<1x32x128xf32>
    %260 = vector.shape_cast %259 : vector<1x32x128xf32> to vector<32x128xf32>
    %cst_223 = arith.constant dense<0.000000e+00> : vector<2x128xf32>
    %261 = tpu.matmul %258, %260, %cst_223 {dimension_numbers = #tpu.dot_dimension_numbers<[1], [0], [0], [1], [0, 0, 1, 1], [], []>} : vector<2x32xf32>, vector<32x128xf32>, vector<2x128xf32> -> vector<2x128xf32>
    %262 = arith.addf %257, %261 : vector<2x128xf32>
    %c36 = arith.constant 36 : index
    %c0_224 = arith.constant 0 : index
    %263 = tpu.strided_load %arg10[%c36, %c0_224] {strides = array<i32: 50, 1>} : memref<100x32xf32, #tpu.memory_space<vmem>>, vector<2x32xf32>
    %c36_225 = arith.constant 36 : index
    %c0_226 = arith.constant 0 : index
    %c0_227 = arith.constant 0 : index
    %264 = vector.load %arg5[%c36_225, %c0_226, %c0_227] : memref<50x32x128xf32, #tpu.memory_space<vmem>>, vector<1x32x128xf32>
    %265 = vector.shape_cast %264 : vector<1x32x128xf32> to vector<32x128xf32>
    %cst_228 = arith.constant dense<0.000000e+00> : vector<2x128xf32>
    %266 = tpu.matmul %263, %265, %cst_228 {dimension_numbers = #tpu.dot_dimension_numbers<[1], [0], [0], [1], [0, 0, 1, 1], [], []>} : vector<2x32xf32>, vector<32x128xf32>, vector<2x128xf32> -> vector<2x128xf32>
    %267 = arith.addf %262, %266 : vector<2x128xf32>
    %c37 = arith.constant 37 : index
    %c0_229 = arith.constant 0 : index
    %268 = tpu.strided_load %arg10[%c37, %c0_229] {strides = array<i32: 50, 1>} : memref<100x32xf32, #tpu.memory_space<vmem>>, vector<2x32xf32>
    %c37_230 = arith.constant 37 : index
    %c0_231 = arith.constant 0 : index
    %c0_232 = arith.constant 0 : index
    %269 = vector.load %arg5[%c37_230, %c0_231, %c0_232] : memref<50x32x128xf32, #tpu.memory_space<vmem>>, vector<1x32x128xf32>
    %270 = vector.shape_cast %269 : vector<1x32x128xf32> to vector<32x128xf32>
    %cst_233 = arith.constant dense<0.000000e+00> : vector<2x128xf32>
    %271 = tpu.matmul %268, %270, %cst_233 {dimension_numbers = #tpu.dot_dimension_numbers<[1], [0], [0], [1], [0, 0, 1, 1], [], []>} : vector<2x32xf32>, vector<32x128xf32>, vector<2x128xf32> -> vector<2x128xf32>
    %272 = arith.addf %267, %271 : vector<2x128xf32>
    %c38 = arith.constant 38 : index
    %c0_234 = arith.constant 0 : index
    %273 = tpu.strided_load %arg10[%c38, %c0_234] {strides = array<i32: 50, 1>} : memref<100x32xf32, #tpu.memory_space<vmem>>, vector<2x32xf32>
    %c38_235 = arith.constant 38 : index
    %c0_236 = arith.constant 0 : index
    %c0_237 = arith.constant 0 : index
    %274 = vector.load %arg5[%c38_235, %c0_236, %c0_237] : memref<50x32x128xf32, #tpu.memory_space<vmem>>, vector<1x32x128xf32>
    %275 = vector.shape_cast %274 : vector<1x32x128xf32> to vector<32x128xf32>
    %cst_238 = arith.constant dense<0.000000e+00> : vector<2x128xf32>
    %276 = tpu.matmul %273, %275, %cst_238 {dimension_numbers = #tpu.dot_dimension_numbers<[1], [0], [0], [1], [0, 0, 1, 1], [], []>} : vector<2x32xf32>, vector<32x128xf32>, vector<2x128xf32> -> vector<2x128xf32>
    %277 = arith.addf %272, %276 : vector<2x128xf32>
    %c39 = arith.constant 39 : index
    %c0_239 = arith.constant 0 : index
    %278 = tpu.strided_load %arg10[%c39, %c0_239] {strides = array<i32: 50, 1>} : memref<100x32xf32, #tpu.memory_space<vmem>>, vector<2x32xf32>
    %c39_240 = arith.constant 39 : index
    %c0_241 = arith.constant 0 : index
    %c0_242 = arith.constant 0 : index
    %279 = vector.load %arg5[%c39_240, %c0_241, %c0_242] : memref<50x32x128xf32, #tpu.memory_space<vmem>>, vector<1x32x128xf32>
    %280 = vector.shape_cast %279 : vector<1x32x128xf32> to vector<32x128xf32>
    %cst_243 = arith.constant dense<0.000000e+00> : vector<2x128xf32>
    %281 = tpu.matmul %278, %280, %cst_243 {dimension_numbers = #tpu.dot_dimension_numbers<[1], [0], [0], [1], [0, 0, 1, 1], [], []>} : vector<2x32xf32>, vector<32x128xf32>, vector<2x128xf32> -> vector<2x128xf32>
    %282 = arith.addf %277, %281 : vector<2x128xf32>
    %c40 = arith.constant 40 : index
    %c0_244 = arith.constant 0 : index
    %283 = tpu.strided_load %arg10[%c40, %c0_244] {strides = array<i32: 50, 1>} : memref<100x32xf32, #tpu.memory_space<vmem>>, vector<2x32xf32>
    %c40_245 = arith.constant 40 : index
    %c0_246 = arith.constant 0 : index
    %c0_247 = arith.constant 0 : index
    %284 = vector.load %arg5[%c40_245, %c0_246, %c0_247] : memref<50x32x128xf32, #tpu.memory_space<vmem>>, vector<1x32x128xf32>
    %285 = vector.shape_cast %284 : vector<1x32x128xf32> to vector<32x128xf32>
    %cst_248 = arith.constant dense<0.000000e+00> : vector<2x128xf32>
    %286 = tpu.matmul %283, %285, %cst_248 {dimension_numbers = #tpu.dot_dimension_numbers<[1], [0], [0], [1], [0, 0, 1, 1], [], []>} : vector<2x32xf32>, vector<32x128xf32>, vector<2x128xf32> -> vector<2x128xf32>
    %287 = arith.addf %282, %286 : vector<2x128xf32>
    %c41 = arith.constant 41 : index
    %c0_249 = arith.constant 0 : index
    %288 = tpu.strided_load %arg10[%c41, %c0_249] {strides = array<i32: 50, 1>} : memref<100x32xf32, #tpu.memory_space<vmem>>, vector<2x32xf32>
    %c41_250 = arith.constant 41 : index
    %c0_251 = arith.constant 0 : index
    %c0_252 = arith.constant 0 : index
    %289 = vector.load %arg5[%c41_250, %c0_251, %c0_252] : memref<50x32x128xf32, #tpu.memory_space<vmem>>, vector<1x32x128xf32>
    %290 = vector.shape_cast %289 : vector<1x32x128xf32> to vector<32x128xf32>
    %cst_253 = arith.constant dense<0.000000e+00> : vector<2x128xf32>
    %291 = tpu.matmul %288, %290, %cst_253 {dimension_numbers = #tpu.dot_dimension_numbers<[1], [0], [0], [1], [0, 0, 1, 1], [], []>} : vector<2x32xf32>, vector<32x128xf32>, vector<2x128xf32> -> vector<2x128xf32>
    %292 = arith.addf %287, %291 : vector<2x128xf32>
    %c42 = arith.constant 42 : index
    %c0_254 = arith.constant 0 : index
    %293 = tpu.strided_load %arg10[%c42, %c0_254] {strides = array<i32: 50, 1>} : memref<100x32xf32, #tpu.memory_space<vmem>>, vector<2x32xf32>
    %c42_255 = arith.constant 42 : index
    %c0_256 = arith.constant 0 : index
    %c0_257 = arith.constant 0 : index
    %294 = vector.load %arg5[%c42_255, %c0_256, %c0_257] : memref<50x32x128xf32, #tpu.memory_space<vmem>>, vector<1x32x128xf32>
    %295 = vector.shape_cast %294 : vector<1x32x128xf32> to vector<32x128xf32>
    %cst_258 = arith.constant dense<0.000000e+00> : vector<2x128xf32>
    %296 = tpu.matmul %293, %295, %cst_258 {dimension_numbers = #tpu.dot_dimension_numbers<[1], [0], [0], [1], [0, 0, 1, 1], [], []>} : vector<2x32xf32>, vector<32x128xf32>, vector<2x128xf32> -> vector<2x128xf32>
    %297 = arith.addf %292, %296 : vector<2x128xf32>
    %c43 = arith.constant 43 : index
    %c0_259 = arith.constant 0 : index
    %298 = tpu.strided_load %arg10[%c43, %c0_259] {strides = array<i32: 50, 1>} : memref<100x32xf32, #tpu.memory_space<vmem>>, vector<2x32xf32>
    %c43_260 = arith.constant 43 : index
    %c0_261 = arith.constant 0 : index
    %c0_262 = arith.constant 0 : index
    %299 = vector.load %arg5[%c43_260, %c0_261, %c0_262] : memref<50x32x128xf32, #tpu.memory_space<vmem>>, vector<1x32x128xf32>
    %300 = vector.shape_cast %299 : vector<1x32x128xf32> to vector<32x128xf32>
    %cst_263 = arith.constant dense<0.000000e+00> : vector<2x128xf32>
    %301 = tpu.matmul %298, %300, %cst_263 {dimension_numbers = #tpu.dot_dimension_numbers<[1], [0], [0], [1], [0, 0, 1, 1], [], []>} : vector<2x32xf32>, vector<32x128xf32>, vector<2x128xf32> -> vector<2x128xf32>
    %302 = arith.addf %297, %301 : vector<2x128xf32>
    %c44 = arith.constant 44 : index
    %c0_264 = arith.constant 0 : index
    %303 = tpu.strided_load %arg10[%c44, %c0_264] {strides = array<i32: 50, 1>} : memref<100x32xf32, #tpu.memory_space<vmem>>, vector<2x32xf32>
    %c44_265 = arith.constant 44 : index
    %c0_266 = arith.constant 0 : index
    %c0_267 = arith.constant 0 : index
    %304 = vector.load %arg5[%c44_265, %c0_266, %c0_267] : memref<50x32x128xf32, #tpu.memory_space<vmem>>, vector<1x32x128xf32>
    %305 = vector.shape_cast %304 : vector<1x32x128xf32> to vector<32x128xf32>
    %cst_268 = arith.constant dense<0.000000e+00> : vector<2x128xf32>
    %306 = tpu.matmul %303, %305, %cst_268 {dimension_numbers = #tpu.dot_dimension_numbers<[1], [0], [0], [1], [0, 0, 1, 1], [], []>} : vector<2x32xf32>, vector<32x128xf32>, vector<2x128xf32> -> vector<2x128xf32>
    %307 = arith.addf %302, %306 : vector<2x128xf32>
    %c45 = arith.constant 45 : index
    %c0_269 = arith.constant 0 : index
    %308 = tpu.strided_load %arg10[%c45, %c0_269] {strides = array<i32: 50, 1>} : memref<100x32xf32, #tpu.memory_space<vmem>>, vector<2x32xf32>
    %c45_270 = arith.constant 45 : index
    %c0_271 = arith.constant 0 : index
    %c0_272 = arith.constant 0 : index
    %309 = vector.load %arg5[%c45_270, %c0_271, %c0_272] : memref<50x32x128xf32, #tpu.memory_space<vmem>>, vector<1x32x128xf32>
    %310 = vector.shape_cast %309 : vector<1x32x128xf32> to vector<32x128xf32>
    %cst_273 = arith.constant dense<0.000000e+00> : vector<2x128xf32>
    %311 = tpu.matmul %308, %310, %cst_273 {dimension_numbers = #tpu.dot_dimension_numbers<[1], [0], [0], [1], [0, 0, 1, 1], [], []>} : vector<2x32xf32>, vector<32x128xf32>, vector<2x128xf32> -> vector<2x128xf32>
    %312 = arith.addf %307, %311 : vector<2x128xf32>
    %c46 = arith.constant 46 : index
    %c0_274 = arith.constant 0 : index
    %313 = tpu.strided_load %arg10[%c46, %c0_274] {strides = array<i32: 50, 1>} : memref<100x32xf32, #tpu.memory_space<vmem>>, vector<2x32xf32>
    %c46_275 = arith.constant 46 : index
    %c0_276 = arith.constant 0 : index
    %c0_277 = arith.constant 0 : index
    %314 = vector.load %arg5[%c46_275, %c0_276, %c0_277] : memref<50x32x128xf32, #tpu.memory_space<vmem>>, vector<1x32x128xf32>
    %315 = vector.shape_cast %314 : vector<1x32x128xf32> to vector<32x128xf32>
    %cst_278 = arith.constant dense<0.000000e+00> : vector<2x128xf32>
    %316 = tpu.matmul %313, %315, %cst_278 {dimension_numbers = #tpu.dot_dimension_numbers<[1], [0], [0], [1], [0, 0, 1, 1], [], []>} : vector<2x32xf32>, vector<32x128xf32>, vector<2x128xf32> -> vector<2x128xf32>
    %317 = arith.addf %312, %316 : vector<2x128xf32>
    %c47 = arith.constant 47 : index
    %c0_279 = arith.constant 0 : index
    %318 = tpu.strided_load %arg10[%c47, %c0_279] {strides = array<i32: 50, 1>} : memref<100x32xf32, #tpu.memory_space<vmem>>, vector<2x32xf32>
    %c47_280 = arith.constant 47 : index
    %c0_281 = arith.constant 0 : index
    %c0_282 = arith.constant 0 : index
    %319 = vector.load %arg5[%c47_280, %c0_281, %c0_282] : memref<50x32x128xf32, #tpu.memory_space<vmem>>, vector<1x32x128xf32>
    %320 = vector.shape_cast %319 : vector<1x32x128xf32> to vector<32x128xf32>
    %cst_283 = arith.constant dense<0.000000e+00> : vector<2x128xf32>
    %321 = tpu.matmul %318, %320, %cst_283 {dimension_numbers = #tpu.dot_dimension_numbers<[1], [0], [0], [1], [0, 0, 1, 1], [], []>} : vector<2x32xf32>, vector<32x128xf32>, vector<2x128xf32> -> vector<2x128xf32>
    %322 = arith.addf %317, %321 : vector<2x128xf32>
    %c48 = arith.constant 48 : index
    %c0_284 = arith.constant 0 : index
    %323 = tpu.strided_load %arg10[%c48, %c0_284] {strides = array<i32: 50, 1>} : memref<100x32xf32, #tpu.memory_space<vmem>>, vector<2x32xf32>
    %c48_285 = arith.constant 48 : index
    %c0_286 = arith.constant 0 : index
    %c0_287 = arith.constant 0 : index
    %324 = vector.load %arg5[%c48_285, %c0_286, %c0_287] : memref<50x32x128xf32, #tpu.memory_space<vmem>>, vector<1x32x128xf32>
    %325 = vector.shape_cast %324 : vector<1x32x128xf32> to vector<32x128xf32>
    %cst_288 = arith.constant dense<0.000000e+00> : vector<2x128xf32>
    %326 = tpu.matmul %323, %325, %cst_288 {dimension_numbers = #tpu.dot_dimension_numbers<[1], [0], [0], [1], [0, 0, 1, 1], [], []>} : vector<2x32xf32>, vector<32x128xf32>, vector<2x128xf32> -> vector<2x128xf32>
    %327 = arith.addf %322, %326 : vector<2x128xf32>
    %c49 = arith.constant 49 : index
    %c0_289 = arith.constant 0 : index
    %328 = tpu.strided_load %arg10[%c49, %c0_289] {strides = array<i32: 50, 1>} : memref<100x32xf32, #tpu.memory_space<vmem>>, vector<2x32xf32>
    %c49_290 = arith.constant 49 : index
    %c0_291 = arith.constant 0 : index
    %c0_292 = arith.constant 0 : index
    %329 = vector.load %arg5[%c49_290, %c0_291, %c0_292] : memref<50x32x128xf32, #tpu.memory_space<vmem>>, vector<1x32x128xf32>
    %330 = vector.shape_cast %329 : vector<1x32x128xf32> to vector<32x128xf32>
    %cst_293 = arith.constant dense<0.000000e+00> : vector<2x128xf32>
    %331 = tpu.matmul %328, %330, %cst_293 {dimension_numbers = #tpu.dot_dimension_numbers<[1], [0], [0], [1], [0, 0, 1, 1], [], []>} : vector<2x32xf32>, vector<32x128xf32>, vector<2x128xf32> -> vector<2x128xf32>
    %332 = arith.addf %327, %331 : vector<2x128xf32>
    %c0_294 = arith.constant 0 : index
    %c0_295 = arith.constant 0 : index
    %333 = vector.load %arg6[%c0_294, %c0_295] : memref<1x128xf32, #tpu.memory_space<vmem>>, vector<1x128xf32>
    %334 = vector.broadcast %333 : vector<1x128xf32> to vector<2x128xf32>
    %335 = arith.addf %332, %334 : vector<2x128xf32>
    %cst_296 = arith.constant 0.000000e+00 : f32
    %336 = vector.broadcast %cst_296 : f32 to vector<2x128xf32>
    %337 = arith.maximumf %335, %336 : vector<2x128xf32>
    %c0_297 = arith.constant 0 : index
    %c0_298 = arith.constant 0 : index
    %338 = vector.load %arg7[%c0_297, %c0_298] : memref<2x128xf32, #tpu.memory_space<vmem>>, vector<2x128xf32>
    tpu.vector_store %arg7[%c0_297, %c0_298], %337 {strides = array<i32>} : memref<2x128xf32, #tpu.memory_space<vmem>>, vector<2x128xf32>,
    return
  }
}

</mosaic_0001>

<bundles_post_ra>
// kernel: time_encoder_forward.1
= control target key start
LH: loop header
LB: loop body
LE: loop exit
PB: predicated region body
PF: predicated region fallthrough
CT: control target
= control target key end

     0   :  { %12 = vsyncpa [#allocation6], 0  ;;  %s10666_s0 = inlined_call_operand.vmem [shape: f32[400,1], index: 0, kind: input, shape index: {}]   ;;  %s10667_s1 = inlined_call_operand.vmem [shape: f32[3,16], index: 1, kind: input, shape index: {}]   ;;  %s10668_s2 = inlined_call_operand.vmem [shape: f32[1,16], index: 2, kind: input, shape index: {}]   ;;  %s10669_s3 = inlined_call_operand.vmem [shape: f32[3,16,32], index: 3, kind: input, shape index: {}]   ;;  %s10670_s4 = inlined_call_operand.vmem [shape: f32[1,32], index: 4, kind: input, shape index: {}]   ;;  %s10671_s5 = inlined_call_operand.hbm [shape: f32[50,32,128], index: 5, kind: input, shape index: {}]   ;;  %s10672_s6 = inlined_call_operand.vmem [shape: f32[1,128], index: 6, kind: input, shape index: {}]   ;;  %s10673_s7 = inlined_call_operand.hbm [shape: f32[2,128], index: 7, kind: output, shape index: {}]  }
   0x1   :  { %13 = vsyncpa [#allocation7], 0  ;;  %s8967_s24 = smov [#allocation5]   ;;  %s8919_s28 = scalar_lea.hbm %s10671_s5, 25600 }
   0x2   :  { %s29_s25 = sshll.u32 %s8967_s24, 4  ;;  %p8920_p0 = scmp.ne.s32.totalorder %s10671_s5, %s8919_s28  ;;  %s30_s25 = int_to_ptr.vmem [resolvable:$true] %s29_s25 }
   0x3   :  { %p8923_p1 = scmp.lt.u32.totalorder %s8919_s28, %s10671_s5 }
   0x5   :  { %p8925_p2 = pnand %p8923_p1, %p8920_p0 }
   0x7   :  { %8928 = shalt.err (!%p8925_p2)
}
   0x8   :  { %s8929_s10 = scalar_lea.vmem %s30_s25, 25600  ;;  %p8934_p4 = scmp.lt.s32.totalorder %s30_s25, %s30_s25 }
   0x9   :  { %p8930_p3 = scmp.ne.s32.totalorder %s30_s25, %s8929_s10  ;;  %p8935_p5 = scmp.lt.s32.totalorder %s8929_s10, %s8929_s10 }
   0xb   :  { %p8936_p6 = por %p8935_p5, %p8934_p4 }
   0xd   :  { %p8937_p7 = pnand %p8936_p6, %p8930_p3 }
   0xf   :  { %8940 = shalt.err (!%p8937_p7)
}
  0x10   :  { %s8968_s11 = smov 128   ;;  %s8969_s12 = smov 8  }
  0x11   :  { %35 = dma.hbm_to_vmem [thread:$0]  %s10671_s5, 25600, %s30_s25, [#allocation6], %s8968_s11, %s8968_s11, %s8969_s12  }
  0x12   :  { %8963 = dma.done.wait [#allocation6], 25600  }
  0x13   :  { %8964 = vsyncadd [#allocation6], 4294941696  ;;  %v8970_v0 = vmov 0   ;;  %v41_v1 = vld [vmem:[%s10666_s0] sm:$0xff]  ;;  %vm141_vm0 = vcmask 1040384   ;;  %v42_v2 = vld [vmem:[%s10666_s0 + $0x8] sm:$0xff] }
  0x14   :  { %8916 = vset.pattern.permute.xlu1 %v8970_v0  ;;  %8917 = vset.pattern.permute.xlu0 %v8970_v0  ;;  %v43_v3 = vld [vmem:[%s10666_s0 + $0x10] sm:$0xff]  ;;  %v142_v4 = vrot.slane %v41_v1, 7  ;;  %v143_v5 = vrot.slane %v42_v2, 7  ;;  %v445_v6 = vrot.slane %v42_v2, 1  ;;  %vm443_vm1 = vcmask 1046528   ;;  %v44_v9 = vld [vmem:[%s10666_s0 + $0x18] sm:$0xff] }
  0x15   :  { %1000 = vperm.xlu1 %8916, %v41_v1   ;;  %v447_v7 = vrot.slane %v43_v3, 1  ;;  %v444_v10 = vrot.slane %v41_v1, 1  ;;  %v145_v13 = vrot.slane %v43_v3, 7  ;;  %v147_v14 = vrot.slane %v44_v9, 7  ;;  %v45_v17 = vld [vmem:[%s10666_s0 + $0x20] sm:$0xff]  ;;  %v46_v21 = vld [vmem:[%s10666_s0 + $0x28] sm:$0xff] }
  0x16   :  { %v291_v8 = vsel %vm141_vm0, 0.0, %v142_v4  ;;  %v144_v11 = vsel %vm141_vm0, %v142_v4, %v143_v5  ;;  %v449_v19 = vrot.slane %v44_v9, 1  ;;  %v451_v20 = vrot.slane %v45_v17, 1  ;;  %v47_v27 = vld [vmem:[%s10666_s0 + $0x30] sm:$0xff]  ;;  %v7351_v30 = vld [vmem:[%s10669_s3 + $0x18] sm:$0xff]  ;;  %v2314_v36 = vld [vmem:[%s10669_s3] sm:$0xff] }
  0x17   :  { %697 = vperm.xlu0 %8917, %v291_v8   ;;  %v448_v12 = vsel %vm443_vm1, %v445_v6, %v447_v7  ;;  %v446_v15 = vsel %vm443_vm1, %v444_v10, %v445_v6  ;;  %v148_v16 = vsel %vm141_vm0, %v145_v13, %v147_v14  ;;  %v146_v18 = vsel %vm141_vm0, %v143_v5, %v145_v13  ;;  %v7350_v29 = vld [vmem:[%s10669_s3 + $0x10] sm:$0xff]  ;;  %v48_v33 = vld [vmem:[%s10666_s0 + $0x38] sm:$0xff]  ;;  %v2315_v37 = vld [vmem:[%s10669_s3 + $0x8] sm:$0xff]  ;;  %s8974_s10 = smov [#allocation8]  }
  0x18   :  { %v452_v22 = vsel %vm443_vm1, %v449_v19, %v451_v20  ;;  %v149_v23 = vrot.slane %v45_v17, 7  ;;  %v151_v24 = vrot.slane %v46_v21, 7  ;;  %v450_v25 = vsel %vm443_vm1, %v447_v7, %v449_v19  ;;  %v49_v45 = vld [vmem:[%s10666_s0 + $0x40] sm:$0xff]  ;;  %v50_v49 = vld [vmem:[%s10666_s0 + $0x48] sm:$0xff]  ;;  %v51_v55 = vld [vmem:[%s10666_s0 + $0x50] sm:$0xff]  ;;  %s7340_s11 = sshll.u32 %s8974_s10, 4  ;;  %s7341_s11 = int_to_ptr.vmem [resolvable:$true] %s7340_s11 }
  0x19   :  { %1004 = vperm.xlu1 %8916, %v42_v2   ;;  %v453_v31 = vrot.slane %v46_v21, 1  ;;  %v455_v32 = vrot.slane %v47_v27, 1  ;;  %v8971_v34 = vmov 0.0|0.0   ;;  %v8600_v35 = vpack.c.bf16 %v7351_v30, %v7350_v29  ;;  %v52_v59 = vld [vmem:[%s10666_s0 + $0x58] sm:$0xff]  ;;  %v53_v1 = vld [vmem:[%s10666_s0 + $0x60] sm:$0xff]  ;;  %v54_v5 = vld [vmem:[%s10666_s0 + $0x68] sm:$0xff]  ;;  %p8946_p9 = scmp.lt.s32.totalorder %s7341_s11, %s7341_s11 }
  0x1a   :  { %v152_v26 = vsel %vm141_vm0, %v149_v23, %v151_v24  ;;  %v150_v28 = vsel %vm141_vm0, %v147_v14, %v149_v23  ;;  %8599 = vmatprep.subr.bf16.mxu0 %v8971_v34  ;;  %v153_v38 = vrot.slane %v47_v27, 7  ;;  %8602 = vmatprep.subr.bf16.mxu1 %v8971_v34  ;;  %v155_v40 = vrot.slane %v48_v33, 7  ;;  %s8941_s12 = scalar_lea.vmem %s7341_s11, 32 }
  0x1b   :  { %702 = vperm.xlu0 %8917, %v144_v11   ;;  %v456_v39 = vsel %vm443_vm1, %v453_v31, %v455_v32  ;;  %8601 = vmatpush3.bf16.msra.mxu0 %v8600_v35  ;;  %vm8972_vm2 = vmmov 0   ;;  %v8973_v41 = vmov 0.0   ;;  %v8603_v42 = vpack.c.bf16 %v2315_v37, %v2314_v36  ;;  %v55_v11 = vld [vmem:[%s10666_s0 + $0x70] sm:$0xff]  ;;  %v60_v36 = vld [vmem:[%s10666_s0 + $0x98] sm:$0xff]  ;;  %p8942_p8 = scmp.ne.s32.totalorder %s7341_s11, %s8941_s12  ;;  %p8947_p10 = scmp.lt.s32.totalorder %s8941_s12, %s8941_s12 }
  0x1c   :  { %7816 = vmatprep.mubr.msk.f32.mxu0 %vm8972_vm2, %v8973_v41  ;;  %7895 = vmatprep.mubr.msk.f32.mxu1 %vm8972_vm2, %v8973_v41  ;;  %v454_v43 = vsel %vm443_vm1, %v451_v20, %v453_v31  ;;  %v156_v44 = vsel %vm141_vm0, %v153_v38, %v155_v40  ;;  %v154_v46 = vsel %vm141_vm0, %v151_v24, %v153_v38  ;;  %v457_v47 = vrot.slane %v48_v33, 1  ;;  %v59_v31 = vld [vmem:[%s10666_s0 + $0x90] sm:$0xff] }
  0x1d   :  { %1310 = vperm.xlu1 %8916, %v448_v12   ;;  %8605 = vmatprep.subr.bf16.mxu0 %v8971_v34  ;;  %v459_v48 = vrot.slane %v49_v45, 1  ;;  %v157_v51 = vrot.slane %v49_v45, 7  ;;  %v159_v52 = vrot.slane %v50_v49, 7  ;;  %v461_v57 = vrot.slane %v50_v49, 1  ;;  %p8948_p11 = por %p8947_p10, %p8946_p9 }
  0x1e   :  { %8604 = vmatpush3.bf16.msra.mxu1 %v8603_v42  ;;  %v458_v53 = vsel %vm443_vm1, %v455_v32, %v457_v47  ;;  %v463_v58 = vrot.slane %v51_v55, 1  ;;  %v161_v61 = vrot.slane %v51_v55, 7  ;;  %v163_v62 = vrot.slane %v52_v59, 7 }
  0x1f   :  { %1305 = vperm.xlu0 %8917, %v446_v15   ;;  %8608 = vmatprep.subr.bf16.mxu1 %v8971_v34  ;;  %v460_v50 = vsel %vm443_vm1, %v457_v47, %v459_v48  ;;  %v160_v54 = vsel %vm141_vm0, %v157_v51, %v159_v52  ;;  %v158_v56 = vsel %vm141_vm0, %v155_v40, %v157_v51  ;;  %v467_v4 = vrot.slane %v53_v1, 1  ;;  %v56_v15 = vld [vmem:[%s10666_s0 + $0x78] sm:$0xff]  ;;  %v62_v47 = vld [vmem:[%s10666_s0 + $0xa8] sm:$0xff]  ;;  %p8949_p12 = pnand %p8948_p11, %p8942_p8 }
  0x20   :  { %v464_v60 = vsel %vm443_vm1, %v461_v57, %v463_v58  ;;  %v462_v63 = vsel %vm443_vm1, %v459_v48, %v461_v57  ;;  %v164_v0 = vsel %vm141_vm0, %v161_v61, %v163_v62  ;;  %v162_v2 = vsel %vm141_vm0, %v159_v52, %v161_v61 }
  0x21   :  { %712 = vperm.xlu1 %8916, %v148_v16   ;;  %v165_v7 = vrot.slane %v53_v1, 7  ;;  %v167_v8 = vrot.slane %v54_v5, 7  ;;  %v469_v13 = vrot.slane %v54_v5, 1  ;;  %v471_v14 = vrot.slane %v55_v11, 1 }
  0x22   :  { %v473_v23 = vrot.slane %v56_v15, 1  ;;  %v479_v35 = vrot.slane %v59_v31, 1  ;;  %v177_v38 = vrot.slane %v59_v31, 7  ;;  %vm1764_vm4 = vcmask 130048  }
  0x23   :  { %707 = vperm.xlu0 %8917, %v146_v18   ;;  %v168_v10 = vsel %vm141_vm0, %v165_v7, %v167_v8  ;;  %v166_v12 = vsel %vm141_vm0, %v163_v62, %v165_v7  ;;  %v472_v16 = vsel %vm443_vm1, %v469_v13, %v471_v14  ;;  %v171_v18 = vrot.slane %v56_v15, 7  ;;  %v9178_v7 = vld [vmem:[%s10666_s0 + $0xc0] sm:$0xff] }
  0x24   :  { %v470_v19 = vsel %vm443_vm1, %v467_v4, %v469_v13  ;;  %v474_v29 = vsel %vm443_vm1, %v471_v14, %v473_v23  ;;  %vm3174_vm8 = vcmask 261120   ;;  %vm3276_vm9 = vcmask 257024  }
  0x25   :  { %1012 = vperm.xlu1 %8916, %v44_v9  }
  0x27   :  { %1008 = vperm.xlu0 %8917, %v43_v3   ;;  %v465_v3 = vrot.slane %v52_v59, 1 }
  0x29   :  { %1320 = vperm.xlu1 %8916, %v452_v22   ;;  %v468_v6 = vsel %vm443_vm1, %v465_v3, %v467_v4  ;;  %v466_v9 = vsel %vm443_vm1, %v463_v58, %v465_v3  ;;  %v9161_v58 = vld [vmem:[%s10666_s0 + $0xb8] sm:$0xff] }
  0x2a   :  { %v187_v62 = vrot.slane %v9161_v58, 7  ;;  %v489_v14 = vrot.slane %v9161_v58, 1 }
  0x2b   :  { %1315 = vperm.xlu0 %8917, %v450_v25   ;;  %v58_v25 = vld [vmem:[%s10666_s0 + $0x88] sm:$0xff] }
  0x2d   :  { %722 = vperm.xlu1 %8916, %v152_v26  }
  0x2f   :  { %717 = vperm.xlu0 %8917, %v150_v28   ;;  %v175_v28 = vrot.slane %v58_v25, 7 }
  0x31   :  { %1020 = vperm.xlu1 %8916, %v46_v21   ;;  %v57_v21 = vld [vmem:[%s10666_s0 + $0x80] sm:$0xff] }
  0x32   :  { %v475_v24 = vrot.slane %v57_v21, 1 }
  0x33   :  { %1016 = vperm.xlu0 %8917, %v45_v17   ;;  %v169_v17 = vrot.slane %v55_v11, 7 }
  0x34   :  { %v476_v26 = vsel %vm443_vm1, %v473_v23, %v475_v24 }
  0x35   :  { %1330 = vperm.xlu1 %8916, %v456_v39   ;;  %v172_v20 = vsel %vm141_vm0, %v169_v17, %v171_v18  ;;  %v170_v22 = vsel %vm141_vm0, %v167_v8, %v169_v17  ;;  %v179_v39 = vrot.slane %v60_v36, 7  ;;  %v189_v17 = vrot.slane %v9178_v7, 7 }
  0x37   :  { %1325 = vperm.xlu0 %8917, %v454_v43   ;;  %v180_v42 = vsel %vm141_vm0, %v177_v38, %v179_v39  ;;  %v61_v43 = vld [vmem:[%s10666_s0 + $0xa0] sm:$0xff] }
  0x39   :  { %732 = vperm.xlu1 %8916, %v156_v44   ;;  %v178_v44 = vsel %vm141_vm0, %v175_v28, %v177_v38 }
  0x3b   :  { %727 = vperm.xlu0 %8917, %v154_v46   ;;  %v483_v46 = vrot.slane %v61_v43, 1 }
  0x3d   :  { %1028 = vperm.xlu1 %8916, %v48_v33   ;;  %v477_v33 = vrot.slane %v58_v25, 1 }
  0x3f   :  { %1024 = vperm.xlu0 %8917, %v47_v27   ;;  %v173_v27 = vrot.slane %v57_v21, 7  ;;  %v480_v37 = vsel %vm443_vm1, %v477_v33, %v479_v35  ;;  %v478_v40 = vsel %vm443_vm1, %v475_v24, %v477_v33 }
  0x41   :  { %1340 = vperm.xlu1 %8916, %v460_v50   ;;  %v176_v30 = vsel %vm141_vm0, %v173_v27, %v175_v28  ;;  %v174_v32 = vsel %vm141_vm0, %v171_v18, %v173_v27  ;;  %v183_v50 = vrot.slane %v62_v47, 7  ;;  %v9207_v28 = vld [vmem:[%s10668_s2] ss:$0 sm:$0xff] }
  0x43   :  { %1335 = vperm.xlu0 %8917, %v458_v53   ;;  %v63_v53 = vld [vmem:[%s10666_s0 + $0xb0] sm:$0xff] }
  0x44   :  { %v487_v57 = vrot.slane %v63_v53, 1  ;;  %v185_v61 = vrot.slane %v63_v53, 7 }
  0x45   :  { %742 = vperm.xlu1 %8916, %v160_v54   ;;  %v292_v54 = vlaneseq }
  0x46   :  { %v186_v13 = vsel %vm141_vm0, %v183_v50, %v185_v61 }
  0x47   :  { %737 = vperm.xlu0 %8917, %v158_v56   ;;  %v485_v56 = vrot.slane %v62_v47, 1 }
  0x49   :  { %1036 = vperm.xlu1 %8916, %v50_v49   ;;  %v181_v49 = vrot.slane %v61_v43, 7  ;;  %v486_v3 = vsel %vm443_vm1, %v483_v46, %v485_v56 }
  0x4b   :  { %1032 = vperm.xlu0 %8917, %v49_v45   ;;  %v481_v45 = vrot.slane %v60_v36, 1  ;;  %v184_v52 = vsel %vm141_vm0, %v181_v49, %v183_v50 }
  0x4d   :  { %1350 = vperm.xlu1 %8916, %v464_v60   ;;  %v484_v48 = vsel %vm443_vm1, %v481_v45, %v483_v46  ;;  %v482_v51 = vsel %vm443_vm1, %v479_v35, %v481_v45  ;;  %v488_v60 = vsel %vm443_vm1, %v485_v56, %v487_v57 }
  0x4f   :  { %1345 = vperm.xlu0 %8917, %v462_v63  }
  0x51   :  { %752 = vperm.xlu1 %8916, %v164_v0  }
  0x53   :  { %747 = vperm.xlu0 %8917, %v162_v2   ;;  %v694_v2 = vld [vmem:[%s10667_s1] sm:$0x7] }
  0x55   :  { %1044 = vperm.xlu1 %8916, %v52_v59   ;;  %v9163_v59 = vshrl.u32 %v292_v54, 7  ;;  %v9231_v54 = vld [vmem:[%s10666_s0 + $0xd8] sm:$0xff] }
  0x57   :  { %1040 = vperm.xlu0 %8917, %v51_v55   ;;  %v182_v55 = vsel %vm141_vm0, %v179_v39, %v181_v49  ;;  %v1201_v63 = vsub.s32 1, %v9163_v59  ;;  %v1555_v4 = vsub.s32 2, %v9163_v59 }
  0x59   :  { %1360 = vperm.xlu1 %8916, %v468_v6   ;;  %v9180_v8 = vrot.slane %v694_v2, %v1201_v63 }
  0x5b   :  { %1355 = vperm.xlu0 %8917, %v466_v9  }
  0x5d   :  { %762 = vperm.xlu1 %8916, %v168_v10  }
  0x5f   :  { %757 = vperm.xlu0 %8917, %v166_v12   ;;  %v9189_v12 = vrot.slane %v694_v2, %v1555_v4 }
  0x61   :  { %1052 = vperm.xlu1 %8916, %v54_v5   ;;  %v188_v5 = vsel %vm141_vm0, %v185_v61, %v187_v62 }
  0x63   :  { %1048 = vperm.xlu0 %8917, %v53_v1   ;;  %v947_v1 = vsub.s32 0, %v9163_v59 }
  0x65   :  { %1370 = vperm.xlu1 %8916, %v472_v16   ;;  %v9182_v9 = vrot.slane %v694_v2, %v947_v1 }
  0x67   :  { %1365 = vperm.xlu0 %8917, %v470_v19   ;;  %v318_v19 = vadd.s32 200, %v9163_v59 }
  0x69   :  { %772 = vperm.xlu1 %8916, %v172_v20   ;;  %vm368_vm3 = vcmp.eq.s32.totalorder %v318_v19, 200 }
  0x6b   :  { %767 = vperm.xlu0 %8917, %v170_v22  }
  0x6d   :  { %1060 = vperm.xlu1 %8916, %v56_v15   ;;  %v491_v15 = vrot.slane %v9178_v7, 1 }
  0x6f   :  { %1056 = vperm.xlu0 %8917, %v55_v11   ;;  %v9187_v11 = vld [vmem:[%s10666_s0 + $0xc8] sm:$0xff]  ;;  %v492_v27 = vsel %vm443_vm1, %v489_v14, %v491_v15 }
  0x70   :  { %v191_v18 = vrot.slane %v9187_v11, 7 }
  0x71   :  { %1380 = vperm.xlu1 %8916, %v476_v26  }
  0x73   :  { %1375 = vperm.xlu0 %8917, %v474_v29  }
  0x75   :  { %782 = vperm.xlu1 %8916, %v176_v30   ;;  %v192_v30 = vsel %vm141_vm0, %v189_v17, %v191_v18 }
  0x76   :  { %v418_v39 = vsel %vm368_vm3, 0.0, %v192_v30 }
  0x77   :  { %777 = vperm.xlu0 %8917, %v174_v32  }
  0x79   :  { %1068 = vperm.xlu1 %8916, %v58_v25  }
  0x7b   :  { %1064 = vperm.xlu0 %8917, %v57_v21  }
  0x7d   :  { %1390 = vperm.xlu1 %8916, %v480_v37  }
  0x7f   :  { %1385 = vperm.xlu0 %8917, %v478_v40   ;;  %v9218_v40 = vld [vmem:[%s10666_s0 + $0xd0] sm:$0xff] }
  0x80   :  { %v495_v49 = vrot.slane %v9218_v40, 1  ;;  %v193_v63 = vrot.slane %v9218_v40, 7 }
  0x81   :  { %792 = vperm.xlu1 %8916, %v180_v42  }
  0x83   :  { %787 = vperm.xlu0 %8917, %v178_v44  }
  0x85   :  { %1076 = vperm.xlu1 %8916, %v60_v36   ;;  %v490_v36 = vsel %vm443_vm1, %v487_v57, %v489_v14 }
  0x87   :  { %1072 = vperm.xlu0 %8917, %v59_v31  }
  0x89   :  { %1400 = vperm.xlu1 %8916, %v484_v48   ;;  %v493_v48 = vrot.slane %v9187_v11, 1 }
  0x8b   :  { %1395 = vperm.xlu0 %8917, %v482_v51   ;;  %v317_v51 = vadd.s32 192, %v9163_v59  ;;  %v494_v61 = vsel %vm443_vm1, %v491_v15, %v493_v48 }
  0x8d   :  { %802 = vperm.xlu1 %8916, %v184_v52   ;;  %vm618_vm5 = vcmp.eq.s32.totalorder %v317_v51, 199 }
  0x8f   :  { %797 = vperm.xlu0 %8917, %v182_v55  }
  0x91   :  { %1084 = vperm.xlu1 %8916, %v62_v47   ;;  %v190_v47 = vsel %vm141_vm0, %v187_v62, %v189_v17 }
  0x93   :  { %1080 = vperm.xlu0 %8917, %v61_v43  }
  0x94   :  { %v1001_v0 = vpop.permute.xlu1 %1000 }
  0x95   :  { %1410 = vperm.xlu1 %8916, %v488_v60   ;;  %v1203_v20 = vmul.f32 %v9180_v8, %v1001_v0  ;;  %v496_v60 = vsel %vm443_vm1, %v493_v48, %v495_v49  ;;  %v195_v0 = vrot.slane %v9231_v54, 7 }
  0x96   :  { %v698_v6 = vpop.permute.xlu0 %697 }
  0x97   :  { %1405 = vperm.xlu0 %8917, %v486_v3   ;;  %v949_v21 = vmul.f32 %v9182_v9, %v698_v6  ;;  %v196_v14 = vsel %vm141_vm0, %v193_v63, %v195_v0 }
  0x98   :  { %v1005_v10 = vpop.permute.xlu1 %1004 }
  0x99   :  { %812 = vperm.xlu1 %8916, %v188_v5   ;;  %v1204_v22 = vmul.f32 %v9180_v8, %v1005_v10  ;;  %v1253_v31 = vadd.f32 %v1203_v20, %v949_v21  ;;  %v668_v10 = vsel %vm618_vm5, 0.0, %v494_v61  ;;  %v9253_v20 = vld [vmem:[%s10666_s0 + $0xe0] sm:$0xff] }
  0x9a   :  { %v703_v16 = vpop.permute.xlu0 %702 }
  0x9b   :  { %v950_v23 = vmul.f32 %v9182_v9, %v703_v16  ;;  %807 = vperm.xlu0 %8917, %v186_v13  }
  0x9c   :  { %v1311_v24 = vpop.permute.xlu1 %1310 }
  0x9d   :  { %v1558_v25 = vmul.f32 %v9189_v12, %v1311_v24  ;;  %1092 = vperm.xlu1 %8916, %v9161_v58   ;;  %v1254_v26 = vadd.f32 %v1204_v22, %v950_v23  ;;  %v194_v24 = vsel %vm141_vm0, %v191_v18, %v193_v63 }
  0x9e   :  { %v1306_v29 = vpop.permute.xlu0 %1305 }
  0x9f   :  { %v1608_v32 = vadd.f32 %v1558_v25, %v1254_v26  ;;  %v1557_v33 = vmul.f32 %v9189_v12, %v1306_v29  ;;  %1088 = vperm.xlu0 %8917, %v63_v53   ;;  %v499_v29 = vrot.slane %v9253_v20, 1 }
  0xa0   :  { %v713_v35 = vpop.permute.xlu1 %712 }
  0xa1   :  { %1420 = vperm.xlu1 %8916, %v492_v27   ;;  %v1665_v37 = vadd.f32 %v9207_v28, %v1608_v32  ;;  %v1607_v38 = vadd.f32 %v1557_v33, %v1253_v31  ;;  %v952_v52 = vmul.f32 %v9182_v9, %v713_v35  ;;  %v497_v27 = vrot.slane %v9231_v54, 1  ;;  %v9272_v32 = vld [vmem:[%s10666_s0 + $0xe8] sm:$0xff] }
  0xa2   :  { %v708_v42 = vpop.permute.xlu0 %707  ;;  %v501_v63 = vrot.slane %v9272_v32, 1 }
  0xa3   :  { %v1715_v43 = vmax.f32 %v1665_v37, 0.0  ;;  %v1664_v44 = vadd.f32 %v9207_v28, %v1607_v38  ;;  %1415 = vperm.xlu0 %8917, %v490_v36   ;;  %v951_v62 = vmul.f32 %v9182_v9, %v708_v42  ;;  %v500_v38 = vsel %vm443_vm1, %v497_v27, %v499_v29 }
  0xa4   :  { %v1013_v45 = vpop.permute.xlu1 %1012  ;;  %v199_v42 = vrot.slane %v9272_v32, 7 }
  0xa5   :  { %v1206_v46 = vmul.f32 %v9180_v8, %v1013_v45  ;;  %822 = vperm.xlu1 %8916, %v418_v39   ;;  %1766 = vst.msk [vmem:[#allocation2 + $0x8] sm:$0xff] %vm1764_vm4, %v1715_v43  ;;  %v1714_v50 = vmax.f32 %v1664_v44, 0.0  ;;  %v197_v39 = vrot.slane %v9253_v20, 7 }
  0xa6   :  { %v1009_v53 = vpop.permute.xlu0 %1008 }
  0xa7   :  { %1765 = vst.msk [vmem:[#allocation2] sm:$0xff] %vm1764_vm4, %v1714_v50  ;;  %v1205_v55 = vmul.f32 %v9180_v8, %v1009_v53  ;;  %817 = vperm.xlu0 %8917, %v190_v47   ;;  %v1256_v57 = vadd.f32 %v1206_v46, %v952_v52  ;;  %v498_v50 = vsel %vm443_vm1, %v495_v49, %v497_v27  ;;  %v9302_v53 = vld [vmem:[%s10666_s0 + $0xf0] sm:$0xff] }
  0xa8   :  { %v1321_v56 = vpop.permute.xlu1 %1320  ;;  %v200_v52 = vsel %vm141_vm0, %v197_v39, %v199_v42 }
  0xa9   :  { %v1560_v58 = vmul.f32 %v9189_v12, %v1321_v56  ;;  %1100 = vperm.xlu1 %8916, %v9187_v11   ;;  %v1255_v3 = vadd.f32 %v1205_v55, %v951_v62  ;;  %v198_v62 = vsel %vm141_vm0, %v195_v0, %v197_v39 }
  0xaa   :  { %v1316_v2 = vpop.permute.xlu0 %1315 }
  0xab   :  { %v1610_v1 = vadd.f32 %v1560_v58, %v1256_v57  ;;  %v1559_v4 = vmul.f32 %v9189_v12, %v1316_v2  ;;  %1096 = vperm.xlu0 %8917, %v9178_v7  }
  0xac   :  { %v723_v5 = vpop.permute.xlu1 %722 }
  0xad   :  { %v1667_v6 = vadd.f32 %v9207_v28, %v1610_v1  ;;  %1430 = vperm.xlu1 %8916, %v496_v60   ;;  %v1609_v13 = vadd.f32 %v1559_v4, %v1255_v3  ;;  %v954_v30 = vmul.f32 %v9182_v9, %v723_v5  ;;  %v503_v1 = vrot.slane %v9302_v53, 1 }
  0xae   :  { %v718_v16 = vpop.permute.xlu0 %717  ;;  %v1815_v17 = vld [vmem:[#allocation2] ss:$2 sm:$0xff]  ;;  %v1865_v19 = vld [vmem:[#allocation2 + $0x1] ss:$2 sm:$0xff] }
  0xaf   :  { %v1717_v15 = vmax.f32 %v1667_v6, 0.0  ;;  %v1666_v7 = vadd.f32 %v9207_v28, %v1609_v13  ;;  %1425 = vperm.xlu0 %8917, %v668_v10   ;;  %v9256_v22 = vmax.f32 %v1815_v17, %v1865_v19  ;;  %v953_v37 = vmul.f32 %v9182_v9, %v718_v16 }
  0xb0   :  { %v1021_v21 = vpop.permute.xlu1 %1020 }
  0xb1   :  { %1768 = vst.msk [vmem:[#allocation2 + $0x18] sm:$0xff] %vm1764_vm4, %v1717_v15  ;;  %v1208_v23 = vmul.f32 %v9180_v8, %v1021_v21  ;;  %832 = vperm.xlu1 %8916, %v196_v14   ;;  %v1716_v25 = vmax.f32 %v1666_v7, 0.0  ;;  %7817 = vmatmul.mubr.msk.f32.vlgmr.msra.gmra.mrb[0].mxu0 %vm1764_vm4, %v9256_v22  ;;  %v1964_v26 = vrot.slane %v9256_v22, 7  ;;  %v2139_v2 = vrot.slane %v9256_v22, 1 }
  0xb2   :  { %v1017_v31 = vpop.permute.xlu0 %1016  ;;  %7819 = vmatprep.mubr.msk.f32.mxu0 %vm8972_vm2, %v8973_v41  ;;  %v504_v7 = vsel %vm443_vm1, %v501_v63, %v503_v1  ;;  %v201_v21 = vrot.slane %v9302_v53, 7 }
  0xb3   :  { %1767 = vst.msk [vmem:[#allocation2 + $0x10] sm:$0xff] %vm1764_vm4, %v1716_v25  ;;  %v1207_v11 = vmul.f32 %v9180_v8, %v1017_v31  ;;  %827 = vperm.xlu0 %8917, %v194_v24   ;;  %v2038_v33 = vsel %vm141_vm0, 0.0, %v1964_v26  ;;  %v1258_v35 = vadd.f32 %v1208_v23, %v954_v30  ;;  %v502_v31 = vsel %vm443_vm1, %v499_v29, %v501_v63 }
  0xb4   :  { %v1331_v18 = vpop.permute.xlu1 %1330  ;;  %7896 = vmatmul.mubr.msk.f32.vlgmr.msra.gmra.mrb[0].mxu1 %vm1764_vm4, %v2038_v33 }
  0xb5   :  { %v1562_v36 = vmul.f32 %v9189_v12, %v1331_v18  ;;  %1108 = vperm.xlu1 %8916, %v9231_v54   ;;  %7898 = vmatprep.mubr.msk.f32.mxu1 %vm8972_vm2, %v8973_v41  ;;  %v1257_v45 = vadd.f32 %v1207_v11, %v953_v37  ;;  %v9323_v54 = vld [vmem:[%s10666_s0 + $0xf8] sm:$0xff] }
  0xb6   :  { %v1326_v44 = vpop.permute.xlu0 %1325  ;;  %v203_v22 = vrot.slane %v9323_v54, 7 }
  0xb7   :  { %v1612_v43 = vadd.f32 %v1562_v36, %v1258_v35  ;;  %v1561_v46 = vmul.f32 %v9189_v12, %v1326_v44  ;;  %1104 = vperm.xlu0 %8917, %v9218_v40   ;;  %v202_v44 = vsel %vm141_vm0, %v199_v42, %v201_v21 }
  0xb8   :  { %v733_v47 = vpop.permute.xlu1 %732  ;;  %v204_v18 = vsel %vm141_vm0, %v201_v21, %v203_v22 }
  0xb9   :  { %v1669_v48 = vadd.f32 %v9207_v28, %v1612_v43  ;;  %1440 = vperm.xlu1 %8916, %v500_v38   ;;  %v1611_v51 = vadd.f32 %v1561_v46, %v1257_v45  ;;  %v956_v6 = vmul.f32 %v9182_v9, %v733_v47  ;;  %v9356_v38 = vld [vmem:[%s10666_s0 + $0x100] sm:$0xff]  ;;  %v505_v45 = vrot.slane %v9323_v54, 1 }
  0xba   :  { %v728_v56 = vpop.permute.xlu0 %727  ;;  %v1817_v57 = vld [vmem:[#allocation2 + $0x10] ss:$2 sm:$0xff]  ;;  %v1867_v58 = vld [vmem:[#allocation2 + $0x11] ss:$2 sm:$0xff] }
  0xbb   :  { %v1719_v55 = vmax.f32 %v1669_v48, 0.0  ;;  %v1668_v60 = vadd.f32 %v9207_v28, %v1611_v51  ;;  %1435 = vperm.xlu0 %8917, %v498_v50   ;;  %v9305_v40 = vmax.f32 %v1817_v57, %v1867_v58  ;;  %v955_v19 = vmul.f32 %v9182_v9, %v728_v56 }
  0xbc   :  { %v1029_v61 = vpop.permute.xlu1 %1028  ;;  %v507_v48 = vrot.slane %v9356_v38, 1 }
  0xbd   :  { %1770 = vst.msk [vmem:[#allocation2 + $0x28] sm:$0xff] %vm1764_vm4, %v1719_v55  ;;  %v1210_v49 = vmul.f32 %v9180_v8, %v1029_v61  ;;  %842 = vperm.xlu1 %8916, %v200_v52   ;;  %v1718_v3 = vmax.f32 %v1668_v60, 0.0  ;;  %v2140_v4 = vrot.slane %v9305_v40, 1  ;;  %7820 = vmatmul.mubr.msk.f32.gmra.mrb[2].mxu0 %vm1764_vm4, %v9305_v40  ;;  %v1965_v5 = vrot.slane %v9305_v40, 7 }
  0xbe   :  { %v1025_v10 = vpop.permute.xlu0 %1024  ;;  %7822 = vmatprep.mubr.msk.f32.mxu0 %vm8972_vm2, %v8973_v41  ;;  %v508_v40 = vsel %vm443_vm1, %v505_v45, %v507_v48 }
  0xbf   :  { %1769 = vst.msk [vmem:[#allocation2 + $0x20] sm:$0xff] %vm1764_vm4, %v1718_v3  ;;  %v1209_v0 = vmul.f32 %v9180_v8, %v1025_v10  ;;  %837 = vperm.xlu0 %8917, %v198_v62   ;;  %v1966_v14 = vsel %vm141_vm0, %v1964_v26, %v1965_v5  ;;  %v9331_v15 = vsel %vm443_vm1, %v2139_v2, %v2140_v4 }
  0xc0   :  { %v1341_v13 = vpop.permute.xlu1 %1340  ;;  %v1260_v16 = vadd.f32 %v1210_v49, %v956_v6  ;;  %7899 = vmatmul.mubr.msk.f32.gmra.mrb[2].mxu1 %vm1764_vm4, %v1966_v14  ;;  %v205_v49 = vrot.slane %v9356_v38, 7  ;;  %v506_v10 = vsel %vm443_vm1, %v503_v1, %v505_v45 }
  0xc1   :  { %v1564_v17 = vmul.f32 %v9189_v12, %v1341_v13  ;;  %1116 = vperm.xlu1 %8916, %v9272_v32   ;;  %7901 = vmatprep.mubr.msk.f32.mxu1 %vm8972_vm2, %v8973_v41  ;;  %v1259_v25 = vadd.f32 %v1209_v0, %v955_v19  ;;  %v9376_v32 = vld [vmem:[%s10666_s0 + $0x108] sm:$0xff] }
  0xc2   :  { %v1336_v24 = vpop.permute.xlu0 %1335  ;;  %v207_v62 = vrot.slane %v9376_v32, 7 }
  0xc3   :  { %v1614_v23 = vadd.f32 %v1564_v17, %v1260_v16  ;;  %v1563_v26 = vmul.f32 %v9189_v12, %v1336_v24  ;;  %1112 = vperm.xlu0 %8917, %v9253_v20   ;;  %v206_v24 = vsel %vm141_vm0, %v203_v22, %v205_v49 }
  0xc4   :  { %v743_v27 = vpop.permute.xlu1 %742  ;;  %v208_v13 = vsel %vm141_vm0, %v205_v49, %v207_v62  ;;  %v9462_v49 = vld [vmem:[%s10666_s0 + $0x120] sm:$0xff] }
  0xc5   :  { %v1671_v30 = vadd.f32 %v9207_v28, %v1614_v23  ;;  %1450 = vperm.xlu1 %8916, %v504_v7   ;;  %v1613_v11 = vadd.f32 %v1563_v26, %v1259_v25  ;;  %v958_v51 = vmul.f32 %v9182_v9, %v743_v27  ;;  %v9409_v7 = vld [vmem:[%s10666_s0 + $0x110] sm:$0xff]  ;;  %v509_v25 = vrot.slane %v9376_v32, 1 }
  0xc6   :  { %v738_v35 = vpop.permute.xlu0 %737  ;;  %v1819_v36 = vld [vmem:[#allocation2 + $0x20] ss:$2 sm:$0xff]  ;;  %v1869_v37 = vld [vmem:[#allocation2 + $0x21] ss:$2 sm:$0xff] }
  0xc7   :  { %v1721_v33 = vmax.f32 %v1671_v30, 0.0  ;;  %v1670_v39 = vadd.f32 %v9207_v28, %v1613_v11  ;;  %1445 = vperm.xlu0 %8917, %v502_v31   ;;  %v9359_v20 = vmax.f32 %v1819_v36, %v1869_v37  ;;  %v957_v61 = vmul.f32 %v9182_v9, %v738_v35 }
  0xc8   :  { %v1037_v43 = vpop.permute.xlu1 %1036  ;;  %v511_v30 = vrot.slane %v9409_v7, 1 }
  0xc9   :  { %1772 = vst.msk [vmem:[#allocation2 + $0x38] sm:$0xff] %vm1764_vm4, %v1721_v33  ;;  %v1212_v29 = vmul.f32 %v9180_v8, %v1037_v43  ;;  %852 = vperm.xlu1 %8916, %v204_v18   ;;  %v1720_v46 = vmax.f32 %v1670_v39, 0.0  ;;  %7823 = vmatmul.mubr.msk.f32.gmra.mrb[4].mxu0 %vm1764_vm4, %v9359_v20  ;;  %v1967_v47 = vrot.slane %v9359_v20, 7  ;;  %v2142_v50 = vrot.slane %v9359_v20, 1 }
  0xca   :  { %v1033_v52 = vpop.permute.xlu0 %1032  ;;  %7825 = vmatprep.mubr.msk.f32.mxu0 %vm8972_vm2, %v8973_v41  ;;  %v512_v20 = vsel %vm443_vm1, %v509_v25, %v511_v30 }
  0xcb   :  { %1771 = vst.msk [vmem:[#allocation2 + $0x30] sm:$0xff] %vm1764_vm4, %v1720_v46  ;;  %v1211_v42 = vmul.f32 %v9180_v8, %v1033_v52  ;;  %847 = vperm.xlu0 %8917, %v202_v44   ;;  %v1968_v56 = vsel %vm141_vm0, %v1965_v5, %v1967_v47  ;;  %v9384_v57 = vsel %vm443_vm1, %v2140_v4, %v2142_v50 }
  0xcc   :  { %v1351_v55 = vpop.permute.xlu1 %1350  ;;  %v1262_v58 = vadd.f32 %v1212_v29, %v958_v51  ;;  %7902 = vmatmul.mubr.msk.f32.gmra.mrb[4].mxu1 %vm1764_vm4, %v1968_v56  ;;  %v209_v29 = vrot.slane %v9409_v7, 7 }
  0xcd   :  { %v1566_v60 = vmul.f32 %v9189_v12, %v1351_v55  ;;  %1124 = vperm.xlu1 %8916, %v9323_v54   ;;  %7904 = vmatprep.mubr.msk.f32.mxu1 %vm8972_vm2, %v8973_v41  ;;  %v1261_v3 = vadd.f32 %v1211_v42, %v957_v61  ;;  %v9429_v54 = vld [vmem:[%s10666_s0 + $0x118] sm:$0xff]  ;;  %v510_v42 = vsel %vm443_vm1, %v507_v48, %v509_v25 }
  0xce   :  { %v1346_v2 = vpop.permute.xlu0 %1345  ;;  %v211_v44 = vrot.slane %v9429_v54, 7 }
  0xcf   :  { %v1616_v63 = vadd.f32 %v1566_v60, %v1262_v58  ;;  %v1565_v4 = vmul.f32 %v9189_v12, %v1346_v2  ;;  %1120 = vperm.xlu0 %8917, %v9302_v53  }
  0xd0   :  { %v753_v5 = vpop.permute.xlu1 %752  ;;  %v212_v56 = vsel %vm141_vm0, %v209_v29, %v211_v44 }
  0xd1   :  { %v1673_v6 = vadd.f32 %v9207_v28, %v1616_v63  ;;  %1460 = vperm.xlu1 %8916, %v508_v40   ;;  %v1615_v0 = vadd.f32 %v1565_v4, %v1261_v3  ;;  %v960_v11 = vmul.f32 %v9182_v9, %v753_v5  ;;  %v210_v3 = vsel %vm141_vm0, %v207_v62, %v209_v29 }
  0xd2   :  { %v748_v16 = vpop.permute.xlu0 %747  ;;  %v1821_v17 = vld [vmem:[#allocation2 + $0x30] ss:$2 sm:$0xff]  ;;  %v1871_v19 = vld [vmem:[#allocation2 + $0x31] ss:$2 sm:$0xff]  ;;  %v513_v4 = vrot.slane %v9429_v54, 1 }
  0xd3   :  { %v1723_v14 = vmax.f32 %v1673_v6, 0.0  ;;  %v1672_v21 = vadd.f32 %v9207_v28, %v1615_v0  ;;  %1455 = vperm.xlu0 %8917, %v506_v10   ;;  %v9412_v53 = vmax.f32 %v1821_v17, %v1871_v19  ;;  %v959_v43 = vmul.f32 %v9182_v9, %v748_v16 }
  0xd4   :  { %v1045_v23 = vpop.permute.xlu1 %1044  ;;  %v515_v10 = vrot.slane %v9462_v49, 1 }
  0xd5   :  { %1774 = vst.msk [vmem:[#allocation2 + $0x48] sm:$0xff] %vm1764_vm4, %v1723_v14  ;;  %v1214_v1 = vmul.f32 %v9180_v8, %v1045_v23  ;;  %862 = vperm.xlu1 %8916, %v208_v13   ;;  %v1722_v26 = vmax.f32 %v1672_v21, 0.0  ;;  %7826 = vmatmul.mubr.msk.f32.gmra.mrb[6].mxu0 %vm1764_vm4, %v9412_v53  ;;  %v1969_v27 = vrot.slane %v9412_v53, 7  ;;  %v2144_v31 = vrot.slane %v9412_v53, 1 }
  0xd6   :  { %v1041_v18 = vpop.permute.xlu0 %1040  ;;  %7828 = vmatprep.mubr.msk.f32.mxu0 %vm8972_vm2, %v8973_v41 }
  0xd7   :  { %1773 = vst.msk [vmem:[#allocation2 + $0x40] sm:$0xff] %vm1764_vm4, %v1722_v26  ;;  %v1213_v22 = vmul.f32 %v9180_v8, %v1041_v18  ;;  %857 = vperm.xlu0 %8917, %v206_v24   ;;  %v1970_v35 = vsel %vm141_vm0, %v1967_v47, %v1969_v27  ;;  %v9437_v36 = vsel %vm443_vm1, %v2142_v50, %v2144_v31  ;;  %v213_v24 = vrot.slane %v9462_v49, 7 }
  0xd8   :  { %v1361_v33 = vpop.permute.xlu1 %1360  ;;  %v1264_v37 = vadd.f32 %v1214_v1, %v960_v11  ;;  %7905 = vmatmul.mubr.msk.f32.gmra.mrb[6].mxu1 %vm1764_vm4, %v1970_v35  ;;  %v516_v1 = vsel %vm443_vm1, %v513_v4, %v515_v10 }
  0xd9   :  { %v1568_v39 = vmul.f32 %v9189_v12, %v1361_v33  ;;  %1132 = vperm.xlu1 %8916, %v9376_v32   ;;  %7907 = vmatprep.mubr.msk.f32.mxu1 %vm8972_vm2, %v8973_v41  ;;  %v1263_v47 = vadd.f32 %v1213_v22, %v959_v43  ;;  %v9482_v32 = vld [vmem:[%s10666_s0 + $0x128] sm:$0xff]  ;;  %v514_v33 = vsel %vm443_vm1, %v511_v30, %v513_v4 }
  0xda   :  { %v1356_v46 = vpop.permute.xlu0 %1355  ;;  %v215_v25 = vrot.slane %v9482_v32, 7 }
  0xdb   :  { %v1618_v45 = vadd.f32 %v1568_v39, %v1264_v37  ;;  %v1567_v50 = vmul.f32 %v9189_v12, %v1356_v46  ;;  %1128 = vperm.xlu0 %8917, %v9356_v38  }
  0xdc   :  { %v763_v51 = vpop.permute.xlu1 %762  ;;  %v216_v37 = vsel %vm141_vm0, %v213_v24, %v215_v25 }
  0xdd   :  { %v1675_v52 = vadd.f32 %v9207_v28, %v1618_v45  ;;  %1470 = vperm.xlu1 %8916, %v512_v20   ;;  %v1617_v55 = vadd.f32 %v1567_v50, %v1263_v47  ;;  %v962_v13 = vmul.f32 %v9182_v9, %v763_v51  ;;  %v9515_v45 = vld [vmem:[%s10666_s0 + $0x130] sm:$0xff]  ;;  %v214_v50 = vsel %vm141_vm0, %v211_v44, %v213_v24 }
  0xde   :  { %v758_v60 = vpop.permute.xlu0 %757  ;;  %v1823_v61 = vld [vmem:[#allocation2 + $0x40] ss:$2 sm:$0xff]  ;;  %v1873_v40 = vld [vmem:[#allocation2 + $0x41] ss:$2 sm:$0xff]  ;;  %v517_v51 = vrot.slane %v9482_v32, 1  ;;  %v217_v4 = vrot.slane %v9515_v45, 7 }
  0xdf   :  { %v1725_v58 = vmax.f32 %v1675_v52, 0.0  ;;  %v1674_v63 = vadd.f32 %v9207_v28, %v1617_v55  ;;  %1465 = vperm.xlu0 %8917, %v510_v42   ;;  %v9465_v38 = vmax.f32 %v1823_v61, %v1873_v40  ;;  %v961_v53 = vmul.f32 %v9182_v9, %v758_v60 }
  0xe0   :  { %v1053_v2 = vpop.permute.xlu1 %1052  ;;  %v519_v55 = vrot.slane %v9515_v45, 1 }
  0xe1   :  { %1776 = vst.msk [vmem:[#allocation2 + $0x58] sm:$0xff] %vm1764_vm4, %v1725_v58  ;;  %v1216_v48 = vmul.f32 %v9180_v8, %v1053_v2  ;;  %872 = vperm.xlu1 %8916, %v212_v56   ;;  %v1724_v5 = vmax.f32 %v1674_v63, 0.0  ;;  %7829 = vmatmul.mubr.msk.f32.gmra.mrb[8].mxu0 %vm1764_vm4, %v9465_v38  ;;  %v1971_v6 = vrot.slane %v9465_v38, 7  ;;  %v2146_v0 = vrot.slane %v9465_v38, 1 }
  0xe2   :  { %v1049_v14 = vpop.permute.xlu0 %1048  ;;  %7831 = vmatprep.mubr.msk.f32.mxu0 %vm8972_vm2, %v8973_v41 }
  0xe3   :  { %1775 = vst.msk [vmem:[#allocation2 + $0x50] sm:$0xff] %vm1764_vm4, %v1724_v5  ;;  %v1215_v62 = vmul.f32 %v9180_v8, %v1049_v14  ;;  %867 = vperm.xlu0 %8917, %v210_v3   ;;  %v1972_v17 = vsel %vm141_vm0, %v1969_v27, %v1971_v6  ;;  %v9490_v19 = vsel %vm443_vm1, %v2144_v31, %v2146_v0 }
  0xe4   :  { %v1371_v16 = vpop.permute.xlu1 %1370  ;;  %v1266_v21 = vadd.f32 %v1216_v48, %v962_v13  ;;  %7908 = vmatmul.mubr.msk.f32.gmra.mrb[8].mxu1 %vm1764_vm4, %v1972_v17  ;;  %v520_v3 = vsel %vm443_vm1, %v517_v51, %v519_v55  ;;  %v7403_v17 = vld [vmem:[%s10669_s3 + $0x28] sm:$0xff] }
  0xe5   :  { %v1570_v23 = vmul.f32 %v9189_v12, %v1371_v16  ;;  %1140 = vperm.xlu1 %8916, %v9429_v54   ;;  %7910 = vmatprep.mubr.msk.f32.mxu1 %vm8972_vm2, %v8973_v41  ;;  %v1265_v31 = vadd.f32 %v1215_v62, %v961_v53  ;;  %v9535_v54 = vld [vmem:[%s10666_s0 + $0x138] sm:$0xff]  ;;  %v7402_v16 = vld [vmem:[%s10669_s3 + $0x20] sm:$0xff] }
  0xe6   :  { %v1366_v27 = vpop.permute.xlu0 %1365  ;;  %v219_v5 = vrot.slane %v9535_v54, 7  ;;  %v8606_v53 = vpack.c.bf16 %v7403_v17, %v7402_v16  ;;  %v9636_v16 = vld [vmem:[%s10666_s0 + $0x150] sm:$0xff] }
  0xe7   :  { %v1620_v26 = vadd.f32 %v1570_v23, %v1266_v21  ;;  %v1569_v11 = vmul.f32 %v9189_v12, %v1366_v27  ;;  %1136 = vperm.xlu0 %8917, %v9409_v7   ;;  %v518_v23 = vsel %vm443_vm1, %v515_v10, %v517_v51 }
  0xe8   :  { %v773_v18 = vpop.permute.xlu1 %772  ;;  %v220_v24 = vsel %vm141_vm0, %v217_v4, %v219_v5  ;;  %8607 = vmatpush3.bf16.msra.mxu0 %v8606_v53 }
  0xe9   :  { %v1677_v22 = vadd.f32 %v9207_v28, %v1620_v26  ;;  %1480 = vperm.xlu1 %8916, %v516_v1   ;;  %v1619_v35 = vadd.f32 %v1569_v11, %v1265_v31  ;;  %v964_v58 = vmul.f32 %v9182_v9, %v773_v18  ;;  %v9578_v18 = vld [vmem:[%s10666_s0 + $0x140] sm:$0xff]  ;;  %8686 = vmatprep.subr.bf16.mxu0 %v8971_v34 }
  0xea   :  { %v768_v43 = vpop.permute.xlu0 %767  ;;  %v1825_v20 = vld [vmem:[#allocation2 + $0x50] ss:$2 sm:$0xff]  ;;  %v1875_v29 = vld [vmem:[#allocation2 + $0x51] ss:$2 sm:$0xff] }
  0xeb   :  { %v1727_v39 = vmax.f32 %v1677_v22, 0.0  ;;  %v1676_v46 = vadd.f32 %v9207_v28, %v1619_v35  ;;  %1475 = vperm.xlu0 %8917, %v514_v33   ;;  %v9518_v7 = vmax.f32 %v1825_v20, %v1875_v29  ;;  %v963_v48 = vmul.f32 %v9182_v9, %v768_v43 }
  0xec   :  { %v1061_v47 = vpop.permute.xlu1 %1060  ;;  %v218_v35 = vsel %vm141_vm0, %v215_v25, %v217_v4  ;;  %v523_v20 = vrot.slane %v9578_v18, 1 }
  0xed   :  { %1778 = vst.msk [vmem:[#allocation2 + $0x68] sm:$0xff] %vm1764_vm4, %v1727_v39  ;;  %v1218_v30 = vmul.f32 %v9180_v8, %v1061_v47  ;;  %882 = vperm.xlu1 %8916, %v216_v37   ;;  %v1726_v52 = vmax.f32 %v1676_v46, 0.0  ;;  %7832 = vmatmul.mubr.msk.f32.gmra.mrb[10].mxu0 %vm1764_vm4, %v9518_v7  ;;  %v1973_v42 = vrot.slane %v9518_v7, 7  ;;  %v2148_v56 = vrot.slane %v9518_v7, 1 }
  0xee   :  { %v1057_v60 = vpop.permute.xlu0 %1056  ;;  %7834 = vmatprep.mubr.msk.f32.mxu0 %vm8972_vm2, %v8973_v41  ;;  %v521_v37 = vrot.slane %v9535_v54, 1 }
  0xef   :  { %1777 = vst.msk [vmem:[#allocation2 + $0x60] sm:$0xff] %vm1764_vm4, %v1726_v52  ;;  %v1217_v44 = vmul.f32 %v9180_v8, %v1057_v60  ;;  %877 = vperm.xlu0 %8917, %v214_v50   ;;  %v1974_v40 = vsel %vm141_vm0, %v1971_v6, %v1973_v42  ;;  %v9547_v63 = vsel %vm443_vm1, %v2146_v0, %v2148_v56 }
  0xf0   :  { %v1381_v61 = vpop.permute.xlu1 %1380  ;;  %v1268_v2 = vadd.f32 %v1218_v30, %v964_v58  ;;  %7911 = vmatmul.mubr.msk.f32.gmra.mrb[10].mxu1 %vm1764_vm4, %v1974_v40 }
  0xf1   :  { %v1572_v38 = vmul.f32 %v9189_v12, %v1381_v61  ;;  %1148 = vperm.xlu1 %8916, %v9482_v32   ;;  %7913 = vmatprep.mubr.msk.f32.mxu1 %vm8972_vm2, %v8973_v41  ;;  %v1267_v13 = vadd.f32 %v1217_v44, %v963_v48  ;;  %v9599_v32 = vld [vmem:[%s10666_s0 + $0x148] sm:$0xff]  ;;  %v524_v44 = vsel %vm443_vm1, %v521_v37, %v523_v20 }
  0xf2   :  { %v1376_v0 = vpop.permute.xlu0 %1375  ;;  %v223_v7 = vrot.slane %v9599_v32, 7  ;;  %v525_v53 = vrot.slane %v9599_v32, 1 }
  0xf3   :  { %v1622_v6 = vadd.f32 %v1572_v38, %v1268_v2  ;;  %v1571_v14 = vmul.f32 %v9189_v12, %v1376_v0  ;;  %1144 = vperm.xlu0 %8917, %v9462_v49  }
  0xf4   :  { %v783_v62 = vpop.permute.xlu1 %782 }
  0xf5   :  { %v1679_v21 = vadd.f32 %v9207_v28, %v1622_v6  ;;  %1490 = vperm.xlu1 %8916, %v520_v3   ;;  %v1621_v1 = vadd.f32 %v1571_v14, %v1267_v13  ;;  %v966_v46 = vmul.f32 %v9182_v9, %v783_v62  ;;  %v522_v3 = vsel %vm443_vm1, %v519_v55, %v521_v37 }
  0xf6   :  { %v778_v27 = vpop.permute.xlu0 %777  ;;  %v1827_v31 = vld [vmem:[#allocation2 + $0x60] ss:$2 sm:$0xff]  ;;  %v1877_v11 = vld [vmem:[#allocation2 + $0x61] ss:$2 sm:$0xff] }
  0xf7   :  { %v1729_v26 = vmax.f32 %v1679_v21, 0.0  ;;  %v1678_v49 = vadd.f32 %v9207_v28, %v1621_v1  ;;  %1485 = vperm.xlu0 %8917, %v518_v23   ;;  %v9581_v10 = vmax.f32 %v1827_v31, %v1877_v11  ;;  %v965_v60 = vmul.f32 %v9182_v9, %v778_v27 }
  0xf8   :  { %v1069_v22 = vpop.permute.xlu1 %1068 }
  0xf9   :  { %1780 = vst.msk [vmem:[#allocation2 + $0x78] sm:$0xff] %vm1764_vm4, %v1729_v26  ;;  %v1220_v33 = vmul.f32 %v9180_v8, %v1069_v22  ;;  %892 = vperm.xlu1 %8916, %v220_v24   ;;  %v1728_v39 = vmax.f32 %v1678_v49, 0.0  ;;  %7835 = vmatmul.mubr.msk.f32.gmra.mrb[12].mxu0 %vm1764_vm4, %v9581_v10  ;;  %v1975_v43 = vrot.slane %v9581_v10, 7  ;;  %v2150_v29 = vrot.slane %v9581_v10, 1 }
  0xfa   :  { %v1065_v47 = vpop.permute.xlu0 %1064  ;;  %7837 = vmatprep.mubr.msk.f32.mxu0 %vm8972_vm2, %v8973_v41  ;;  %v527_v26 = vrot.slane %v9636_v16, 1 }
  0xfb   :  { %1779 = vst.msk [vmem:[#allocation2 + $0x70] sm:$0xff] %vm1764_vm4, %v1728_v39  ;;  %v1219_v25 = vmul.f32 %v9180_v8, %v1065_v47  ;;  %887 = vperm.xlu0 %8917, %v218_v35   ;;  %v1976_v50 = vsel %vm141_vm0, %v1973_v42, %v1975_v43  ;;  %v9611_v51 = vsel %vm443_vm1, %v2148_v56, %v2150_v29  ;;  %v221_v42 = vrot.slane %v9578_v18, 7 }
  0xfc   :  { %v1391_v30 = vpop.permute.xlu1 %1390  ;;  %v1270_v52 = vadd.f32 %v1220_v33, %v966_v46  ;;  %7914 = vmatmul.mubr.msk.f32.gmra.mrb[12].mxu1 %vm1764_vm4, %v1976_v50  ;;  %v528_v39 = vsel %vm443_vm1, %v525_v53, %v527_v26  ;;  %v225_v46 = vrot.slane %v9636_v16, 7 }
  0xfd   :  { %v1574_v58 = vmul.f32 %v9189_v12, %v1391_v30  ;;  %1156 = vperm.xlu1 %8916, %v9535_v54   ;;  %7916 = vmatprep.mubr.msk.f32.mxu1 %vm8972_vm2, %v8973_v41  ;;  %v1269_v40 = vadd.f32 %v1219_v25, %v965_v60  ;;  %v224_v6 = vsel %vm141_vm0, %v221_v42, %v223_v7  ;;  %v9656_v54 = vld [vmem:[%s10666_s0 + $0x158] sm:$0xff] }
  0xfe   :  { %v1386_v61 = vpop.permute.xlu0 %1385  ;;  %v222_v23 = vsel %vm141_vm0, %v219_v5, %v221_v42 }
  0xff   :  { %v1624_v56 = vadd.f32 %v1574_v58, %v1270_v52  ;;  %v1573_v2 = vmul.f32 %v9189_v12, %v1386_v61  ;;  %1152 = vperm.xlu0 %8917, %v9515_v45   ;;  %v526_v58 = vsel %vm443_vm1, %v523_v20, %v525_v53 }
 0x100   :  { %v793_v38 = vpop.permute.xlu1 %792 }
 0x101   :  { %v1681_v48 = vadd.f32 %v9207_v28, %v1624_v56  ;;  %1500 = vperm.xlu1 %8916, %v524_v44   ;;  %v1623_v4 = vadd.f32 %v1573_v2, %v1269_v40  ;;  %v968_v31 = vmul.f32 %v9182_v9, %v793_v38  ;;  %v9689_v2 = vld [vmem:[%s10666_s0 + $0x160] sm:$0xff] }
 0x102   :  { %v788_v13 = vpop.permute.xlu0 %787  ;;  %v1829_v14 = vld [vmem:[#allocation2 + $0x70] ss:$2 sm:$0xff]  ;;  %v1879_v62 = vld [vmem:[#allocation2 + $0x71] ss:$2 sm:$0xff] }
 0x103   :  { %v1731_v0 = vmax.f32 %v1681_v48, 0.0  ;;  %v1680_v17 = vadd.f32 %v9207_v28, %v1623_v4  ;;  %1495 = vperm.xlu0 %8917, %v522_v3   ;;  %v9639_v45 = vmax.f32 %v1829_v14, %v1879_v62  ;;  %v967_v37 = vmul.f32 %v9182_v9, %v788_v13 }
 0x104   :  { %v1077_v21 = vpop.permute.xlu1 %1076  ;;  %v226_v3 = vsel %vm141_vm0, %v223_v7, %v225_v46  ;;  %v529_v4 = vrot.slane %v9656_v54, 1  ;;  %v531_v13 = vrot.slane %v9689_v2, 1 }
 0x105   :  { %1782 = vst.msk [vmem:[#allocation2 + $0x88] sm:$0xff] %vm1764_vm4, %v1731_v0  ;;  %v1222_v55 = vmul.f32 %v9180_v8, %v1077_v21  ;;  %902 = vperm.xlu1 %8916, %v224_v6   ;;  %v1730_v1 = vmax.f32 %v1680_v17, 0.0  ;;  %7838 = vmatmul.mubr.msk.f32.gmra.mrb[14].mxu0 %vm1764_vm4, %v9639_v45  ;;  %v1977_v24 = vrot.slane %v9639_v45, 7  ;;  %v2152_v27 = vrot.slane %v9639_v45, 1 }
 0x106   :  { %v1073_v11 = vpop.permute.xlu0 %1072  ;;  %7840 = vmatprep.mubr.msk.f32.mxu0 %vm8972_vm2, %v8973_v41 }
 0x107   :  { %1781 = vst.msk [vmem:[#allocation2 + $0x80] sm:$0xff] %vm1764_vm4, %v1730_v1  ;;  %v1221_v5 = vmul.f32 %v9180_v8, %v1073_v11  ;;  %897 = vperm.xlu0 %8917, %v222_v23   ;;  %v1978_v22 = vsel %vm141_vm0, %v1975_v43, %v1977_v24  ;;  %v9664_v10 = vsel %vm443_vm1, %v2150_v29, %v2152_v27  ;;  %v227_v43 = vrot.slane %v9656_v54, 7 }
 0x108   :  { %v1401_v49 = vpop.permute.xlu1 %1400  ;;  %v1272_v33 = vadd.f32 %v1222_v55, %v968_v31  ;;  %7917 = vmatmul.mubr.msk.f32.gmra.mrb[14].mxu1 %vm1764_vm4, %v1978_v22  ;;  %v532_v31 = vsel %vm443_vm1, %v529_v4, %v531_v13  ;;  %v229_v11 = vrot.slane %v9689_v2, 7 }
 0x109   :  { %v1576_v35 = vmul.f32 %v9189_v12, %v1401_v49  ;;  %1164 = vperm.xlu1 %8916, %v9599_v32   ;;  %7919 = vmatprep.mubr.msk.f32.mxu1 %vm8972_vm2, %v8973_v41  ;;  %v1271_v25 = vadd.f32 %v1221_v5, %v967_v37  ;;  %v228_v44 = vsel %vm141_vm0, %v225_v46, %v227_v43  ;;  %v9709_v32 = vld [vmem:[%s10666_s0 + $0x168] sm:$0xff] }
 0x10a   :  { %v1396_v47 = vpop.permute.xlu0 %1395  ;;  %v530_v37 = vsel %vm443_vm1, %v527_v26, %v529_v4 }
 0x10b   :  { %v1626_v29 = vadd.f32 %v1576_v35, %v1272_v33  ;;  %v1575_v30 = vmul.f32 %v9189_v12, %v1396_v47  ;;  %1160 = vperm.xlu0 %8917, %v9578_v18  }
 0x10c   :  { %v803_v50 = vpop.permute.xlu1 %802 }
 0x10d   :  { %v1683_v52 = vadd.f32 %v9207_v28, %v1626_v29  ;;  %1510 = vperm.xlu1 %8916, %v528_v39   ;;  %v1625_v60 = vadd.f32 %v1575_v30, %v1271_v25  ;;  %v970_v62 = vmul.f32 %v9182_v9, %v803_v50  ;;  %v9742_v50 = vld [vmem:[%s10666_s0 + $0x170] sm:$0xff] }
 0x10e   :  { %v798_v56 = vpop.permute.xlu0 %797  ;;  %v1831_v61 = vld [vmem:[#allocation2 + $0x80] ss:$2 sm:$0xff]  ;;  %v1881_v40 = vld [vmem:[#allocation2 + $0x81] ss:$2 sm:$0xff] }
 0x10f   :  { %v1733_v42 = vmax.f32 %v1683_v52, 0.0  ;;  %v1682_v38 = vadd.f32 %v9207_v28, %v1625_v60  ;;  %1505 = vperm.xlu0 %8917, %v526_v58   ;;  %v9692_v18 = vmax.f32 %v1831_v61, %v1881_v40  ;;  %v969_v1 = vmul.f32 %v9182_v9, %v798_v56 }
 0x110   :  { %v1085_v48 = vpop.permute.xlu1 %1084  ;;  %v230_v60 = vsel %vm141_vm0, %v227_v43, %v229_v11  ;;  %v535_v56 = vrot.slane %v9742_v50, 1 }
 0x111   :  { %1784 = vst.msk [vmem:[#allocation2 + $0x98] sm:$0xff] %vm1764_vm4, %v1733_v42  ;;  %v1224_v20 = vmul.f32 %v9180_v8, %v1085_v48  ;;  %912 = vperm.xlu1 %8916, %v228_v44   ;;  %v1732_v6 = vmax.f32 %v1682_v38, 0.0  ;;  %7841 = vmatmul.mubr.msk.f32.gmra.mrb[16].mxu0 %vm1764_vm4, %v9692_v18  ;;  %v1979_v0 = vrot.slane %v9692_v18, 7  ;;  %v2154_v14 = vrot.slane %v9692_v18, 1 }
 0x112   :  { %v1081_v17 = vpop.permute.xlu0 %1080  ;;  %7843 = vmatprep.mubr.msk.f32.mxu0 %vm8972_vm2, %v8973_v41  ;;  %v533_v44 = vrot.slane %v9709_v32, 1 }
 0x113   :  { %1783 = vst.msk [vmem:[#allocation2 + $0x90] sm:$0xff] %vm1764_vm4, %v1732_v6  ;;  %v1223_v7 = vmul.f32 %v9180_v8, %v1081_v17  ;;  %907 = vperm.xlu0 %8917, %v226_v3   ;;  %v1980_v45 = vsel %vm141_vm0, %v1977_v24, %v1979_v0  ;;  %v9717_v55 = vsel %vm443_vm1, %v2152_v27, %v2154_v14  ;;  %v231_v24 = vrot.slane %v9709_v32, 7 }
 0x114   :  { %v1411_v21 = vpop.permute.xlu1 %1410  ;;  %v1274_v23 = vadd.f32 %v1224_v20, %v970_v62  ;;  %7920 = vmatmul.mubr.msk.f32.gmra.mrb[16].mxu1 %vm1764_vm4, %v1980_v45  ;;  %v536_v62 = vsel %vm443_vm1, %v533_v44, %v535_v56  ;;  %v233_v17 = vrot.slane %v9742_v50, 7 }
 0x115   :  { %v1578_v53 = vmul.f32 %v9189_v12, %v1411_v21  ;;  %1172 = vperm.xlu1 %8916, %v9656_v54   ;;  %7922 = vmatprep.mubr.msk.f32.mxu1 %vm8972_vm2, %v8973_v41  ;;  %v1273_v49 = vadd.f32 %v1223_v7, %v969_v1  ;;  %v232_v46 = vsel %vm141_vm0, %v229_v11, %v231_v24  ;;  %v9762_v54 = vld [vmem:[%s10666_s0 + $0x178] sm:$0xff] }
 0x116   :  { %v1406_v5 = vpop.permute.xlu0 %1405 }
 0x117   :  { %v1628_v27 = vadd.f32 %v1578_v53, %v1274_v23  ;;  %v1577_v22 = vmul.f32 %v9189_v12, %v1406_v5  ;;  %1168 = vperm.xlu0 %8917, %v9636_v16   ;;  %v9788_v53 = vld [vmem:[%s10668_s2] ss:$0 sm:$0xff] }
 0x118   :  { %v813_v33 = vpop.permute.xlu1 %812 }
 0x119   :  { %v1685_v35 = vadd.f32 %v9207_v28, %v1628_v27  ;;  %1520 = vperm.xlu1 %8916, %v532_v31   ;;  %v1627_v39 = vadd.f32 %v1577_v22, %v1273_v49  ;;  %v972_v40 = vmul.f32 %v9182_v9, %v813_v33  ;;  %v534_v31 = vsel %vm443_vm1, %v531_v13, %v533_v44 }
 0x11a   :  { %v808_v47 = vpop.permute.xlu0 %807  ;;  %v1833_v25 = vld [vmem:[#allocation2 + $0x90] ss:$2 sm:$0xff]  ;;  %v1883_v30 = vld [vmem:[#allocation2 + $0x91] ss:$2 sm:$0xff] }
 0x11b   :  { %v1735_v29 = vmax.f32 %v1685_v35, 0.0  ;;  %v1684_v52 = vadd.f32 %v9207_v28, %v1627_v39  ;;  %1515 = vperm.xlu0 %8917, %v530_v37   ;;  %v9745_v16 = vmax.f32 %v1833_v25, %v1883_v30  ;;  %v971_v6 = vmul.f32 %v9182_v9, %v808_v47  ;;  %v9800_v35 = vld [vmem:[%s10666_s0 + $0x180] sm:$0xff] }
 0x11c   :  { %v1093_v58 = vpop.permute.xlu1 %1092  ;;  %v539_v30 = vrot.slane %v9800_v35, 1 }
 0x11d   :  { %1786 = vst.msk [vmem:[#allocation2 + $0xa8] sm:$0xff] %vm1764_vm4, %v1735_v29  ;;  %v1226_v26 = vmul.f32 %v9180_v8, %v1093_v58  ;;  %922 = vperm.xlu1 %8916, %v232_v46   ;;  %v1734_v42 = vmax.f32 %v1684_v52, 0.0  ;;  %7844 = vmatmul.mubr.msk.f32.gmra.mrb[18].mxu0 %vm1764_vm4, %v9745_v16  ;;  %v1981_v28 = vrot.slane %v9745_v16, 7  ;;  %v2156_v61 = vrot.slane %v9745_v16, 1 }
 0x11e   :  { %v1089_v38 = vpop.permute.xlu0 %1088  ;;  %7846 = vmatprep.mubr.msk.f32.mxu0 %vm8972_vm2, %v8973_v41  ;;  %v234_v46 = vsel %vm141_vm0, %v231_v24, %v233_v17  ;;  %v537_v29 = vrot.slane %v9762_v54, 1 }
 0x11f   :  { %1785 = vst.msk [vmem:[#allocation2 + $0xa0] sm:$0xff] %vm1764_vm4, %v1734_v42  ;;  %v1225_v43 = vmul.f32 %v9180_v8, %v1089_v38  ;;  %917 = vperm.xlu0 %8917, %v230_v60   ;;  %v1982_v18 = vsel %vm141_vm0, %v1979_v0, %v1981_v28  ;;  %v9770_v20 = vsel %vm443_vm1, %v2154_v14, %v2156_v61  ;;  %v235_v0 = vrot.slane %v9762_v54, 7 }
 0x120   :  { %v1421_v48 = vpop.permute.xlu1 %1420  ;;  %v1276_v3 = vadd.f32 %v1226_v26, %v972_v40  ;;  %7923 = vmatmul.mubr.msk.f32.gmra.mrb[18].mxu1 %vm1764_vm4, %v1982_v18 }
 0x121   :  { %v1580_v4 = vmul.f32 %v9189_v12, %v1421_v48  ;;  %1180 = vperm.xlu1 %8916, %v9709_v32   ;;  %7925 = vmatprep.mubr.msk.f32.mxu1 %vm8972_vm2, %v8973_v41  ;;  %v1275_v21 = vadd.f32 %v1225_v43, %v971_v6  ;;  %v236_v27 = vsel %vm141_vm0, %v233_v17, %v235_v0  ;;  %v9820_v32 = vld [vmem:[%s10666_s0 + $0x188] sm:$0xff]  ;;  %v237_v48 = vrot.slane %v9800_v35, 7 }
 0x122   :  { %v1416_v7 = vpop.permute.xlu0 %1415  ;;  %v540_v43 = vsel %vm443_vm1, %v537_v29, %v539_v30  ;;  %v538_v17 = vsel %vm443_vm1, %v535_v56, %v537_v29 }
 0x123   :  { %v1630_v14 = vadd.f32 %v1580_v4, %v1276_v3  ;;  %v1579_v45 = vmul.f32 %v9189_v12, %v1416_v7  ;;  %1176 = vperm.xlu0 %8917, %v9689_v2  }
 0x124   :  { %v823_v23 = vpop.permute.xlu1 %822 }
 0x125   :  { %v1687_v1 = vadd.f32 %v9788_v53, %v1630_v14  ;;  %1530 = vperm.xlu1 %8916, %v536_v62   ;;  %v1629_v11 = vadd.f32 %v1579_v45, %v1275_v21  ;;  %v974_v58 = vmul.f32 %v9182_v9, %v823_v23 }
 0x126   :  { %v818_v49 = vpop.permute.xlu0 %817  ;;  %v1835_v22 = vld [vmem:[#allocation2 + $0xa0] ss:$2 sm:$0xff]  ;;  %v1885_v33 = vld [vmem:[#allocation2 + $0xa1] ss:$2 sm:$0xff] }
 0x127   :  { %v1737_v5 = vmax.f32 %v1687_v1, 0.0  ;;  %v1686_v37 = vadd.f32 %v9788_v53, %v1629_v11  ;;  %1525 = vperm.xlu0 %8917, %v534_v31   ;;  %v9803_v2 = vmax.f32 %v1835_v22, %v1885_v33  ;;  %v973_v38 = vmul.f32 %v9182_v9, %v818_v49 }
 0x128   :  { %v1101_v39 = vpop.permute.xlu1 %1100  ;;  %v541_v22 = vrot.slane %v9820_v32, 1 }
 0x129   :  { %1788 = vst.msk [vmem:[#allocation2 + $0xb8] sm:$0xff] %vm1764_vm4, %v1737_v5  ;;  %v1228_v13 = vmul.f32 %v9180_v8, %v1101_v39  ;;  %932 = vperm.xlu1 %8916, %v236_v27   ;;  %v1736_v47 = vmax.f32 %v1686_v37, 0.0  ;;  %7847 = vmatmul.mubr.msk.f32.gmra.mrb[20].mxu0 %vm1764_vm4, %v9803_v2  ;;  %v1983_v25 = vrot.slane %v9803_v2, 7  ;;  %v2158_v52 = vrot.slane %v9803_v2, 1 }
 0x12a   :  { %v1097_v16 = vpop.permute.xlu0 %1096  ;;  %7849 = vmatprep.mubr.msk.f32.mxu0 %vm8972_vm2, %v8973_v41 }
 0x12b   :  { %1787 = vst.msk [vmem:[#allocation2 + $0xb0] sm:$0xff] %vm1764_vm4, %v1736_v47  ;;  %v1227_v24 = vmul.f32 %v9180_v8, %v1097_v16  ;;  %927 = vperm.xlu0 %8917, %v234_v46   ;;  %v1984_v60 = vsel %vm141_vm0, %v1981_v28, %v1983_v25  ;;  %v9828_v44 = vsel %vm443_vm1, %v2156_v61, %v2158_v52  ;;  %v239_v28 = vrot.slane %v9820_v32, 7 }
 0x12c   :  { %v1431_v26 = vpop.permute.xlu1 %1430  ;;  %v1278_v42 = vadd.f32 %v1228_v13, %v974_v58  ;;  %7926 = vmatmul.mubr.msk.f32.gmra.mrb[20].mxu1 %vm1764_vm4, %v1984_v60  ;;  %v593_v58 = vsel %vm443_vm1, %v541_v22, 0.0 }
 0x12d   :  { %v1582_v40 = vmul.f32 %v9189_v12, %v1431_v26  ;;  %1188 = vperm.xlu1 %8916, %v9762_v54   ;;  %7928 = vmatprep.mubr.msk.f32.mxu1 %vm8972_vm2, %v8973_v41  ;;  %v1277_v3 = vadd.f32 %v1227_v24, %v973_v38  ;;  %v240_v7 = vsel %vm141_vm0, %v237_v48, %v239_v28 }
 0x12e   :  { %v1426_v18 = vpop.permute.xlu0 %1425 }
 0x12f   :  { %v1632_v61 = vadd.f32 %v1582_v40, %v1278_v42  ;;  %v1581_v4 = vmul.f32 %v9189_v12, %v1426_v18  ;;  %1184 = vperm.xlu0 %8917, %v9742_v50   ;;  %v238_v50 = vsel %vm141_vm0, %v235_v0, %v237_v48  ;;  %v9879_v40 = vadd.s32 96, %v9163_v59 }
 0x130   :  { %v833_v6 = vpop.permute.xlu1 %832 }
 0x131   :  { %v1689_v62 = vadd.f32 %v9788_v53, %v1632_v61  ;;  %1540 = vperm.xlu1 %8916, %v540_v43   ;;  %v1631_v14 = vadd.f32 %v1581_v4, %v1277_v3  ;;  %v976_v37 = vmul.f32 %v9182_v9, %v833_v6  ;;  %vm2051_vm6 = vcmp.eq.s32.totalorder %v9879_v40, 100 }
 0x132   :  { %v828_v45 = vpop.permute.xlu0 %827  ;;  %v1837_v23 = vld [vmem:[#allocation2 + $0xb0] ss:$2 sm:$0xff]  ;;  %v1887_v1 = vld [vmem:[#allocation2 + $0xb1] ss:$2 sm:$0xff]  ;;  %vm2226_vm7 = vcmp.eq.s32.totalorder %v9879_v40, 99 }
 0x133   :  { %v1739_v21 = vmax.f32 %v1689_v62, 0.0  ;;  %v1688_v31 = vadd.f32 %v9788_v53, %v1631_v14  ;;  %1535 = vperm.xlu0 %8917, %v538_v17   ;;  %v1925_v27 = vmax.f32 %v1837_v23, %v1887_v1  ;;  %v975_v47 = vmul.f32 %v9182_v9, %v828_v45 }
 0x134   :  { %v1109_v11 = vpop.permute.xlu1 %1108 }
 0x135   :  { %1790 = vst.msk [vmem:[#allocation2 + $0xc8] sm:$0xff] %vm1764_vm4, %v1739_v21  ;;  %v1230_v5 = vmul.f32 %v9180_v8, %v1109_v11  ;;  %942 = vperm.xlu1 %8916, %v240_v7   ;;  %v1738_v56 = vmax.f32 %v1688_v31, 0.0  ;;  %7850 = vmatmul.mubr.msk.f32.gmra.mrb[22].mxu0 %vm1764_vm4, %v1925_v27  ;;  %v1985_v49 = vrot.slane %v1925_v27, 7  ;;  %v2160_v33 = vrot.slane %v1925_v27, 1 }
 0x136   :  { %v1105_v39 = vpop.permute.xlu0 %1104  ;;  %7852 = vmatprep.mubr.msk.f32.mxu0 %vm8972_vm2, %v8973_v41 }
 0x137   :  { %1789 = vst.msk [vmem:[#allocation2 + $0xc0] sm:$0xff] %vm1764_vm4, %v1738_v56  ;;  %v1229_v2 = vmul.f32 %v9180_v8, %v1105_v39  ;;  %937 = vperm.xlu0 %8917, %v238_v50   ;;  %v1986_v0 = vsel %vm141_vm0, %v1983_v25, %v1985_v49  ;;  %v9863_v13 = vsel %vm443_vm1, %v2158_v52, %v2160_v33 }
 0x138   :  { %v1441_v54 = vpop.permute.xlu1 %1440  ;;  %v1280_v46 = vadd.f32 %v1230_v5, %v976_v37  ;;  %7929 = vmatmul.mubr.msk.f32.gmra.mrb[22].mxu1 %vm1764_vm4, %v1986_v0 }
 0x139   :  { %v1584_v29 = vmul.f32 %v9189_v12, %v1441_v54  ;;  %1196 = vperm.xlu1 %8916, %v9820_v32   ;;  %7931 = vmatprep.mubr.msk.f32.mxu1 %vm8972_vm2, %v8973_v41  ;;  %v1279_v25 = vadd.f32 %v1229_v2, %v975_v47  ;;  %v542_v32 = vsel %vm443_vm1, %v539_v30, %v541_v22 }
 0x13a   :  { %v1436_v24 = vpop.permute.xlu0 %1435 }
 0x13b   :  { %v1634_v16 = vadd.f32 %v1584_v29, %v1280_v46  ;;  %v1583_v52 = vmul.f32 %v9189_v12, %v1436_v24  ;;  %1192 = vperm.xlu0 %8917, %v9800_v35  }
 0x13c   :  { %v843_v26 = vpop.permute.xlu1 %842 }
 0x13d   :  { %v1691_v60 = vadd.f32 %v9788_v53, %v1634_v16  ;;  %1550 = vperm.xlu1 %8916, %v593_v58   ;;  %v1633_v42 = vadd.f32 %v1583_v52, %v1279_v25  ;;  %v978_v6 = vmul.f32 %v9182_v9, %v843_v26 }
 0x13e   :  { %v838_v43 = vpop.permute.xlu0 %837  ;;  %v1839_v48 = vld [vmem:[#allocation2 + $0xc0] ss:$2 sm:$0xff]  ;;  %v1889_v28 = vld [vmem:[#allocation2 + $0xc1] ss:$2 sm:$0xff] }
 0x13f   :  { %v1741_v38 = vmax.f32 %v1691_v60, 0.0  ;;  %v1690_v61 = vadd.f32 %v9788_v53, %v1633_v42  ;;  %1545 = vperm.xlu0 %8917, %v542_v32   ;;  %v1926_v3 = vmax.f32 %v1839_v48, %v1889_v28  ;;  %v977_v31 = vmul.f32 %v9182_v9, %v838_v43 }
 0x140   :  { %v1117_v18 = vpop.permute.xlu1 %1116 }
 0x141   :  { %1792 = vst.msk [vmem:[#allocation2 + $0xd8] sm:$0xff] %vm1764_vm4, %v1741_v38  ;;  %v1232_v4 = vmul.f32 %v9180_v8, %v1117_v18  ;;  %v1740_v35 = vmax.f32 %v1690_v61, 0.0  ;;  %7853 = vmatmul.mubr.msk.f32.gmra.mrb[24].mxu0 %vm1764_vm4, %v1926_v3  ;;  %v1987_v30 = vrot.slane %v1926_v3, 7  ;;  %v2162_v59 = vrot.slane %v1926_v3, 1 }
 0x142   :  { %v1113_v62 = vpop.permute.xlu0 %1112  ;;  %7855 = vmatprep.mubr.msk.f32.mxu0 %vm8972_vm2, %v8973_v41 }
 0x143   :  { %1791 = vst.msk [vmem:[#allocation2 + $0xd0] sm:$0xff] %vm1764_vm4, %v1740_v35  ;;  %v1231_v17 = vmul.f32 %v9180_v8, %v1113_v62  ;;  %v1988_v7 = vsel %vm141_vm0, %v1985_v49, %v1987_v30  ;;  %v9893_v21 = vsel %vm443_vm1, %v2160_v33, %v2162_v59  ;;  %v1282_v45 = vadd.f32 %v1232_v4, %v978_v6 }
 0x144   :  { %v1451_v14 = vpop.permute.xlu1 %1450  ;;  %v2126_v1 = vsel %vm2051_vm6, 0.0, %v1988_v7 }
 0x145   :  { %v1586_v23 = vmul.f32 %v9189_v12, %v1451_v14  ;;  %7932 = vmatmul.mubr.msk.f32.gmra.mrb[24].mxu1 %vm1764_vm4, %v2126_v1  ;;  %v1281_v5 = vadd.f32 %v1231_v17, %v977_v31 }
 0x146   :  { %v1446_v27 = vpop.permute.xlu0 %1445  ;;  %7934 = vmatprep.mubr.msk.f32.mxu1 %vm8972_vm2, %v8973_v41 }
 0x147   :  { %v1636_v11 = vadd.f32 %v1586_v23, %v1282_v45  ;;  %v1585_v50 = vmul.f32 %v9189_v12, %v1446_v27 }
 0x148   :  { %v853_v56 = vpop.permute.xlu1 %852 }
 0x149   :  { %v1693_v49 = vadd.f32 %v9788_v53, %v1636_v11  ;;  %v1635_v22 = vadd.f32 %v1585_v50, %v1281_v5  ;;  %v980_v24 = vmul.f32 %v9182_v9, %v853_v56 }
 0x14a   :  { %v848_v37 = vpop.permute.xlu0 %847  ;;  %v1841_v39 = vld [vmem:[#allocation2 + $0xd0] ss:$2 sm:$0xff]  ;;  %v1891_v2 = vld [vmem:[#allocation2 + $0xd1] ss:$2 sm:$0xff] }
 0x14b   :  { %v1743_v33 = vmax.f32 %v1693_v49, 0.0  ;;  %v1692_v54 = vadd.f32 %v9788_v53, %v1635_v22  ;;  %v1927_v46 = vmax.f32 %v1841_v39, %v1891_v2  ;;  %v979_v43 = vmul.f32 %v9182_v9, %v848_v37 }
 0x14c   :  { %v1125_v0 = vpop.permute.xlu1 %1124 }
 0x14d   :  { %1794 = vst.msk [vmem:[#allocation2 + $0xe8] sm:$0xff] %vm1764_vm4, %v1743_v33  ;;  %v1234_v29 = vmul.f32 %v9180_v8, %v1125_v0  ;;  %v1742_v47 = vmax.f32 %v1692_v54, 0.0  ;;  %7856 = vmatmul.mubr.msk.f32.gmra.mrb[26].mxu0 %vm1764_vm4, %v1927_v46  ;;  %v1989_v58 = vrot.slane %v1927_v46, 7  ;;  %v2164_v16 = vrot.slane %v1927_v46, 1 }
 0x14e   :  { %v1121_v25 = vpop.permute.xlu0 %1120  ;;  %7858 = vmatprep.mubr.msk.f32.mxu0 %vm8972_vm2, %v8973_v41 }
 0x14f   :  { %1793 = vst.msk [vmem:[#allocation2 + $0xe0] sm:$0xff] %vm1764_vm4, %v1742_v47  ;;  %v1233_v52 = vmul.f32 %v9180_v8, %v1121_v25  ;;  %v1990_v60 = vsel %vm141_vm0, %v1987_v30, %v1989_v58  ;;  %v2165_v32 = vsel %vm443_vm1, %v2162_v59, %v2164_v16  ;;  %v1284_v42 = vadd.f32 %v1234_v29, %v980_v24 }
 0x150   :  { %v1461_v26 = vpop.permute.xlu1 %1460  ;;  %7935 = vmatmul.mubr.msk.f32.gmra.mrb[26].mxu1 %vm1764_vm4, %v1990_v60  ;;  %v9916_v40 = vsel %vm2226_vm7, 0.0, %v2165_v32 }
 0x151   :  { %v1588_v38 = vmul.f32 %v9189_v12, %v1461_v26  ;;  %7937 = vmatprep.mubr.msk.f32.mxu1 %vm8972_vm2, %v8973_v41  ;;  %v1283_v61 = vadd.f32 %v1233_v52, %v979_v43 }
 0x152   :  { %v1456_v28 = vpop.permute.xlu0 %1455 }
 0x153   :  { %v1638_v48 = vadd.f32 %v1588_v38, %v1284_v42  ;;  %v1587_v18 = vmul.f32 %v9189_v12, %v1456_v28 }
 0x154   :  { %v863_v3 = vpop.permute.xlu1 %862 }
 0x155   :  { %v1695_v4 = vadd.f32 %v9788_v53, %v1638_v48  ;;  %v1637_v35 = vadd.f32 %v1587_v18, %v1283_v61  ;;  %v982_v11 = vmul.f32 %v9182_v9, %v863_v3 }
 0x156   :  { %v858_v59 = vpop.permute.xlu0 %857  ;;  %v1843_v6 = vld [vmem:[#allocation2 + $0xe0] ss:$2 sm:$0xff]  ;;  %v1893_v62 = vld [vmem:[#allocation2 + $0xe1] ss:$2 sm:$0xff] }
 0x157   :  { %v1745_v30 = vmax.f32 %v1695_v4, 0.0  ;;  %v1694_v17 = vadd.f32 %v9788_v53, %v1637_v35  ;;  %v1928_v7 = vmax.f32 %v1843_v6, %v1893_v62  ;;  %v981_v37 = vmul.f32 %v9182_v9, %v858_v59 }
 0x158   :  { %v1133_v14 = vpop.permute.xlu1 %1132 }
 0x159   :  { %1796 = vst.msk [vmem:[#allocation2 + $0xf8] sm:$0xff] %vm1764_vm4, %v1745_v30  ;;  %v1236_v45 = vmul.f32 %v9180_v8, %v1133_v14  ;;  %v1744_v23 = vmax.f32 %v1694_v17, 0.0  ;;  %7859 = vmatmul.mubr.msk.f32.gmra.mrb[28].mxu0 %vm1764_vm4, %v1928_v7  ;;  %v1991_v1 = vrot.slane %v1928_v7, 7  ;;  %v2166_v31 = vrot.slane %v1928_v7, 1 }
 0x15a   :  { %v1129_v27 = vpop.permute.xlu0 %1128  ;;  %7861 = vmatprep.mubr.msk.f32.mxu0 %vm8972_vm2, %v8973_v41 }
 0x15b   :  { %1795 = vst.msk [vmem:[#allocation2 + $0xf0] sm:$0xff] %vm1764_vm4, %v1744_v23  ;;  %v1235_v5 = vmul.f32 %v9180_v8, %v1129_v27  ;;  %v1992_v56 = vsel %vm141_vm0, %v1989_v58, %v1991_v1  ;;  %v9934_v49 = vsel %vm443_vm1, %v2164_v16, %v2166_v31  ;;  %v1286_v22 = vadd.f32 %v1236_v45, %v982_v11 }
 0x15c   :  { %v1471_v50 = vpop.permute.xlu1 %1470  ;;  %7938 = vmatmul.mubr.msk.f32.gmra.mrb[28].mxu1 %vm1764_vm4, %v1992_v56 }
 0x15d   :  { %v1590_v33 = vmul.f32 %v9189_v12, %v1471_v50  ;;  %7940 = vmatprep.mubr.msk.f32.mxu1 %vm8972_vm2, %v8973_v41  ;;  %v1285_v54 = vadd.f32 %v1235_v5, %v981_v37 }
 0x15e   :  { %v1466_v2 = vpop.permute.xlu0 %1465 }
 0x15f   :  { %v1640_v39 = vadd.f32 %v1590_v33, %v1286_v22  ;;  %v1589_v0 = vmul.f32 %v9189_v12, %v1466_v2 }
 0x160   :  { %v873_v46 = vpop.permute.xlu1 %872 }
 0x161   :  { %v1697_v29 = vadd.f32 %v9788_v53, %v1640_v39  ;;  %v1639_v47 = vadd.f32 %v1589_v0, %v1285_v54  ;;  %v984_v48 = vmul.f32 %v9182_v9, %v873_v46 }
 0x162   :  { %v868_v16 = vpop.permute.xlu0 %867  ;;  %v1845_v24 = vld [vmem:[#allocation2 + $0xf0] ss:$2 sm:$0xff]  ;;  %v1895_v25 = vld [vmem:[#allocation2 + $0xf1] ss:$2 sm:$0xff] }
 0x163   :  { %v1747_v58 = vmax.f32 %v1697_v29, 0.0  ;;  %v1696_v52 = vadd.f32 %v9788_v53, %v1639_v47  ;;  %v1929_v60 = vmax.f32 %v1845_v24, %v1895_v25  ;;  %v983_v59 = vmul.f32 %v9182_v9, %v868_v16 }
 0x164   :  { %v1141_v26 = vpop.permute.xlu1 %1140 }
 0x165   :  { %1798 = vst.msk [vmem:[#allocation2 + $0x108] sm:$0xff] %vm1764_vm4, %v1747_v58  ;;  %v1238_v32 = vmul.f32 %v9180_v8, %v1141_v26  ;;  %v1746_v42 = vmax.f32 %v1696_v52, 0.0  ;;  %7862 = vmatmul.mubr.msk.f32.gmra.mrb[30].mxu0 %vm1764_vm4, %v1929_v60  ;;  %v1993_v38 = vrot.slane %v1929_v60, 7  ;;  %v2168_v43 = vrot.slane %v1929_v60, 1 }
 0x166   :  { %v1137_v28 = vpop.permute.xlu0 %1136  ;;  %7864 = vmatprep.mubr.msk.f32.mxu0 %vm8972_vm2, %v8973_v41 }
 0x167   :  { %1797 = vst.msk [vmem:[#allocation2 + $0x100] sm:$0xff] %vm1764_vm4, %v1746_v42  ;;  %v1237_v61 = vmul.f32 %v9180_v8, %v1137_v28  ;;  %v1994_v3 = vsel %vm141_vm0, %v1991_v1, %v1993_v38  ;;  %v9954_v4 = vsel %vm443_vm1, %v2166_v31, %v2168_v43  ;;  %v1288_v35 = vadd.f32 %v1238_v32, %v984_v48 }
 0x168   :  { %v1481_v18 = vpop.permute.xlu1 %1480  ;;  %7941 = vmatmul.mubr.msk.f32.gmra.mrb[30].mxu1 %vm1764_vm4, %v1994_v3 }
 0x169   :  { %v1592_v30 = vmul.f32 %v9189_v12, %v1481_v18  ;;  %7943 = vmatprep.mubr.msk.f32.mxu1 %vm8972_vm2, %v8973_v41  ;;  %v1287_v17 = vadd.f32 %v1237_v61, %v983_v59 }
 0x16a   :  { %v1476_v62 = vpop.permute.xlu0 %1475 }
 0x16b   :  { %v1642_v6 = vadd.f32 %v1592_v30, %v1288_v35  ;;  %v1591_v14 = vmul.f32 %v9189_v12, %v1476_v62 }
 0x16c   :  { %v883_v7 = vpop.permute.xlu1 %882 }
 0x16d   :  { %v1699_v45 = vadd.f32 %v9788_v53, %v1642_v6  ;;  %v1641_v23 = vadd.f32 %v1591_v14, %v1287_v17  ;;  %v986_v2 = vmul.f32 %v9182_v9, %v883_v7 }
 0x16e   :  { %v878_v31 = vpop.permute.xlu0 %877  ;;  %v1847_v11 = vld [vmem:[#allocation2 + $0x100] ss:$2 sm:$0xff]  ;;  %v1897_v27 = vld [vmem:[#allocation2 + $0x101] ss:$2 sm:$0xff] }
 0x16f   :  { %v1749_v1 = vmax.f32 %v1699_v45, 0.0  ;;  %v1698_v5 = vadd.f32 %v9788_v53, %v1641_v23  ;;  %v1930_v56 = vmax.f32 %v1847_v11, %v1897_v27  ;;  %v985_v24 = vmul.f32 %v9182_v9, %v878_v31 }
 0x170   :  { %v1149_v50 = vpop.permute.xlu1 %1148 }
 0x171   :  { %1800 = vst.msk [vmem:[#allocation2 + $0x118] sm:$0xff] %vm1764_vm4, %v1749_v1  ;;  %v1240_v22 = vmul.f32 %v9180_v8, %v1149_v50  ;;  %v1748_v33 = vmax.f32 %v1698_v5, 0.0  ;;  %7865 = vmatmul.mubr.msk.f32.gmra.mrb[32].mxu0 %vm1764_vm4, %v1930_v56  ;;  %v1995_v37 = vrot.slane %v1930_v56, 7  ;;  %v2170_v39 = vrot.slane %v1930_v56, 1 }
 0x172   :  { %v1145_v54 = vpop.permute.xlu0 %1144  ;;  %7867 = vmatprep.mubr.msk.f32.mxu0 %vm8972_vm2, %v8973_v41 }
 0x173   :  { %1799 = vst.msk [vmem:[#allocation2 + $0x110] sm:$0xff] %vm1764_vm4, %v1748_v33  ;;  %v1239_v0 = vmul.f32 %v9180_v8, %v1145_v54  ;;  %v1996_v29 = vsel %vm141_vm0, %v1993_v38, %v1995_v37  ;;  %v9974_v47 = vsel %vm443_vm1, %v2168_v43, %v2170_v39  ;;  %v1290_v58 = vadd.f32 %v1240_v22, %v986_v2 }
 0x174   :  { %v1491_v46 = vpop.permute.xlu1 %1490  ;;  %7944 = vmatmul.mubr.msk.f32.gmra.mrb[32].mxu1 %vm1764_vm4, %v1996_v29 }
 0x175   :  { %v1594_v16 = vmul.f32 %v9189_v12, %v1491_v46  ;;  %7946 = vmatprep.mubr.msk.f32.mxu1 %vm8972_vm2, %v8973_v41  ;;  %v1289_v26 = vadd.f32 %v1239_v0, %v985_v24 }
 0x176   :  { %v1486_v52 = vpop.permute.xlu0 %1485 }
 0x177   :  { %v1644_v25 = vadd.f32 %v1594_v16, %v1290_v58  ;;  %v1593_v60 = vmul.f32 %v9189_v12, %v1486_v52 }
 0x178   :  { %v893_v32 = vpop.permute.xlu1 %892 }
 0x179   :  { %v1701_v42 = vadd.f32 %v9788_v53, %v1644_v25  ;;  %v1643_v38 = vadd.f32 %v1593_v60, %v1289_v26  ;;  %v988_v17 = vmul.f32 %v9182_v9, %v893_v32 }
 0x17a   :  { %v888_v48 = vpop.permute.xlu0 %887  ;;  %v1849_v28 = vld [vmem:[#allocation2 + $0x110] ss:$2 sm:$0xff]  ;;  %v1899_v61 = vld [vmem:[#allocation2 + $0x111] ss:$2 sm:$0xff] }
 0x17b   :  { %v1751_v43 = vmax.f32 %v1701_v42, 0.0  ;;  %v1700_v18 = vadd.f32 %v9788_v53, %v1643_v38  ;;  %v1931_v35 = vmax.f32 %v1849_v28, %v1899_v61  ;;  %v987_v27 = vmul.f32 %v9182_v9, %v888_v48 }
 0x17c   :  { %v1157_v3 = vpop.permute.xlu1 %1156 }
 0x17d   :  { %1802 = vst.msk [vmem:[#allocation2 + $0x128] sm:$0xff] %vm1764_vm4, %v1751_v43  ;;  %v1242_v30 = vmul.f32 %v9180_v8, %v1157_v3  ;;  %v1750_v59 = vmax.f32 %v1700_v18, 0.0  ;;  %7868 = vmatmul.mubr.msk.f32.gmra.mrb[34].mxu0 %vm1764_vm4, %v1931_v35  ;;  %v1997_v6 = vrot.slane %v1931_v35, 7  ;;  %v2172_v62 = vrot.slane %v1931_v35, 1 }
 0x17e   :  { %v1153_v14 = vpop.permute.xlu0 %1152  ;;  %7870 = vmatprep.mubr.msk.f32.mxu0 %vm8972_vm2, %v8973_v41 }
 0x17f   :  { %1801 = vst.msk [vmem:[#allocation2 + $0x120] sm:$0xff] %vm1764_vm4, %v1750_v59  ;;  %v1241_v7 = vmul.f32 %v9180_v8, %v1153_v14  ;;  %v1998_v23 = vsel %vm141_vm0, %v1995_v37, %v1997_v6  ;;  %v9994_v1 = vsel %vm443_vm1, %v2170_v39, %v2172_v62  ;;  %v1292_v31 = vadd.f32 %v1242_v30, %v988_v17 }
 0x180   :  { %v1501_v45 = vpop.permute.xlu1 %1500  ;;  %7947 = vmatmul.mubr.msk.f32.gmra.mrb[34].mxu1 %vm1764_vm4, %v1998_v23 }
 0x181   :  { %v1596_v11 = vmul.f32 %v9189_v12, %v1501_v45  ;;  %7949 = vmatprep.mubr.msk.f32.mxu1 %vm8972_vm2, %v8973_v41  ;;  %v1291_v56 = vadd.f32 %v1241_v7, %v987_v27 }
 0x182   :  { %v1496_v50 = vpop.permute.xlu0 %1495 }
 0x183   :  { %v1646_v5 = vadd.f32 %v1596_v11, %v1292_v31  ;;  %v1595_v22 = vmul.f32 %v9189_v12, %v1496_v50 }
 0x184   :  { %v903_v33 = vpop.permute.xlu1 %902  ;;  %v2435_v39 = vpop.f32.mrb[0].mxu0 }
 0x185   :  { %v1703_v37 = vadd.f32 %v9788_v53, %v1646_v5  ;;  %v1645_v2 = vadd.f32 %v1595_v22, %v1291_v56  ;;  %v7818_v54 = vpop.f32.mrb[1].mxu0  ;;  %v990_v48 = vmul.f32 %v9182_v9, %v903_v33 }
 0x186   :  { %v898_v46 = vpop.permute.xlu0 %897  ;;  %v1851_v29 = vld [vmem:[#allocation2 + $0x120] ss:$2 sm:$0xff]  ;;  %v1901_v58 = vld [vmem:[#allocation2 + $0x121] ss:$2 sm:$0xff] }
 0x187   :  { %v1753_v0 = vmax.f32 %v1703_v37, 0.0  ;;  %v1702_v16 = vadd.f32 %v9788_v53, %v1645_v2  ;;  %v2700_v25 = vpop.f32.mrb[0].mxu1  ;;  %v1932_v52 = vmax.f32 %v1851_v29, %v1901_v58  ;;  %v989_v17 = vmul.f32 %v9182_v9, %v898_v46 }
 0x188   :  { %v1165_v24 = vpop.permute.xlu1 %1164  ;;  %v10006_v60 = vadd.f32 %v2700_v25, %v2435_v39  ;;  %v7897_v32 = vpop.f32.mrb[1].mxu1 }
 0x189   :  { %1804 = vst.msk [vmem:[#allocation2 + $0x138] sm:$0xff] %vm1764_vm4, %v1753_v0  ;;  %v1244_v26 = vmul.f32 %v9180_v8, %v1165_v24  ;;  %v1752_v42 = vmax.f32 %v1702_v16, 0.0  ;;  %7871 = vmatmul.mubr.msk.f32.gmra.mrb[36].mxu0 %vm1764_vm4, %v1932_v52  ;;  %v1999_v38 = vrot.slane %v1932_v52, 7  ;;  %v2174_v43 = vrot.slane %v1932_v52, 1 }
 0x18a   :  { %v1161_v28 = vpop.permute.xlu0 %1160  ;;  %7873 = vmatprep.mubr.msk.f32.mxu0 %vm8972_vm2, %v8973_v41 }
 0x18b   :  { %1803 = vst.msk [vmem:[#allocation2 + $0x130] sm:$0xff] %vm1764_vm4, %v1752_v42  ;;  %v1243_v61 = vmul.f32 %v9180_v8, %v1161_v28  ;;  %v2000_v3 = vsel %vm141_vm0, %v1997_v6, %v1999_v38  ;;  %v10016_v35 = vsel %vm443_vm1, %v2172_v62, %v2174_v43  ;;  %v1294_v30 = vadd.f32 %v1244_v26, %v990_v48 }
 0x18c   :  { %v1511_v18 = vpop.permute.xlu1 %1510  ;;  %7950 = vmatmul.mubr.msk.f32.gmra.mrb[36].mxu1 %vm1764_vm4, %v2000_v3 }
 0x18d   :  { %v1598_v59 = vmul.f32 %v9189_v12, %v1511_v18  ;;  %7952 = vmatprep.mubr.msk.f32.mxu1 %vm8972_vm2, %v8973_v41  ;;  %v1293_v45 = vadd.f32 %v1243_v61, %v989_v17 }
 0x18e   :  { %v1506_v7 = vpop.permute.xlu0 %1505 }
 0x18f   :  { %v1648_v14 = vadd.f32 %v1598_v59, %v1294_v30  ;;  %v1597_v23 = vmul.f32 %v9189_v12, %v1506_v7 }
 0x190   :  { %v913_v31 = vpop.permute.xlu1 %912  ;;  %v2440_v62 = vpop.f32.mrb[2].mxu0 }
 0x191   :  { %v1705_v6 = vadd.f32 %v9788_v53, %v1648_v14  ;;  %v1647_v11 = vadd.f32 %v1597_v23, %v1293_v45  ;;  %v7821_v27 = vpop.f32.mrb[3].mxu0  ;;  %v992_v24 = vmul.f32 %v9182_v9, %v913_v31 }
 0x192   :  { %v908_v50 = vpop.permute.xlu0 %907  ;;  %v1853_v56 = vld [vmem:[#allocation2 + $0x130] ss:$2 sm:$0xff]  ;;  %v1903_v22 = vld [vmem:[#allocation2 + $0x131] ss:$2 sm:$0xff] }
 0x193   :  { %v1755_v5 = vmax.f32 %v1705_v6, 0.0  ;;  %v1704_v33 = vadd.f32 %v9788_v53, %v1647_v11  ;;  %v2705_v39 = vpop.f32.mrb[2].mxu1  ;;  %v1933_v2 = vmax.f32 %v1853_v56, %v1903_v22  ;;  %v991_v61 = vmul.f32 %v9182_v9, %v908_v50 }
 0x194   :  { %v1173_v37 = vpop.permute.xlu1 %1172  ;;  %v10028_v0 = vadd.f32 %v2705_v39, %v2440_v62  ;;  %v7900_v46 = vpop.f32.mrb[3].mxu1 }
 0x195   :  { %1806 = vst.msk [vmem:[#allocation2 + $0x148] sm:$0xff] %vm1764_vm4, %v1755_v5  ;;  %v1246_v54 = vmul.f32 %v9180_v8, %v1173_v37  ;;  %v1754_v29 = vmax.f32 %v1704_v33, 0.0  ;;  %7874 = vmatmul.mubr.msk.f32.gmra.mrb[38].mxu0 %vm1764_vm4, %v1933_v2  ;;  %v2001_v58 = vrot.slane %v1933_v2, 7  ;;  %v2176_v16 = vrot.slane %v1933_v2, 1 }
 0x196   :  { %v1169_v25 = vpop.permute.xlu0 %1168  ;;  %7876 = vmatprep.mubr.msk.f32.mxu0 %vm8972_vm2, %v8973_v41 }
 0x197   :  { %1805 = vst.msk [vmem:[#allocation2 + $0x140] sm:$0xff] %vm1764_vm4, %v1754_v29  ;;  %v1245_v52 = vmul.f32 %v9180_v8, %v1169_v25  ;;  %v2002_v32 = vsel %vm141_vm0, %v1999_v38, %v2001_v58  ;;  %v10038_v42 = vsel %vm443_vm1, %v2174_v43, %v2176_v16  ;;  %v1296_v48 = vadd.f32 %v1246_v54, %v992_v24 }
 0x198   :  { %v1521_v26 = vpop.permute.xlu1 %1520  ;;  %7953 = vmatmul.mubr.msk.f32.gmra.mrb[38].mxu1 %vm1764_vm4, %v2002_v32 }
 0x199   :  { %v1600_v28 = vmul.f32 %v9189_v12, %v1521_v26  ;;  %7955 = vmatprep.mubr.msk.f32.mxu1 %vm8972_vm2, %v8973_v41  ;;  %v1295_v30 = vadd.f32 %v1245_v52, %v991_v61 }
 0x19a   :  { %v1516_v3 = vpop.permute.xlu0 %1515 }
 0x19b   :  { %v1650_v18 = vadd.f32 %v1600_v28, %v1296_v48  ;;  %v1599_v59 = vmul.f32 %v9189_v12, %v1516_v3 }
 0x19c   :  { %v923_v17 = vpop.permute.xlu1 %922  ;;  %v2445_v43 = vpop.f32.mrb[4].mxu0 }
 0x19d   :  { %v1707_v38 = vadd.f32 %v9788_v53, %v1650_v18  ;;  %v1649_v14 = vadd.f32 %v1599_v59, %v1295_v30  ;;  %v7824_v7 = vpop.f32.mrb[5].mxu0  ;;  %v994_v2 = vmul.f32 %v9182_v9, %v923_v17 }
 0x19e   :  { %v918_v23 = vpop.permute.xlu0 %917  ;;  %v1855_v31 = vld [vmem:[#allocation2 + $0x140] ss:$2 sm:$0xff]  ;;  %v1905_v6 = vld [vmem:[#allocation2 + $0x141] ss:$2 sm:$0xff] }
 0x19f   :  { %v1757_v45 = vmax.f32 %v1707_v38, 0.0  ;;  %v1706_v62 = vadd.f32 %v9788_v53, %v1649_v14  ;;  %v2710_v27 = vpop.f32.mrb[4].mxu1  ;;  %v1934_v5 = vmax.f32 %v1855_v31, %v1905_v6  ;;  %v993_v32 = vmul.f32 %v9182_v9, %v918_v23 }
 0x1a0   :  { %v1181_v11 = vpop.permute.xlu1 %1180  ;;  %v10050_v56 = vadd.f32 %v2710_v27, %v2445_v43  ;;  %v7903_v22 = vpop.f32.mrb[5].mxu1 }
 0x1a1   :  { %1808 = vst.msk [vmem:[#allocation2 + $0x158] sm:$0xff] %vm1764_vm4, %v1757_v45  ;;  %v1248_v50 = vmul.f32 %v9180_v8, %v1181_v11  ;;  %v1756_v33 = vmax.f32 %v1706_v62, 0.0  ;;  %7877 = vmatmul.mubr.msk.f32.gmra.mrb[40].mxu0 %vm1764_vm4, %v1934_v5  ;;  %v2003_v37 = vrot.slane %v1934_v5, 7  ;;  %v2178_v39 = vrot.slane %v1934_v5, 1 }
 0x1a2   :  { %v1177_v54 = vpop.permute.xlu0 %1176  ;;  %7879 = vmatprep.mubr.msk.f32.mxu0 %vm8972_vm2, %v8973_v41 }
 0x1a3   :  { %1807 = vst.msk [vmem:[#allocation2 + $0x150] sm:$0xff] %vm1764_vm4, %v1756_v33  ;;  %v1247_v46 = vmul.f32 %v9180_v8, %v1177_v54  ;;  %v2004_v24 = vsel %vm141_vm0, %v2001_v58, %v2003_v37  ;;  %v10060_v25 = vsel %vm443_vm1, %v2176_v16, %v2178_v39  ;;  %v1298_v52 = vadd.f32 %v1248_v50, %v994_v2 }
 0x1a4   :  { %v1531_v29 = vpop.permute.xlu1 %1530  ;;  %7956 = vmatmul.mubr.msk.f32.gmra.mrb[40].mxu1 %vm1764_vm4, %v2004_v24 }
 0x1a5   :  { %v1602_v26 = vmul.f32 %v9189_v12, %v1531_v29  ;;  %7958 = vmatprep.mubr.msk.f32.mxu1 %vm8972_vm2, %v8973_v41  ;;  %v1297_v61 = vadd.f32 %v1247_v46, %v993_v32 }
 0x1a6   :  { %v1526_v28 = vpop.permute.xlu0 %1525 }
 0x1a7   :  { %v1652_v48 = vadd.f32 %v1602_v26, %v1298_v52  ;;  %v1601_v18 = vmul.f32 %v9189_v12, %v1526_v28 }
 0x1a8   :  { %v933_v3 = vpop.permute.xlu1 %932  ;;  %v2450_v16 = vpop.f32.mrb[6].mxu0 }
 0x1a9   :  { %v1709_v58 = vadd.f32 %v9788_v53, %v1652_v48  ;;  %v1651_v30 = vadd.f32 %v1601_v18, %v1297_v61  ;;  %v7827_v59 = vpop.f32.mrb[7].mxu0  ;;  %v996_v22 = vmul.f32 %v9182_v9, %v933_v3 }
 0x1aa   :  { %v928_v38 = vpop.permute.xlu0 %927  ;;  %v1857_v43 = vld [vmem:[#allocation2 + $0x150] ss:$2 sm:$0xff]  ;;  %v1907_v14 = vld [vmem:[#allocation2 + $0x151] ss:$2 sm:$0xff] }
 0x1ab   :  { %v1759_v17 = vmax.f32 %v1709_v58, 0.0  ;;  %v1708_v7 = vadd.f32 %v9788_v53, %v1651_v30  ;;  %v2715_v23 = vpop.f32.mrb[6].mxu1  ;;  %v1935_v31 = vmax.f32 %v1857_v43, %v1907_v14  ;;  %v995_v26 = vmul.f32 %v9182_v9, %v928_v38 }
 0x1ac   :  { %v1189_v45 = vpop.permute.xlu1 %1188  ;;  %v10072_v62 = vadd.f32 %v2715_v23, %v2450_v16  ;;  %v7906_v11 = vpop.f32.mrb[7].mxu1 }
 0x1ad   :  { %1810 = vst.msk [vmem:[#allocation2 + $0x168] sm:$0xff] %vm1764_vm4, %v1759_v17  ;;  %v1250_v6 = vmul.f32 %v9180_v8, %v1189_v45  ;;  %v1758_v27 = vmax.f32 %v1708_v7, 0.0  ;;  %7880 = vmatmul.mubr.msk.f32.gmra.mrb[42].mxu0 %vm1764_vm4, %v1935_v31  ;;  %v2005_v5 = vrot.slane %v1935_v31, 7  ;;  %v2180_v50 = vrot.slane %v1935_v31, 1 }
 0x1ae   :  { %v1185_v33 = vpop.permute.xlu0 %1184  ;;  %7882 = vmatprep.mubr.msk.f32.mxu0 %vm8972_vm2, %v8973_v41 }
 0x1af   :  { %1809 = vst.msk [vmem:[#allocation2 + $0x160] sm:$0xff] %vm1764_vm4, %v1758_v27  ;;  %v1249_v2 = vmul.f32 %v9180_v8, %v1185_v33  ;;  %v2006_v46 = vsel %vm141_vm0, %v2003_v37, %v2005_v5  ;;  %v10082_v29 = vsel %vm443_vm1, %v2178_v39, %v2180_v50  ;;  %v1300_v24 = vadd.f32 %v1250_v6, %v996_v22 }
 0x1b0   :  { %v1541_v54 = vpop.permute.xlu1 %1540  ;;  %7959 = vmatmul.mubr.msk.f32.gmra.mrb[42].mxu1 %vm1764_vm4, %v2006_v46 }
 0x1b1   :  { %v1604_v52 = vmul.f32 %v9189_v12, %v1541_v54  ;;  %7961 = vmatprep.mubr.msk.f32.mxu1 %vm8972_vm2, %v8973_v41  ;;  %v1299_v28 = vadd.f32 %v1249_v2, %v995_v26 }
 0x1b2   :  { %v1536_v48 = vpop.permute.xlu0 %1535 }
 0x1b3   :  { %v1654_v32 = vadd.f32 %v1604_v52, %v1300_v24  ;;  %v1603_v61 = vmul.f32 %v9189_v12, %v1536_v48 }
 0x1b4   :  { %v943_v18 = vpop.permute.xlu1 %942  ;;  %v2455_v39 = vpop.f32.mrb[8].mxu0 }
 0x1b5   :  { %v1711_v37 = vadd.f32 %v9788_v53, %v1654_v32  ;;  %v1653_v3 = vadd.f32 %v1603_v61, %v1299_v28  ;;  %v7830_v58 = vpop.f32.mrb[9].mxu0  ;;  %v998_v22 = vmul.f32 %v9182_v9, %v943_v18 }
 0x1b6   :  { %v938_v30 = vpop.permute.xlu0 %937  ;;  %v1859_v59 = vld [vmem:[#allocation2 + $0x160] ss:$2 sm:$0xff]  ;;  %v1909_v17 = vld [vmem:[#allocation2 + $0x161] ss:$2 sm:$0xff] }
 0x1b7   :  { %v1761_v16 = vmax.f32 %v1711_v37, 0.0  ;;  %v1710_v38 = vadd.f32 %v9788_v53, %v1653_v3  ;;  %v2720_v14 = vpop.f32.mrb[8].mxu1  ;;  %v1936_v7 = vmax.f32 %v1859_v59, %v1909_v17  ;;  %v997_v32 = vmul.f32 %v9182_v9, %v938_v30 }
 0x1b8   :  { %v1197_v43 = vpop.permute.xlu1 %1196  ;;  %v10094_v23 = vadd.f32 %v2720_v14, %v2455_v39  ;;  %v7909_v31 = vpop.f32.mrb[9].mxu1 }
 0x1b9   :  { %1812 = vst.msk [vmem:[#allocation2 + $0x178] sm:$0xff] %vm1764_vm4, %v1761_v16  ;;  %v1252_v45 = vmul.f32 %v9180_v8, %v1197_v43  ;;  %v1760_v6 = vmax.f32 %v1710_v38, 0.0  ;;  %7883 = vmatmul.mubr.msk.f32.gmra.mrb[44].mxu0 %vm1764_vm4, %v1936_v7  ;;  %v2007_v11 = vrot.slane %v1936_v7, 7  ;;  %v2182_v27 = vrot.slane %v1936_v7, 1 }
 0x1ba   :  { %v1193_v33 = vpop.permute.xlu0 %1192  ;;  %7885 = vmatprep.mubr.msk.f32.mxu0 %vm8972_vm2, %v8973_v41 }
 0x1bb   :  { %1811 = vst.msk [vmem:[#allocation2 + $0x170] sm:$0xff] %vm1764_vm4, %v1760_v6  ;;  %v1251_v2 = vmul.f32 %v9180_v8, %v1193_v33  ;;  %v2008_v46 = vsel %vm141_vm0, %v2005_v5, %v2007_v11  ;;  %v10104_v24 = vsel %vm443_vm1, %v2180_v50, %v2182_v27  ;;  %v1302_v52 = vadd.f32 %v1252_v45, %v998_v22 }
 0x1bc   :  { %v1551_v54 = vpop.permute.xlu1 %1550  ;;  %7962 = vmatmul.mubr.msk.f32.gmra.mrb[44].mxu1 %vm1764_vm4, %v2008_v46 }
 0x1bd   :  { %v1606_v26 = vmul.f32 %v9189_v12, %v1551_v54  ;;  %7964 = vmatprep.mubr.msk.f32.mxu1 %vm8972_vm2, %v8973_v41  ;;  %v1301_v61 = vadd.f32 %v1251_v2, %v997_v32 }
 0x1be   :  { %v1546_v28 = vpop.permute.xlu0 %1545 }
 0x1bf   :  { %v1656_v48 = vadd.f32 %v1606_v26, %v1302_v52  ;;  %v1605_v8 = vmul.f32 %v9189_v12, %v1546_v28 }
 0x1c0   :  { %v2460_v18 = vpop.f32.mrb[10].mxu0 }
 0x1c1   :  { %v1713_v5 = vadd.f32 %v9788_v53, %v1656_v48  ;;  %v1655_v50 = vadd.f32 %v1605_v8, %v1301_v61  ;;  %v7833_v37 = vpop.f32.mrb[11].mxu0 }
 0x1c2   :  { %v1861_v3 = vld [vmem:[#allocation2 + $0x170] ss:$2 sm:$0xff]  ;;  %v1911_v58 = vld [vmem:[#allocation2 + $0x171] ss:$2 sm:$0xff] }
 0x1c3   :  { %v1763_v39 = vmax.f32 %v1713_v5, 0.0  ;;  %v1712_v16 = vadd.f32 %v9788_v53, %v1655_v50  ;;  %v2725_v59 = vpop.f32.mrb[10].mxu1  ;;  %v1937_v9 = vmax.f32 %v1861_v3, %v1911_v58 }
 0x1c4   :  { %v10115_v30 = vadd.f32 %v2725_v59, %v2460_v18  ;;  %v7912_v17 = vpop.f32.mrb[11].mxu1 }
 0x1c5   :  { %1814 = vst.msk [vmem:[#allocation2 + $0x188] sm:$0xff] %vm1764_vm4, %v1763_v39  ;;  %v1762_v38 = vmax.f32 %v1712_v16, 0.0  ;;  %7886 = vmatmul.mubr.msk.f32.gmra.mrb[46].mxu0 %vm1764_vm4, %v1937_v9  ;;  %v2009_v12 = vrot.slane %v1937_v9, 7  ;;  %v2184_v43 = vrot.slane %v1937_v9, 1  ;;  %v3287_v16 = vld [vmem:[#allocation5 + $0x28] sm:$0xff] }
 0x1c6   :  { %7888 = vmatprep.mubr.msk.f32.mxu0 %vm8972_vm2, %v8973_v41 }
 0x1c7   :  { %1813 = vst.msk [vmem:[#allocation2 + $0x180] sm:$0xff] %vm1764_vm4, %v1762_v38  ;;  %v2010_v14 = vsel %vm141_vm0, %v2007_v11, %v2009_v12  ;;  %v10123_v53 = vsel %vm443_vm1, %v2182_v27, %v2184_v43 }
 0x1c8   :  { %7965 = vmatmul.mubr.msk.f32.gmra.mrb[46].mxu1 %vm1764_vm4, %v2010_v14 }
 0x1c9   :  { %7967 = vmatprep.mubr.msk.f32.mxu1 %vm8972_vm2, %v8973_v41 }
 0x1cc   :  { %v2465_v7 = vpop.f32.mrb[12].mxu0 }
 0x1cd   :  { %v7836_v45 = vpop.f32.mrb[13].mxu0 }
 0x1ce   :  { %v1863_v31 = vld [vmem:[#allocation2 + $0x180] ss:$2 sm:$0xff]  ;;  %v1913_v6 = vld [vmem:[#allocation2 + $0x181] ss:$2 sm:$0xff] }
 0x1cf   :  { %v2730_v22 = vpop.f32.mrb[12].mxu1  ;;  %v10128_v33 = vmax.f32 %v1863_v31, %v1913_v6 }
 0x1d0   :  { %v10130_v2 = vadd.f32 %v2730_v22, %v2465_v7  ;;  %v7915_v54 = vpop.f32.mrb[13].mxu1 }
 0x1d1   :  { %7889 = vmatmul.mubr.msk.f32.gmra.mrb[48].mxu0 %vm1764_vm4, %v10128_v33  ;;  %v2011_v11 = vrot.slane %v10128_v33, 7  ;;  %v2186_v27 = vrot.slane %v10128_v33, 1  ;;  %v3288_v33 = vld [vmem:[#allocation5 + $0x30] sm:$0xff] }
 0x1d2   :  { %7974 = vmatprep.mubr.msk.f32.mxu0 %vm8972_vm2, %v8973_v41 }
 0x1d3   :  { %v2012_v46 = vsel %vm141_vm0, %v2009_v12, %v2011_v11  ;;  %v10142_v52 = vsel %vm443_vm1, %v2184_v43, %v2186_v27 }
 0x1d4   :  { %7968 = vmatmul.mubr.msk.f32.gmra.mrb[48].mxu1 %vm1764_vm4, %v2012_v46 }
 0x1d5   :  { %7975 = vmatmul.mubr.msk.f32.vlgmr.msra.gmra.mrb[50].mxu0 %vm1764_vm4, %v9331_v15  ;;  %8057 = vmatprep.mubr.msk.f32.mxu1 %vm8972_vm2, %v8973_v41 }
 0x1d6   :  { %7977 = vmatprep.mubr.msk.f32.mxu0 %vm8972_vm2, %v8973_v41 }
 0x1d8   :  { %v2470_v26 = vpop.f32.mrb[14].mxu0 }
 0x1d9   :  { %v7839_v32 = vpop.f32.mrb[15].mxu0  ;;  %7978 = vmatmul.mubr.msk.f32.gmra.mrb[52].mxu0 %vm1764_vm4, %v9384_v57 }
 0x1da   :  { %7980 = vmatprep.mubr.msk.f32.mxu0 %vm8972_vm2, %v8973_v41  ;;  %v3289_v32 = vld [vmem:[#allocation5 + $0x38] sm:$0xff] }
 0x1db   :  { %v2735_v48 = vpop.f32.mrb[14].mxu1 }
 0x1dc   :  { %v10155_v28 = vadd.f32 %v2735_v48, %v2470_v26  ;;  %v7918_v61 = vpop.f32.mrb[15].mxu1 }
 0x1dd   :  { %7981 = vmatmul.mubr.msk.f32.gmra.mrb[54].mxu0 %vm1764_vm4, %v9437_v36 }
 0x1de   :  { %7983 = vmatprep.mubr.msk.f32.mxu0 %vm8972_vm2, %v8973_v41 }
 0x1e1   :  { %7984 = vmatmul.mubr.msk.f32.gmra.mrb[56].mxu0 %vm1764_vm4, %v9490_v19 }
 0x1e2   :  { %7986 = vmatprep.mubr.msk.f32.mxu0 %vm8972_vm2, %v8973_v41 }
 0x1e4   :  { %v2475_v15 = vpop.f32.mrb[16].mxu0 }
 0x1e5   :  { %v7842_v57 = vpop.f32.mrb[17].mxu0  ;;  %7987 = vmatmul.mubr.msk.f32.gmra.mrb[58].mxu0 %vm1764_vm4, %v9547_v63 }
 0x1e6   :  { %7989 = vmatprep.mubr.msk.f32.mxu0 %vm8972_vm2, %v8973_v41 }
 0x1e7   :  { %v2740_v8 = vpop.f32.mrb[16].mxu1 }
 0x1e8   :  { %v10169_v5 = vadd.f32 %v2740_v8, %v2475_v15  ;;  %v7921_v36 = vpop.f32.mrb[17].mxu1 }
 0x1e9   :  { %7990 = vmatmul.mubr.msk.f32.gmra.mrb[60].mxu0 %vm1764_vm4, %v9611_v51 }
 0x1ea   :  { %7992 = vmatprep.mubr.msk.f32.mxu0 %vm8972_vm2, %v8973_v41 }
 0x1ed   :  { %7993 = vmatmul.mubr.msk.f32.gmra.mrb[62].mxu0 %vm1764_vm4, %v9664_v10 }
 0x1ee   :  { %7995 = vmatprep.mubr.msk.f32.mxu0 %vm8972_vm2, %v8973_v41 }
 0x1f0   :  { %v2480_v19 = vpop.f32.mrb[18].mxu0 }
 0x1f1   :  { %v7845_v63 = vpop.f32.mrb[19].mxu0  ;;  %7996 = vmatmul.mubr.msk.f32.gmra.mrb[64].mxu0 %vm1764_vm4, %v9717_v55 }
 0x1f2   :  { %7998 = vmatprep.mubr.msk.f32.mxu0 %vm8972_vm2, %v8973_v41 }
 0x1f3   :  { %v2745_v18 = vpop.f32.mrb[18].mxu1 }
 0x1f4   :  { %v10183_v50 = vadd.f32 %v2745_v18, %v2480_v19  ;;  %v7924_v51 = vpop.f32.mrb[19].mxu1 }
 0x1f5   :  { %7999 = vmatmul.mubr.msk.f32.gmra.mrb[66].mxu0 %vm1764_vm4, %v9770_v20 }
 0x1f6   :  { %8001 = vmatprep.mubr.msk.f32.mxu0 %vm8972_vm2, %v8973_v41 }
 0x1f9   :  { %8002 = vmatmul.mubr.msk.f32.gmra.mrb[68].mxu0 %vm1764_vm4, %v9828_v44 }
 0x1fa   :  { %8004 = vmatprep.mubr.msk.f32.mxu0 %vm8972_vm2, %v8973_v41 }
 0x1fc   :  { %v2485_v10 = vpop.f32.mrb[20].mxu0 }
 0x1fd   :  { %v7848_v55 = vpop.f32.mrb[21].mxu0  ;;  %8005 = vmatmul.mubr.msk.f32.gmra.mrb[70].mxu0 %vm1764_vm4, %v9863_v13 }
 0x1fe   :  { %8007 = vmatprep.mubr.msk.f32.mxu0 %vm8972_vm2, %v8973_v41 }
 0x1ff   :  { %v2750_v37 = vpop.f32.mrb[20].mxu1 }
 0x200   :  { %v10197_v39 = vadd.f32 %v2750_v37, %v2485_v10  ;;  %v7927_v20 = vpop.f32.mrb[21].mxu1 }
 0x201   :  { %8008 = vmatmul.mubr.msk.f32.gmra.mrb[72].mxu0 %vm1764_vm4, %v9893_v21 }
 0x202   :  { %8010 = vmatprep.mubr.msk.f32.mxu0 %vm8972_vm2, %v8973_v41 }
 0x205   :  { %8011 = vmatmul.mubr.msk.f32.gmra.mrb[74].mxu0 %vm1764_vm4, %v9916_v40  ;;  %v3286_v40 = vld [vmem:[#allocation5 + $0x20] sm:$0xff] }
 0x206   :  { %8013 = vmatprep.mubr.msk.f32.mxu0 %vm8972_vm2, %v8973_v41  ;;  %v8609_v59 = vpack.c.bf16 %v3287_v16, %v3286_v40 }
 0x208   :  { %v2490_v44 = vpop.f32.mrb[22].mxu0  ;;  %8610 = vmatpush3.bf16.msra.mxu1 %v8609_v59 }
 0x209   :  { %v7851_v13 = vpop.f32.mrb[23].mxu0  ;;  %8014 = vmatmul.mubr.msk.f32.gmra.mrb[76].mxu0 %vm1764_vm4, %v9934_v49  ;;  %8611 = vmatprep.subr.bf16.mxu1 %v8971_v34 }
 0x20a   :  { %8016 = vmatprep.mubr.msk.f32.mxu0 %vm8972_vm2, %v8973_v41  ;;  %v4330_v13 = vld [vmem:[#allocation5 + $0x1a0] sm:$0xff] }
 0x20b   :  { %v2755_v3 = vpop.f32.mrb[22].mxu1 }
 0x20c   :  { %v10211_v58 = vadd.f32 %v2755_v3, %v2490_v44  ;;  %v7930_v21 = vpop.f32.mrb[23].mxu1  ;;  %v4331_v3 = vld [vmem:[#allocation5 + $0x1a8] sm:$0xff] }
 0x20d   :  { %8017 = vmatmul.mubr.msk.f32.gmra.mrb[78].mxu0 %vm1764_vm4, %v9954_v4  ;;  %v8687_v21 = vpack.c.bf16 %v4331_v3, %v4330_v13 }
 0x20e   :  { %8019 = vmatprep.mubr.msk.f32.mxu0 %vm8972_vm2, %v8973_v41 }
 0x20f   :  { %8688 = vmatpush3.bf16.msra.mxu0 %v8687_v21 }
 0x210   :  { %8689 = vmatprep.subr.bf16.mxu0 %v8971_v34 }
 0x211   :  { %8020 = vmatmul.mubr.msk.f32.gmra.mrb[80].mxu0 %vm1764_vm4, %v9974_v47 }
 0x212   :  { %8022 = vmatprep.mubr.msk.f32.mxu0 %vm8972_vm2, %v8973_v41 }
 0x214   :  { %v2495_v49 = vpop.f32.mrb[24].mxu0 }
 0x215   :  { %v7854_v9 = vpop.f32.mrb[25].mxu0  ;;  %8023 = vmatmul.mubr.msk.f32.gmra.mrb[82].mxu0 %vm1764_vm4, %v9994_v1 }
 0x216   :  { %8025 = vmatprep.mubr.msk.f32.mxu0 %vm8972_vm2, %v8973_v41 }
 0x218   :  { %v2760_v4 = vpop.f32.mrb[24].mxu1 }
 0x219   :  { %v10226_v17 = vadd.f32 %v2760_v4, %v2495_v49  ;;  %v7933_v38 = vpop.f32.mrb[25].mxu1  ;;  %8026 = vmatmul.mubr.msk.f32.gmra.mrb[84].mxu0 %vm1764_vm4, %v10016_v35  ;;  %v4332_v49 = vld [vmem:[#allocation5 + $0x1b0] sm:$0xff] }
 0x21a   :  { %8028 = vmatprep.mubr.msk.f32.mxu0 %vm8972_vm2, %v8973_v41  ;;  %v4333_v38 = vld [vmem:[#allocation5 + $0x1b8] sm:$0xff] }
 0x21d   :  { %8029 = vmatmul.mubr.msk.f32.gmra.mrb[86].mxu0 %vm1764_vm4, %v10038_v42 }
 0x21e   :  { %8031 = vmatprep.mubr.msk.f32.mxu0 %vm8972_vm2, %v8973_v41 }
 0x220   :  { %v2500_v47 = vpop.f32.mrb[26].mxu0 }
 0x221   :  { %v7857_v1 = vpop.f32.mrb[27].mxu0  ;;  %8032 = vmatmul.mubr.msk.f32.gmra.mrb[88].mxu0 %vm1764_vm4, %v10060_v25 }
 0x222   :  { %8034 = vmatprep.mubr.msk.f32.mxu0 %vm8972_vm2, %v8973_v41 }
 0x223   :  { %v2765_v12 = vpop.f32.mrb[26].mxu1 }
 0x224   :  { %v10240_v43 = vadd.f32 %v2765_v12, %v2500_v47  ;;  %v7936_v35 = vpop.f32.mrb[27].mxu1  ;;  %v8690_v47 = vpack.c.bf16 %v4333_v38, %v4332_v49 }
 0x225   :  { %8035 = vmatmul.mubr.msk.f32.gmra.mrb[90].mxu0 %vm1764_vm4, %v10082_v29 }
 0x226   :  { %8037 = vmatprep.mubr.msk.f32.mxu0 %vm8972_vm2, %v8973_v41  ;;  %8691 = vmatpush3.bf16.msra.mxu0 %v8690_v47 }
 0x227   :  { %8698 = vmatprep.subr.bf16.mxu0 %v8971_v34 }
 0x229   :  { %8038 = vmatmul.mubr.msk.f32.gmra.mrb[92].mxu0 %vm1764_vm4, %v10104_v24  ;;  %v2213_v24 = vsel %vm443_vm1, %v2186_v27, 0.0  ;;  %v8612_v27 = vpack.c.bf16 %v3289_v32, %v3288_v33 }
 0x22a   :  { %8040 = vmatprep.mubr.msk.f32.mxu0 %vm8972_vm2, %v8973_v41 }
 0x22b   :  { %8613 = vmatpush3.bf16.msra.mxu1 %v8612_v27 }
 0x22c   :  { %v2505_v42 = vpop.f32.mrb[28].mxu0  ;;  %8614 = vmatprep.subr.bf16.mxu1 %v8971_v34 }
 0x22d   :  { %v7860_v25 = vpop.f32.mrb[29].mxu0  ;;  %8041 = vmatmul.mubr.msk.f32.gmra.mrb[94].mxu0 %vm1764_vm4, %v10123_v53 }
 0x22e   :  { %8043 = vmatprep.mubr.msk.f32.mxu0 %vm8972_vm2, %v8973_v41 }
 0x22f   :  { %v2770_v14 = vpop.f32.mrb[28].mxu1 }
 0x230   :  { %v10254_v7 = vadd.f32 %v2770_v14, %v2505_v42  ;;  %v7939_v29 = vpop.f32.mrb[29].mxu1 }
 0x231   :  { %8044 = vmatmul.mubr.msk.f32.gmra.mrb[96].mxu0 %vm1764_vm4, %v10142_v52 }
 0x232   :  { %8046 = vmatprep.mubr.msk.f32.mxu0 %vm8972_vm2, %v8973_v41 }
 0x235   :  { %8047 = vmatmul.mubr.msk.f32.gmra.mrb[98].mxu0 %vm1764_vm4, %v2213_v24 }
 0x236   :  { %8200 = vmatprep.mubr.msk.f32.mxu0 %vm8972_vm2, %v8973_v41 }
 0x238   :  { %v2510_v53 = vpop.f32.mrb[30].mxu0 }
 0x239   :  { %v7863_v45 = vpop.f32.mrb[31].mxu0 }
 0x23b   :  { %v2775_v31 = vpop.f32.mrb[30].mxu1 }
 0x23c   :  { %v10266_v6 = vadd.f32 %v2775_v31, %v2510_v53  ;;  %v7942_v22 = vpop.f32.mrb[31].mxu1 }
 0x244   :  { %v2515_v54 = vpop.f32.mrb[32].mxu0 }
 0x245   :  { %v7866_v11 = vpop.f32.mrb[33].mxu0 }
 0x247   :  { %v2780_v46 = vpop.f32.mrb[32].mxu1 }
 0x248   :  { %v10268_v52 = vadd.f32 %v2780_v46, %v2515_v54  ;;  %v7945_v26 = vpop.f32.mrb[33].mxu1 }
 0x250   :  { %v2520_v48 = vpop.f32.mrb[34].mxu0 }
 0x251   :  { %v7869_v61 = vpop.f32.mrb[35].mxu0 }
 0x253   :  { %v2785_v15 = vpop.f32.mrb[34].mxu1 }
 0x254   :  { %v10271_v57 = vadd.f32 %v2785_v15, %v2520_v48  ;;  %v7948_v8 = vpop.f32.mrb[35].mxu1  ;;  %v10292_v15 = vld [vmem:[%s10670_s4] ss:$0 sm:$0xff] }
 0x25c   :  { %v2525_v36 = vpop.f32.mrb[36].mxu0 }
 0x25d   :  { %v7872_v19 = vpop.f32.mrb[37].mxu0 }
 0x25f   :  { %v2790_v63 = vpop.f32.mrb[36].mxu1 }
 0x260   :  { %v10273_v18 = vadd.f32 %v2790_v63, %v2525_v36  ;;  %v7951_v51 = vpop.f32.mrb[37].mxu1 }
 0x268   :  { %v2530_v10 = vpop.f32.mrb[38].mxu0 }
 0x269   :  { %v7875_v55 = vpop.f32.mrb[39].mxu0 }
 0x26b   :  { %v2795_v37 = vpop.f32.mrb[38].mxu1 }
 0x26c   :  { %v10275_v20 = vadd.f32 %v2795_v37, %v2530_v10  ;;  %v7954_v44 = vpop.f32.mrb[39].mxu1 }
 0x274   :  { %v2535_v40 = vpop.f32.mrb[40].mxu0 }
 0x275   :  { %v7878_v16 = vpop.f32.mrb[41].mxu0 }
 0x277   :  { %v2800_v59 = vpop.f32.mrb[40].mxu1 }
 0x278   :  { %v10278_v9 = vadd.f32 %v2800_v59, %v2535_v40  ;;  %v7957_v4 = vpop.f32.mrb[41].mxu1 }
 0x280   :  { %v2540_v1 = vpop.f32.mrb[42].mxu0 }
 0x281   :  { %v7881_v12 = vpop.f32.mrb[43].mxu0 }
 0x283   :  { %v2805_v35 = vpop.f32.mrb[42].mxu1 }
 0x284   :  { %v10281_v42 = vadd.f32 %v2805_v35, %v2540_v1  ;;  %v7960_v25 = vpop.f32.mrb[43].mxu1 }
 0x28c   :  { %v2545_v14 = vpop.f32.mrb[44].mxu0 }
 0x28d   :  { %v7884_v29 = vpop.f32.mrb[45].mxu0 }
 0x28f   :  { %v2810_v24 = vpop.f32.mrb[44].mxu1 }
 0x290   :  { %v10283_v53 = vadd.f32 %v2810_v24, %v2545_v14  ;;  %v7963_v45 = vpop.f32.mrb[45].mxu1 }
 0x298   :  { %v2550_v31 = vpop.f32.mrb[46].mxu0 }
 0x299   :  { %v7887_v22 = vpop.f32.mrb[47].mxu0 }
 0x29b   :  { %v2815_v54 = vpop.f32.mrb[46].mxu1 }
 0x29c   :  { %v10285_v11 = vadd.f32 %v2815_v54, %v2550_v31  ;;  %v7966_v46 = vpop.f32.mrb[47].mxu1 }
 0x2a4   :  { %v2555_v26 = vpop.f32.mrb[48].mxu0 }
 0x2a5   :  { %v7890_v33 = vpop.f32.mrb[49].mxu0 }
 0x2a7   :  { %v2820_v32 = vpop.f32.mrb[48].mxu1 }
 0x2a8   :  { %v10287_v27 = vadd.f32 %v2820_v32, %v2555_v26  ;;  %v7969_v48 = vpop.f32.mrb[49].mxu1  ;;  %v2968_v61 = vpop.f32.mrb[50].mxu0 }
 0x2a9   :  { %v3092_v8 = vadd.f32 %v2968_v61, %v10006_v60  ;;  %v7976_v36 = vpop.f32.mrb[51].mxu0 }
 0x2ab   :  { %v3124_v19 = vadd.f32 %v10292_v15, %v3092_v8 }
 0x2ac   :  { %v2973_v63 = vpop.f32.mrb[52].mxu0 }
 0x2ad   :  { %v3149_v51 = vmax.f32 %v3124_v19, 0.0  ;;  %v3093_v10 = vadd.f32 %v2973_v63, %v10028_v0  ;;  %v7979_v55 = vpop.f32.mrb[53].mxu0 }
 0x2af   :  { %3175 = vst.msk [vmem:[#allocation3] sm:$0xff] %vm3174_vm8, %v3149_v51  ;;  %v3125_v37 = vadd.f32 %v10292_v15, %v3093_v10 }
 0x2b0   :  { %v2978_v44 = vpop.f32.mrb[54].mxu0 }
 0x2b1   :  { %v3150_v13 = vmax.f32 %v3125_v37, 0.0  ;;  %v3094_v3 = vadd.f32 %v2978_v44, %v10050_v56  ;;  %v7982_v21 = vpop.f32.mrb[55].mxu0 }
 0x2b3   :  { %3176 = vst.msk [vmem:[#allocation3 + $0x8] sm:$0xff] %vm3174_vm8, %v3150_v13  ;;  %v3126_v60 = vadd.f32 %v10292_v15, %v3094_v3 }
 0x2b4   :  { %v2983_v40 = vpop.f32.mrb[56].mxu0 }
 0x2b5   :  { %v3151_v16 = vmax.f32 %v3126_v60, 0.0  ;;  %v3095_v59 = vadd.f32 %v2983_v40, %v10072_v62  ;;  %v7985_v49 = vpop.f32.mrb[57].mxu0 }
 0x2b7   :  { %3177 = vst.msk [vmem:[#allocation3 + $0x10] sm:$0xff] %vm3174_vm8, %v3151_v16  ;;  %v3127_v0 = vadd.f32 %v10292_v15, %v3095_v59 }
 0x2b8   :  { %v2988_v4 = vpop.f32.mrb[58].mxu0 }
 0x2b9   :  { %v3152_v38 = vmax.f32 %v3127_v0, 0.0  ;;  %v3096_v47 = vadd.f32 %v2988_v4, %v10094_v23  ;;  %v7988_v1 = vpop.f32.mrb[59].mxu0 }
 0x2ba   :  { %v3200_v56 = vld [vmem:[#allocation3] ss:$2 sm:$0xff]  ;;  %v3226_v12 = vld [vmem:[#allocation3 + $0x1] ss:$2 sm:$0xff] }
 0x2bb   :  { %v3251_v35 = vmax.f32 %v3200_v56, %v3226_v12  ;;  %3178 = vst.msk [vmem:[#allocation3 + $0x18] sm:$0xff] %vm3174_vm8, %v3152_v38  ;;  %v3128_v25 = vadd.f32 %v10292_v15, %v3096_v47 }
 0x2bc   :  { %v2993_v14 = vpop.f32.mrb[60].mxu0 }
 0x2bd   :  { %3264 = vst.msk [vmem:[#allocation4] sm:$0xff] %vm3174_vm8, %v3251_v35  ;;  %v3153_v62 = vmax.f32 %v3128_v25, 0.0  ;;  %v3097_v29 = vadd.f32 %v2993_v14, %v10115_v30  ;;  %v7991_v24 = vpop.f32.mrb[61].mxu0 }
 0x2bf   :  { %3179 = vst.msk [vmem:[#allocation3 + $0x20] sm:$0xff] %vm3174_vm8, %v3153_v62  ;;  %v3129_v45 = vadd.f32 %v10292_v15, %v3097_v29 }
 0x2c0   :  { %v2998_v23 = vpop.f32.mrb[62].mxu0 }
 0x2c1   :  { %v3154_v31 = vmax.f32 %v3129_v45, 0.0  ;;  %v3098_v22 = vadd.f32 %v2998_v23, %v10130_v2  ;;  %v7994_v54 = vpop.f32.mrb[63].mxu0 }
 0x2c2   :  { %v3202_v46 = vld [vmem:[#allocation3 + $0x10] ss:$2 sm:$0xff]  ;;  %v3228_v26 = vld [vmem:[#allocation3 + $0x11] ss:$2 sm:$0xff] }
 0x2c3   :  { %v3252_v33 = vmax.f32 %v3202_v46, %v3228_v26  ;;  %3180 = vst.msk [vmem:[#allocation3 + $0x28] sm:$0xff] %vm3174_vm8, %v3154_v31  ;;  %v3130_v32 = vadd.f32 %v10292_v15, %v3098_v22 }
 0x2c4   :  { %v3003_v48 = vpop.f32.mrb[64].mxu0 }
 0x2c5   :  { %3265 = vst.msk [vmem:[#allocation4 + $0x8] sm:$0xff] %vm3174_vm8, %v3252_v33  ;;  %v3155_v30 = vmax.f32 %v3130_v32, 0.0  ;;  %v3099_v61 = vadd.f32 %v3003_v48, %v10155_v28  ;;  %v7997_v8 = vpop.f32.mrb[65].mxu0 }
 0x2c7   :  { %3181 = vst.msk [vmem:[#allocation3 + $0x30] sm:$0xff] %vm3174_vm8, %v3155_v30  ;;  %v3131_v36 = vadd.f32 %v10292_v15, %v3099_v61 }
 0x2c8   :  { %v3008_v2 = vpop.f32.mrb[66].mxu0 }
 0x2c9   :  { %v3156_v19 = vmax.f32 %v3131_v36, 0.0  ;;  %v3100_v63 = vadd.f32 %v3008_v2, %v10169_v5  ;;  %v8000_v51 = vpop.f32.mrb[67].mxu0 }
 0x2ca   :  { %v3204_v10 = vld [vmem:[#allocation3 + $0x20] ss:$2 sm:$0xff]  ;;  %v3230_v55 = vld [vmem:[#allocation3 + $0x21] ss:$2 sm:$0xff] }
 0x2cb   :  { %v3253_v37 = vmax.f32 %v3204_v10, %v3230_v55  ;;  %3182 = vst.msk [vmem:[#allocation3 + $0x38] sm:$0xff] %vm3174_vm8, %v3156_v19  ;;  %v3132_v44 = vadd.f32 %v10292_v15, %v3100_v63 }
 0x2cc   :  { %v3013_v13 = vpop.f32.mrb[68].mxu0 }
 0x2cd   :  { %3266 = vst.msk [vmem:[#allocation4 + $0x10] sm:$0xff] %vm3174_vm8, %v3253_v37  ;;  %v3157_v28 = vmax.f32 %v3132_v44, 0.0  ;;  %v3101_v3 = vadd.f32 %v3013_v13, %v10183_v50  ;;  %v8003_v21 = vpop.f32.mrb[69].mxu0 }
 0x2cf   :  { %3183 = vst.msk [vmem:[#allocation3 + $0x40] sm:$0xff] %vm3174_vm8, %v3157_v28  ;;  %v3133_v60 = vadd.f32 %v10292_v15, %v3101_v3 }
 0x2d0   :  { %v3018_v5 = vpop.f32.mrb[70].mxu0 }
 0x2d1   :  { %v3158_v40 = vmax.f32 %v3133_v60, 0.0  ;;  %v3102_v16 = vadd.f32 %v3018_v5, %v10197_v39  ;;  %v8006_v59 = vpop.f32.mrb[71].mxu0  ;;  %v3280_v5 = vld [vmem:[#allocation5 + $0x8] sm:$0xff] }
 0x2d2   :  { %v3206_v49 = vld [vmem:[#allocation3 + $0x30] ss:$2 sm:$0xff]  ;;  %v3232_v0 = vld [vmem:[#allocation3 + $0x31] ss:$2 sm:$0xff] }
 0x2d3   :  { %v3254_v4 = vmax.f32 %v3206_v49, %v3232_v0  ;;  %3184 = vst.msk [vmem:[#allocation3 + $0x48] sm:$0xff] %vm3174_vm8, %v3158_v40  ;;  %v3134_v38 = vadd.f32 %v10292_v15, %v3102_v16 }
 0x2d4   :  { %v3023_v47 = vpop.f32.mrb[72].mxu0 }
 0x2d5   :  { %3267 = vst.msk [vmem:[#allocation4 + $0x18] sm:$0xff] %vm3174_vm8, %v3254_v4  ;;  %v3159_v50 = vmax.f32 %v3134_v38, 0.0  ;;  %v3103_v1 = vadd.f32 %v3023_v47, %v10211_v58  ;;  %v8009_v56 = vpop.f32.mrb[73].mxu0 }
 0x2d7   :  { %3185 = vst.msk [vmem:[#allocation3 + $0x50] sm:$0xff] %vm3174_vm8, %v3159_v50  ;;  %v3135_v12 = vadd.f32 %v10292_v15, %v3103_v1  ;;  %v3281_v50 = vld [vmem:[#allocation5 + $0x10] sm:$0xff]  ;;  %v3282_v1 = vld [vmem:[#allocation5 + $0x18] sm:$0xff] }
 0x2d8   :  { %v3028_v39 = vpop.f32.mrb[74].mxu0 }
 0x2d9   :  { %v3160_v35 = vmax.f32 %v3135_v12, 0.0  ;;  %v3104_v25 = vadd.f32 %v3028_v39, %v10226_v17  ;;  %v8012_v14 = vpop.f32.mrb[75].mxu0 }
 0x2da   :  { %v3208_v62 = vld [vmem:[#allocation3 + $0x40] ss:$2 sm:$0xff]  ;;  %v3234_v29 = vld [vmem:[#allocation3 + $0x41] ss:$2 sm:$0xff]  ;;  %v3439_v14 = vld [vmem:[#allocation5 + $0x40] sm:$0xff] }
 0x2db   :  { %v3255_v24 = vmax.f32 %v3208_v62, %v3234_v29  ;;  %3186 = vst.msk [vmem:[#allocation3 + $0x58] sm:$0xff] %vm3174_vm8, %v3160_v35  ;;  %v3136_v45 = vadd.f32 %v10292_v15, %v3104_v25  ;;  %v3440_v29 = vld [vmem:[#allocation5 + $0x48] sm:$0xff] }
 0x2dc   :  { %v3033_v23 = vpop.f32.mrb[76].mxu0 }
 0x2dd   :  { %3268 = vst.msk [vmem:[#allocation4 + $0x20] sm:$0xff] %vm3174_vm8, %v3255_v24  ;;  %v3161_v58 = vmax.f32 %v3136_v45, 0.0  ;;  %v3105_v31 = vadd.f32 %v3033_v23, %v10240_v43  ;;  %v8015_v22 = vpop.f32.mrb[77].mxu0  ;;  %v4492_v24 = vld [vmem:[#allocation5 + $0x1e0] sm:$0xff]  ;;  %v4493_v45 = vld [vmem:[#allocation5 + $0x1e8] sm:$0xff] }
 0x2de   :  { %v3441_v22 = vld [vmem:[#allocation5 + $0x50] sm:$0xff] }
 0x2df   :  { %3187 = vst.msk [vmem:[#allocation3 + $0x60] sm:$0xff] %vm3174_vm8, %v3161_v58  ;;  %v3137_v54 = vadd.f32 %v10292_v15, %v3105_v31 }
 0x2e0   :  { %v3038_v17 = vpop.f32.mrb[78].mxu0 }
 0x2e1   :  { %v3162_v46 = vmax.f32 %v3137_v54, 0.0  ;;  %v3106_v26 = vadd.f32 %v3038_v17, %v10254_v7  ;;  %v8018_v33 = vpop.f32.mrb[79].mxu0 }
 0x2e2   :  { %v3210_v32 = vld [vmem:[#allocation3 + $0x50] ss:$2 sm:$0xff]  ;;  %v3236_v48 = vld [vmem:[#allocation3 + $0x51] ss:$2 sm:$0xff]  ;;  %v3442_v33 = vld [vmem:[#allocation5 + $0x58] sm:$0xff] }
 0x2e3   :  { %v3256_v30 = vmax.f32 %v3210_v32, %v3236_v48  ;;  %3188 = vst.msk [vmem:[#allocation3 + $0x68] sm:$0xff] %vm3174_vm8, %v3162_v46  ;;  %v3138_v61 = vadd.f32 %v10292_v15, %v3106_v26  ;;  %v8621_v46 = vpack.c.bf16 %v3440_v29, %v3439_v14  ;;  %v8699_v26 = vpack.c.bf16 %v4493_v45, %v4492_v24 }
 0x2e4   :  { %v3043_v8 = vpop.f32.mrb[80].mxu0 }
 0x2e5   :  { %3269 = vst.msk [vmem:[#allocation4 + $0x28] sm:$0xff] %vm3174_vm8, %v3256_v30  ;;  %v3163_v43 = vmax.f32 %v3138_v61, 0.0  ;;  %v3107_v36 = vadd.f32 %v3043_v8, %v10266_v6  ;;  %v8021_v2 = vpop.f32.mrb[81].mxu0  ;;  %v4494_v61 = vld [vmem:[#allocation5 + $0x1f0] sm:$0xff]  ;;  %v4495_v8 = vld [vmem:[#allocation5 + $0x1f8] sm:$0xff] }
 0x2e7   :  { %3189 = vst.msk [vmem:[#allocation3 + $0x70] sm:$0xff] %vm3174_vm8, %v3163_v43  ;;  %v3139_v19 = vadd.f32 %v10292_v15, %v3107_v36 }
 0x2e8   :  { %v3048_v7 = vpop.f32.mrb[82].mxu0 }
 0x2e9   :  { %v3164_v63 = vmax.f32 %v3139_v19, 0.0  ;;  %v3108_v51 = vadd.f32 %v3048_v7, %v10268_v52  ;;  %v8024_v10 = vpop.f32.mrb[83].mxu0  ;;  %v3279_v52 = vld [vmem:[#allocation5] sm:$0xff]  ;;  %v8624_v7 = vpack.c.bf16 %v3442_v33, %v3441_v22 }
 0x2ea   :  { %v3212_v55 = vld [vmem:[#allocation3 + $0x60] ss:$2 sm:$0xff]  ;;  %v3238_v37 = vld [vmem:[#allocation3 + $0x61] ss:$2 sm:$0xff]  ;;  %v8615_v38 = vpack.c.bf16 %v3280_v5, %v3279_v52 }
 0x2eb   :  { %v3257_v44 = vmax.f32 %v3212_v55, %v3238_v37  ;;  %3190 = vst.msk [vmem:[#allocation3 + $0x78] sm:$0xff] %vm3174_vm8, %v3164_v63  ;;  %v3140_v13 = vadd.f32 %v10292_v15, %v3108_v51  ;;  %v8702_v63 = vpack.c.bf16 %v4495_v8, %v4494_v61  ;;  %v3520_v51 = vld [vmem:[#allocation5 + $0x60] sm:$0xff]  ;;  %v3521_v55 = vld [vmem:[#allocation5 + $0x68] sm:$0xff] }
 0x2ec   :  { %v3053_v28 = vpop.f32.mrb[84].mxu0  ;;  %v4655_v37 = vld [vmem:[#allocation5 + $0x228] sm:$0xff]  ;;  %v8627_v52 = vpack.c.bf16 %v3521_v55, %v3520_v51  ;;  %v4978_v61 = vld [vmem:[#allocation5 + $0x2a0] sm:$0xff]  ;;  %v4980_v51 = vld [vmem:[#allocation5 + $0x2b0] sm:$0xff] }
 0x2ed   :  { %3270 = vst.msk [vmem:[#allocation4 + $0x30] sm:$0xff] %vm3174_vm8, %v3257_v44  ;;  %v3165_v6 = vmax.f32 %v3140_v13, 0.0  ;;  %v3109_v3 = vadd.f32 %v3053_v28, %v10271_v57  ;;  %v8027_v21 = vpop.f32.mrb[85].mxu0  ;;  %v4979_v8 = vld [vmem:[#allocation5 + $0x2a8] sm:$0xff] }
 0x2ef   :  { %3191 = vst.msk [vmem:[#allocation3 + $0x80] sm:$0xff] %vm3174_vm8, %v3165_v6  ;;  %v3141_v60 = vadd.f32 %v10292_v15, %v3109_v3  ;;  %v3522_v3 = vld [vmem:[#allocation5 + $0x70] sm:$0xff] }
 0x2f0   :  { %v3058_v40 = vpop.f32.mrb[86].mxu0 }
 0x2f1   :  { %v3166_v16 = vmax.f32 %v3141_v60, 0.0  ;;  %v3110_v59 = vadd.f32 %v3058_v40, %v10273_v18  ;;  %v8030_v49 = vpop.f32.mrb[87].mxu0  ;;  %v8618_v18 = vpack.c.bf16 %v3282_v1, %v3281_v50  ;;  %v3523_v40 = vld [vmem:[#allocation5 + $0x78] sm:$0xff] }
 0x2f2   :  { %v3214_v0 = vld [vmem:[#allocation3 + $0x70] ss:$2 sm:$0xff]  ;;  %v3240_v4 = vld [vmem:[#allocation3 + $0x71] ss:$2 sm:$0xff]  ;;  %v8630_v1 = vpack.c.bf16 %v3523_v40, %v3522_v3 }
 0x2f3   :  { %v3258_v47 = vmax.f32 %v3214_v0, %v3240_v4  ;;  %3192 = vst.msk [vmem:[#allocation3 + $0x88] sm:$0xff] %vm3174_vm8, %v3166_v16  ;;  %v3142_v57 = vadd.f32 %v10292_v15, %v3110_v59  ;;  %v4657_v0 = vld [vmem:[#allocation5 + $0x238] sm:$0xff] }
 0x2f4   :  { %v3063_v56 = vpop.f32.mrb[88].mxu0  ;;  %v3284_v12 = vld [vmem:[#allocation4 + $0x1] ss:$50 sm:$0x3] }
 0x2f5   :  { %3271 = vst.msk [vmem:[#allocation4 + $0x38] sm:$0xff] %vm3174_vm8, %v3258_v47  ;;  %v3167_v39 = vmax.f32 %v3142_v57, 0.0  ;;  %v3111_v35 = vadd.f32 %v3063_v56, %v10275_v20  ;;  %v8033_v25 = vpop.f32.mrb[89].mxu0  ;;  %8058 = vmatmul.mubr.msk.f32.vlgmr.msra.gmra.mrb[50].mxu1 %vm3174_vm8, %v3284_v12  ;;  %v3278_v30 = vld [vmem:[#allocation4] ss:$50 sm:$0x3] }
 0x2f6   :  { %8616 = vmatpush3.bf16.msra.mxu1 %v8615_v38  ;;  %8068 = vmatprep.mubr.msk.f32.mxu1 %vm8972_vm2, %v8973_v41  ;;  %v3437_v49 = vld [vmem:[#allocation4 + $0x2] ss:$50 sm:$0x3]  ;;  %v3601_v12 = vld [vmem:[#allocation5 + $0x80] sm:$0xff] }
 0x2f7   :  { %3193 = vst.msk [vmem:[#allocation3 + $0x90] sm:$0xff] %vm3174_vm8, %v3167_v39  ;;  %v3143_v62 = vadd.f32 %v10292_v15, %v3111_v35  ;;  %8617 = vmatprep.subr.bf16.mxu1 %v8971_v34  ;;  %v3602_v35 = vld [vmem:[#allocation5 + $0x88] sm:$0xff] }
 0x2f8   :  { %v3068_v23 = vpop.f32.mrb[90].mxu0  ;;  %v4817_v25 = vld [vmem:[#allocation5 + $0x268] sm:$0xff] }
 0x2f9   :  { %v3168_v20 = vmax.f32 %v3143_v62, 0.0  ;;  %v3112_v58 = vadd.f32 %v3068_v23, %v10278_v9  ;;  %v8036_v31 = vpop.f32.mrb[91].mxu0  ;;  %v8633_v23 = vpack.c.bf16 %v3602_v35, %v3601_v12  ;;  %v3599_v55 = vld [vmem:[#allocation4 + $0x4] ss:$50 sm:$0x3]  ;;  %v3846_v35 = vld [vmem:[#allocation5 + $0xf0] sm:$0xff] }
 0x2fa   :  { %v3216_v54 = vld [vmem:[#allocation3 + $0x80] ss:$2 sm:$0xff]  ;;  %v3242_v17 = vld [vmem:[#allocation3 + $0x81] ss:$2 sm:$0xff]  ;;  %8619 = vmatpush3.bf16.msra.mxu1 %v8618_v18 }
 0x2fb   :  { %v3259_v32 = vmax.f32 %v3216_v54, %v3242_v17  ;;  %3194 = vst.msk [vmem:[#allocation3 + $0x98] sm:$0xff] %vm3174_vm8, %v3168_v20  ;;  %v3144_v48 = vadd.f32 %v10292_v15, %v3112_v58  ;;  %8620 = vmatprep.subr.bf16.mxu1 %v8971_v34  ;;  %v3603_v58 = vld [vmem:[#allocation5 + $0x90] sm:$0xff]  ;;  %v3604_v54 = vld [vmem:[#allocation5 + $0x98] sm:$0xff] }
 0x2fc   :  { %v3073_v43 = vpop.f32.mrb[92].mxu0  ;;  %v4328_v9 = vld [vmem:[#allocation4 + $0xd] ss:$50 sm:$0x3] }
 0x2fd   :  { %3272 = vst.msk [vmem:[#allocation4 + $0x40] sm:$0xff] %vm3174_vm8, %v3259_v32  ;;  %v3169_v36 = vmax.f32 %v3144_v48, 0.0  ;;  %v3113_v2 = vadd.f32 %v3073_v43, %v10281_v42  ;;  %8069 = vmatmul.mubr.msk.f32.vlgmr.msra.gmra.mrb[52].mxu1 %vm3174_vm8, %v3278_v30  ;;  %v8039_v19 = vpop.f32.mrb[93].mxu0  ;;  %8201 = vmatmul.mubr.msk.f32.vlgmr.msra.gmra.mrb[100].mxu0 %vm3174_vm8, %v4328_v9  ;;  %v4654_v42 = vld [vmem:[#allocation5 + $0x220] sm:$0xff]  ;;  %v4818_v17 = vld [vmem:[#allocation5 + $0x270] sm:$0xff]  ;;  %v8636_v32 = vpack.c.bf16 %v3604_v54, %v3603_v58  ;;  %v3683_v30 = vld [vmem:[#allocation5 + $0xa8] sm:$0xff] }
 0x2fe   :  { %8622 = vmatpush3.bf16.msra.mxu1 %v8621_v46  ;;  %8700 = vmatpush3.bf16.msra.mxu0 %v8699_v26  ;;  %v8711_v5 = vpack.c.bf16 %v4655_v37, %v4654_v42  ;;  %v3518_v46 = vld [vmem:[#allocation4 + $0x3] ss:$50 sm:$0x3]  ;;  %v3682_v48 = vld [vmem:[#allocation5 + $0xa0] sm:$0xff]  ;;  %v3684_v19 = vld [vmem:[#allocation5 + $0xb0] sm:$0xff] }
 0x2ff   :  { %3195 = vst.msk [vmem:[#allocation3 + $0xa0] sm:$0xff] %vm3174_vm8, %v3169_v36  ;;  %v3145_v10 = vadd.f32 %v10292_v15, %v3113_v2  ;;  %8623 = vmatprep.subr.bf16.mxu1 %v8971_v34  ;;  %8701 = vmatprep.subr.bf16.mxu0 %v8971_v34  ;;  %v8639_v36 = vpack.c.bf16 %v3683_v30, %v3682_v48  ;;  %v3763_v37 = vld [vmem:[#allocation5 + $0xc0] sm:$0xff]  ;;  %v5465_v58 = vld [vmem:[#allocation5 + $0x368] sm:$0xff]  ;;  %v3927_v54 = vld [vmem:[#allocation5 + $0x110] sm:$0xff] }
 0x300   :  { %v3078_v44 = vpop.f32.mrb[94].mxu0  ;;  %8079 = vmatprep.mubr.msk.f32.mxu1 %vm8972_vm2, %v8973_v41  ;;  %8222 = vmatprep.mubr.msk.f32.mxu0 %vm8972_vm2, %v8973_v41  ;;  %v8735_v2 = vpack.c.bf16 %v4979_v8, %v4978_v61  ;;  %v4006_v48 = vld [vmem:[#allocation5 + $0x120] sm:$0xff]  ;;  %v4007_v30 = vld [vmem:[#allocation5 + $0x128] sm:$0xff] }
 0x301   :  { %v3170_v13 = vmax.f32 %v3145_v10, 0.0  ;;  %v3114_v28 = vadd.f32 %v3078_v44, %v10283_v53  ;;  %v8042_v6 = vpop.f32.mrb[95].mxu0  ;;  %v4656_v53 = vld [vmem:[#allocation5 + $0x230] sm:$0xff]  ;;  %v4981_v10 = vld [vmem:[#allocation5 + $0x2b8] sm:$0xff]  ;;  %v5626_v61 = vld [vmem:[#allocation5 + $0x3a0] sm:$0xff] }
 0x302   :  { %v3218_v21 = vld [vmem:[#allocation3 + $0x90] ss:$2 sm:$0xff]  ;;  %v3244_v60 = vld [vmem:[#allocation3 + $0x91] ss:$2 sm:$0xff]  ;;  %8625 = vmatpush3.bf16.msra.mxu1 %v8624_v7  ;;  %8703 = vmatpush3.bf16.msra.mxu0 %v8702_v63  ;;  %v8714_v56 = vpack.c.bf16 %v4657_v0, %v4656_v53  ;;  %v3685_v63 = vld [vmem:[#allocation5 + $0xb8] sm:$0xff]  ;;  %v8738_v6 = vpack.c.bf16 %v4981_v10, %v4980_v51 }
 0x303   :  { %v3260_v16 = vmax.f32 %v3218_v21, %v3244_v60  ;;  %3196 = vst.msk [vmem:[#allocation3 + $0xa8] sm:$0xff] %vm3174_vm8, %v3170_v13  ;;  %v3146_v59 = vadd.f32 %v10292_v15, %v3114_v28  ;;  %8626 = vmatprep.subr.bf16.mxu1 %v8971_v34  ;;  %8710 = vmatprep.subr.bf16.mxu0 %v8971_v34  ;;  %v3764_v21 = vld [vmem:[#allocation5 + $0xc8] sm:$0xff]  ;;  %v5140_v60 = vld [vmem:[#allocation5 + $0x2e0] sm:$0xff]  ;;  %v5143_v53 = vld [vmem:[#allocation5 + $0x2f8] sm:$0xff] }
 0x304   :  { %v3083_v4 = vpop.f32.mrb[96].mxu0  ;;  %v4490_v38 = vld [vmem:[#allocation4 + $0xf] ss:$50 sm:$0x3]  ;;  %v8642_v28 = vpack.c.bf16 %v3685_v63, %v3684_v19  ;;  %v5627_v8 = vld [vmem:[#allocation5 + $0x3a8] sm:$0xff]  ;;  %v5628_v19 = vld [vmem:[#allocation5 + $0x3b0] sm:$0xff] }
 0x305   :  { %3273 = vst.msk [vmem:[#allocation4 + $0x48] sm:$0xff] %vm3174_vm8, %v3260_v16  ;;  %v3171_v47 = vmax.f32 %v3146_v59, 0.0  ;;  %v3115_v57 = vadd.f32 %v3083_v4, %v10285_v11  ;;  %8080 = vmatmul.mubr.msk.f32.vlgmr.msra.gmra.mrb[54].mxu1 %vm3174_vm8, %v3437_v49  ;;  %v8045_v50 = vpop.f32.mrb[97].mxu0  ;;  %8223 = vmatmul.mubr.msk.f32.vlgmr.msra.gmra.mrb[102].mxu0 %vm3174_vm8, %v4490_v38  ;;  %v4816_v11 = vld [vmem:[#allocation5 + $0x260] sm:$0xff]  ;;  %v3765_v16 = vld [vmem:[#allocation5 + $0xd0] sm:$0xff]  ;;  %v3766_v59 = vld [vmem:[#allocation5 + $0xd8] sm:$0xff] }
 0x306   :  { %8628 = vmatpush3.bf16.msra.mxu1 %v8627_v52  ;;  %8712 = vmatpush3.bf16.msra.mxu0 %v8711_v5  ;;  %v8723_v20 = vpack.c.bf16 %v4817_v25, %v4816_v11  ;;  %v4652_v26 = vld [vmem:[#allocation4 + $0x11] ss:$50 sm:$0x3]  ;;  %v4814_v42 = vld [vmem:[#allocation4 + $0x13] ss:$50 sm:$0x3]  ;;  %v8645_v5 = vpack.c.bf16 %v3764_v21, %v3763_v37  ;;  %v8648_v38 = vpack.c.bf16 %v3766_v59, %v3765_v16 }
 0x307   :  { %3197 = vst.msk [vmem:[#allocation3 + $0xb0] sm:$0xff] %vm3174_vm8, %v3171_v47  ;;  %v3147_v39 = vadd.f32 %v10292_v15, %v3115_v57  ;;  %8629 = vmatprep.subr.bf16.mxu1 %v8971_v34  ;;  %8713 = vmatprep.subr.bf16.mxu0 %v8971_v34  ;;  %v5141_v52 = vld [vmem:[#allocation5 + $0x2e8] sm:$0xff]  ;;  %v5142_v49 = vld [vmem:[#allocation5 + $0x2f0] sm:$0xff]  ;;  %v3844_v57 = vld [vmem:[#allocation5 + $0xe0] sm:$0xff] }
 0x308   :  { %v3088_v18 = vpop.f32.mrb[98].mxu0  ;;  %8090 = vmatprep.mubr.msk.f32.mxu1 %vm8972_vm2, %v8973_v41  ;;  %8244 = vmatprep.mubr.msk.f32.mxu0 %vm8972_vm2, %v8973_v41  ;;  %v8747_v40 = vpack.c.bf16 %v5141_v52, %v5140_v60  ;;  %v3680_v0 = vld [vmem:[#allocation4 + $0x5] ss:$50 sm:$0x3]  ;;  %v8750_v47 = vpack.c.bf16 %v5143_v53, %v5142_v49  ;;  %v5304_v25 = vld [vmem:[#allocation5 + $0x330] sm:$0xff]  ;;  %v4168_v49 = vld [vmem:[#allocation5 + $0x160] sm:$0xff] }
 0x309   :  { %v3172_v14 = vmax.f32 %v3147_v39, 0.0  ;;  %v3116_v62 = vadd.f32 %v3088_v18, %v10287_v27  ;;  %v8048_v29 = vpop.f32.mrb[99].mxu0  ;;  %v4819_v27 = vld [vmem:[#allocation5 + $0x278] sm:$0xff]  ;;  %v3845_v50 = vld [vmem:[#allocation5 + $0xe8] sm:$0xff]  ;;  %v5790_v60 = vld [vmem:[#allocation5 + $0x3f0] sm:$0xff] }
 0x30a   :  { %v3220_v24 = vld [vmem:[#allocation3 + $0xa0] ss:$2 sm:$0xff]  ;;  %v3246_v45 = vld [vmem:[#allocation3 + $0xa1] ss:$2 sm:$0xff]  ;;  %8631 = vmatpush3.bf16.msra.mxu1 %v8630_v1  ;;  %8715 = vmatpush3.bf16.msra.mxu0 %v8714_v56  ;;  %v5302_v1 = vld [vmem:[#allocation5 + $0x320] sm:$0xff]  ;;  %v8651_v12 = vpack.c.bf16 %v3845_v50, %v3844_v57 }
 0x30b   :  { %v3261_v31 = vmax.f32 %v3220_v24, %v3246_v45  ;;  %3198 = vst.msk [vmem:[#allocation3 + $0xb8] sm:$0xff] %vm3174_vm8, %v3172_v14  ;;  %v3148_v22 = vadd.f32 %v10292_v15, %v3116_v62  ;;  %8632 = vmatprep.subr.bf16.mxu1 %v8971_v34  ;;  %8722 = vmatprep.subr.bf16.mxu0 %v8971_v34  ;;  %v4976_v4 = vld [vmem:[#allocation4 + $0x15] ss:$50 sm:$0x3]  ;;  %v3925_v45 = vld [vmem:[#allocation5 + $0x100] sm:$0xff]  ;;  %v4170_v57 = vld [vmem:[#allocation5 + $0x170] sm:$0xff] }
 0x30c   :  { %v8726_v15 = vpack.c.bf16 %v4819_v27, %v4818_v17  ;;  %v5303_v56 = vld [vmem:[#allocation5 + $0x328] sm:$0xff]  ;;  %v3847_v11 = vld [vmem:[#allocation5 + $0xf8] sm:$0xff]  ;;  %v5466_v27 = vld [vmem:[#allocation5 + $0x370] sm:$0xff] }
 0x30d   :  { %3274 = vst.msk [vmem:[#allocation4 + $0x50] sm:$0xff] %vm3174_vm8, %v3261_v31  ;;  %v3173_v33 = vmax.f32 %v3148_v22, 0.0  ;;  %8091 = vmatmul.mubr.msk.f32.vlgmr.msra.gmra.mrb[56].mxu1 %vm3174_vm8, %v3518_v46  ;;  %8245 = vmatmul.mubr.msk.f32.vlgmr.msra.gmra.mrb[104].mxu0 %vm3174_vm8, %v4652_v26  ;;  %v8759_v39 = vpack.c.bf16 %v5303_v56, %v5302_v1  ;;  %v5305_v18 = vld [vmem:[#allocation5 + $0x338] sm:$0xff]  ;;  %v5138_v62 = vld [vmem:[#allocation4 + $0x17] ss:$50 sm:$0x3]  ;;  %v8654_v29 = vpack.c.bf16 %v3847_v11, %v3846_v35 }
 0x30e   :  { %8634 = vmatpush3.bf16.msra.mxu1 %v8633_v23  ;;  %8724 = vmatpush3.bf16.msra.mxu0 %v8723_v20  ;;  %v3761_v14 = vld [vmem:[#allocation4 + $0x6] ss:$50 sm:$0x3]  ;;  %v8762_v24 = vpack.c.bf16 %v5305_v18, %v5304_v25  ;;  %v3926_v23 = vld [vmem:[#allocation5 + $0x108] sm:$0xff]  ;;  %v5464_v20 = vld [vmem:[#allocation5 + $0x360] sm:$0xff] }
 0x30f   :  { %3199 = vst.msk [vmem:[#allocation3 + $0xc0] sm:$0xff] %vm3174_vm8, %v3173_v33  ;;  %8635 = vmatprep.subr.bf16.mxu1 %v8971_v34  ;;  %8725 = vmatprep.subr.bf16.mxu0 %v8971_v34  ;;  %v8657_v31 = vpack.c.bf16 %v3926_v23, %v3925_v45  ;;  %v8771_v22 = vpack.c.bf16 %v5465_v58, %v5464_v20  ;;  %v3928_v17 = vld [vmem:[#allocation5 + $0x118] sm:$0xff]  ;;  %v5300_v33 = vld [vmem:[#allocation4 + $0x19] ss:$50 sm:$0x3]  ;;  %v4088_v37 = vld [vmem:[#allocation5 + $0x148] sm:$0xff] }
 0x310   :  { %8101 = vmatprep.mubr.msk.f32.mxu1 %vm8972_vm2, %v8973_v41  ;;  %8266 = vmatprep.mubr.msk.f32.mxu0 %vm8972_vm2, %v8973_v41  ;;  %v5467_v46 = vld [vmem:[#allocation5 + $0x378] sm:$0xff]  ;;  %v3923_v63 = vld [vmem:[#allocation4 + $0x8] ss:$50 sm:$0x3]  ;;  %v4169_v53 = vld [vmem:[#allocation5 + $0x168] sm:$0xff] }
 0x311   :  { %v3842_v26 = vld [vmem:[#allocation4 + $0x7] ss:$50 sm:$0x3]  ;;  %v5462_v51 = vld [vmem:[#allocation4 + $0x1b] ss:$50 sm:$0x3] }
 0x312   :  { %v3222_v43 = vld [vmem:[#allocation3 + $0xb0] ss:$2 sm:$0xff]  ;;  %v3248_v9 = vld [vmem:[#allocation3 + $0xb1] ss:$2 sm:$0xff]  ;;  %8637 = vmatpush3.bf16.msra.mxu1 %v8636_v32  ;;  %8727 = vmatpush3.bf16.msra.mxu0 %v8726_v15  ;;  %v8660_v32 = vpack.c.bf16 %v3928_v17, %v3927_v54  ;;  %v8774_v15 = vpack.c.bf16 %v5467_v46, %v5466_v27  ;;  %v4090_v21 = vld [vmem:[#allocation5 + $0x158] sm:$0xff] }
 0x313   :  { %v3262_v7 = vmax.f32 %v3222_v43, %v3248_v9  ;;  %8638 = vmatprep.subr.bf16.mxu1 %v8971_v34  ;;  %8734 = vmatprep.subr.bf16.mxu0 %v8971_v34  ;;  %v8663_v43 = vpack.c.bf16 %v4007_v30, %v4006_v48  ;;  %v8783_v9 = vpack.c.bf16 %v5627_v8, %v5626_v61  ;;  %v5791_v52 = vld [vmem:[#allocation5 + $0x3f8] sm:$0xff]  ;;  %v5952_v1 = vld [vmem:[#allocation5 + $0x430] sm:$0xff]  ;;  %v4249_v25 = vld [vmem:[#allocation5 + $0x180] sm:$0xff] }
 0x314   :  { %v8798_v59 = vpack.c.bf16 %v5791_v52, %v5790_v60  ;;  %v4171_v50 = vld [vmem:[#allocation5 + $0x178] sm:$0xff]  ;;  %v4250_v18 = vld [vmem:[#allocation5 + $0x188] sm:$0xff]  ;;  %v4251_v45 = vld [vmem:[#allocation5 + $0x190] sm:$0xff] }
 0x315   :  { %3275 = vst.msk [vmem:[#allocation4 + $0x58] sm:$0xff] %vm3174_vm8, %v3262_v7  ;;  %8102 = vmatmul.mubr.msk.f32.vlgmr.msra.gmra.mrb[58].mxu1 %vm3174_vm8, %v3599_v55  ;;  %8267 = vmatmul.mubr.msk.f32.vlgmr.msra.gmra.mrb[106].mxu0 %vm3174_vm8, %v4814_v42  ;;  %v5629_v7 = vld [vmem:[#allocation5 + $0x3b8] sm:$0xff]  ;;  %v4087_v42 = vld [vmem:[#allocation5 + $0x140] sm:$0xff]  ;;  %v8678_v35 = vpack.c.bf16 %v4171_v50, %v4170_v57  ;;  %v6114_v20 = vld [vmem:[#allocation5 + $0x470] sm:$0xff] }
 0x316   :  { %v3224_v44 = vld [vmem:[#allocation3 + $0xc0] ss:$2 sm:$0xf]  ;;  %v3250_v13 = vld [vmem:[#allocation3 + $0xc1] ss:$2 sm:$0xf]  ;;  %8640 = vmatpush3.bf16.msra.mxu1 %v8639_v36  ;;  %8736 = vmatpush3.bf16.msra.mxu0 %v8735_v2  ;;  %v8786_v55 = vpack.c.bf16 %v5629_v7, %v5628_v19 }
 0x317   :  { %v3263_v3 = vmax.f32 %v3224_v44, %v3250_v13  ;;  %8641 = vmatprep.subr.bf16.mxu1 %v8971_v34  ;;  %8737 = vmatprep.subr.bf16.mxu0 %v8971_v34  ;;  %v4008_v36 = vld [vmem:[#allocation5 + $0x130] sm:$0xff]  ;;  %v4009_v2 = vld [vmem:[#allocation5 + $0x138] sm:$0xff]  ;;  %v5788_v44 = vld [vmem:[#allocation5 + $0x3e0] sm:$0xff] }
 0x318   :  { %8112 = vmatprep.mubr.msk.f32.mxu1 %vm8972_vm2, %v8973_v41  ;;  %8288 = vmatprep.mubr.msk.f32.mxu0 %vm8972_vm2, %v8973_v41  ;;  %v8666_v10 = vpack.c.bf16 %v4009_v2, %v4008_v36  ;;  %v5789_v13 = vld [vmem:[#allocation5 + $0x3e8] sm:$0xff]  ;;  %v5953_v56 = vld [vmem:[#allocation5 + $0x438] sm:$0xff]  ;;  %v4411_v27 = vld [vmem:[#allocation5 + $0x1c0] sm:$0xff] }
 0x319   :  { %3277 = vst.msk [vmem:[#allocation4 + $0x60] sm:$0xf] %vm3276_vm9, %v3263_v3  ;;  %v4089_v3 = vld [vmem:[#allocation5 + $0x150] sm:$0xff]  ;;  %v8810_v11 = vpack.c.bf16 %v5953_v56, %v5952_v1  ;;  %v4252_v23 = vld [vmem:[#allocation5 + $0x198] sm:$0xff]  ;;  %v4412_v46 = vld [vmem:[#allocation5 + $0x1c8] sm:$0xff] }
 0x31a   :  { %8643 = vmatpush3.bf16.msra.mxu1 %v8642_v28  ;;  %8739 = vmatpush3.bf16.msra.mxu0 %v8738_v6  ;;  %v8669_v28 = vpack.c.bf16 %v4088_v37, %v4087_v42  ;;  %v8795_v6 = vpack.c.bf16 %v5789_v13, %v5788_v44  ;;  %v8672_v16 = vpack.c.bf16 %v4090_v21, %v4089_v3  ;;  %v6115_v58 = vld [vmem:[#allocation5 + $0x478] sm:$0xff]  ;;  %v4413_v48 = vld [vmem:[#allocation5 + $0x1d0] sm:$0xff]  ;;  %v4573_v19 = vld [vmem:[#allocation5 + $0x200] sm:$0xff] }
 0x31b   :  { %8644 = vmatprep.subr.bf16.mxu1 %v8971_v34  ;;  %8746 = vmatprep.subr.bf16.mxu0 %v8971_v34  ;;  %v8684_v54 = vpack.c.bf16 %v4252_v23, %v4251_v45  ;;  %v8822_v17 = vpack.c.bf16 %v6115_v58, %v6114_v20  ;;  %v4414_v30 = vld [vmem:[#allocation5 + $0x1d8] sm:$0xff]  ;;  %v6276_v61 = vld [vmem:[#allocation5 + $0x4b0] sm:$0xff]  ;;  %v4574_v7 = vld [vmem:[#allocation5 + $0x208] sm:$0xff] }
 0x31c   :  { %v6277_v8 = vld [vmem:[#allocation5 + $0x4b8] sm:$0xff]  ;;  %v8696_v36 = vpack.c.bf16 %v4414_v30, %v4413_v48  ;;  %v4575_v42 = vld [vmem:[#allocation5 + $0x210] sm:$0xff]  ;;  %v4735_v60 = vld [vmem:[#allocation5 + $0x240] sm:$0xff] }
 0x31d   :  { %8113 = vmatmul.mubr.msk.f32.vlgmr.msra.gmra.mrb[60].mxu1 %vm3174_vm8, %v3680_v0  ;;  %8289 = vmatmul.mubr.msk.f32.vlgmr.msra.gmra.mrb[108].mxu0 %vm3174_vm8, %v4976_v4  ;;  %v5950_v0 = vld [vmem:[#allocation5 + $0x420] sm:$0xff]  ;;  %v5951_v4 = vld [vmem:[#allocation5 + $0x428] sm:$0xff]  ;;  %v8834_v2 = vpack.c.bf16 %v6277_v8, %v6276_v61  ;;  %v4576_v37 = vld [vmem:[#allocation5 + $0x218] sm:$0xff] }
 0x31e   :  { %8646 = vmatpush3.bf16.msra.mxu1 %v8645_v5  ;;  %8748 = vmatpush3.bf16.msra.mxu0 %v8747_v40  ;;  %v4004_v5 = vld [vmem:[#allocation4 + $0x9] ss:$50 sm:$0x3]  ;;  %v5624_v40 = vld [vmem:[#allocation4 + $0x1d] ss:$50 sm:$0x3]  ;;  %v8708_v3 = vpack.c.bf16 %v4576_v37, %v4575_v42 }
 0x31f   :  { %8647 = vmatprep.subr.bf16.mxu1 %v8971_v34  ;;  %8749 = vmatprep.subr.bf16.mxu0 %v8971_v34  ;;  %v6438_v44 = vld [vmem:[#allocation5 + $0x4f0] sm:$0xff]  ;;  %v6439_v13 = vld [vmem:[#allocation5 + $0x4f8] sm:$0xff]  ;;  %v4736_v52 = vld [vmem:[#allocation5 + $0x248] sm:$0xff] }
 0x320   :  { %8123 = vmatprep.mubr.msk.f32.mxu1 %vm8972_vm2, %v8973_v41  ;;  %8310 = vmatprep.mubr.msk.f32.mxu0 %vm8972_vm2, %v8973_v41  ;;  %v8846_v21 = vpack.c.bf16 %v6439_v13, %v6438_v44  ;;  %v4897_v1 = vld [vmem:[#allocation5 + $0x280] sm:$0xff]  ;;  %v4898_v56 = vld [vmem:[#allocation5 + $0x288] sm:$0xff] }
 0x321   :  { %v5059_v20 = vld [vmem:[#allocation5 + $0x2c0] sm:$0xff]  ;;  %v5060_v58 = vld [vmem:[#allocation5 + $0x2c8] sm:$0xff] }
 0x322   :  { %8649 = vmatpush3.bf16.msra.mxu1 %v8648_v38  ;;  %8751 = vmatpush3.bf16.msra.mxu0 %v8750_v47  ;;  %v8675_v38 = vpack.c.bf16 %v4169_v53, %v4168_v49  ;;  %v8807_v47 = vpack.c.bf16 %v5951_v4, %v5950_v0  ;;  %v4737_v49 = vld [vmem:[#allocation5 + $0x250] sm:$0xff]  ;;  %v4738_v53 = vld [vmem:[#allocation5 + $0x258] sm:$0xff]  ;;  %v5221_v61 = vld [vmem:[#allocation5 + $0x300] sm:$0xff] }
 0x323   :  { %8650 = vmatprep.subr.bf16.mxu1 %v8971_v34  ;;  %8758 = vmatprep.subr.bf16.mxu0 %v8971_v34  ;;  %v6600_v0 = vld [vmem:[#allocation5 + $0x530] sm:$0xff]  ;;  %v6601_v4 = vld [vmem:[#allocation5 + $0x538] sm:$0xff]  ;;  %v8720_v57 = vpack.c.bf16 %v4738_v53, %v4737_v49  ;;  %v5222_v8 = vld [vmem:[#allocation5 + $0x308] sm:$0xff] }
 0x324   :  { %v8858_v50 = vpack.c.bf16 %v6601_v4, %v6600_v0  ;;  %v5383_v44 = vld [vmem:[#allocation5 + $0x340] sm:$0xff]  ;;  %v5384_v13 = vld [vmem:[#allocation5 + $0x348] sm:$0xff] }
 0x325   :  { %8124 = vmatmul.mubr.msk.f32.vlgmr.msra.gmra.mrb[62].mxu1 %vm3174_vm8, %v3761_v14  ;;  %8311 = vmatmul.mubr.msk.f32.vlgmr.msra.gmra.mrb[110].mxu0 %vm3174_vm8, %v5138_v62  ;;  %v6112_v14 = vld [vmem:[#allocation5 + $0x460] sm:$0xff]  ;;  %v6113_v62 = vld [vmem:[#allocation5 + $0x468] sm:$0xff] }
 0x326   :  { %8652 = vmatpush3.bf16.msra.mxu1 %v8651_v12  ;;  %8760 = vmatpush3.bf16.msra.mxu0 %v8759_v39  ;;  %v4085_v12 = vld [vmem:[#allocation4 + $0xa] ss:$50 sm:$0x3]  ;;  %v5786_v39 = vld [vmem:[#allocation4 + $0x1f] ss:$50 sm:$0x3] }
 0x327   :  { %8653 = vmatprep.subr.bf16.mxu1 %v8971_v34  ;;  %8761 = vmatprep.subr.bf16.mxu0 %v8971_v34  ;;  %v5545_v0 = vld [vmem:[#allocation5 + $0x380] sm:$0xff]  ;;  %v5546_v4 = vld [vmem:[#allocation5 + $0x388] sm:$0xff] }
 0x328   :  { %8134 = vmatprep.mubr.msk.f32.mxu1 %vm8972_vm2, %v8973_v41  ;;  %8332 = vmatprep.mubr.msk.f32.mxu0 %vm8972_vm2, %v8973_v41 }
 0x32a   :  { %8655 = vmatpush3.bf16.msra.mxu1 %v8654_v29  ;;  %8763 = vmatpush3.bf16.msra.mxu0 %v8762_v24  ;;  %v8681_v29 = vpack.c.bf16 %v4250_v18, %v4249_v25  ;;  %v8819_v24 = vpack.c.bf16 %v6113_v62, %v6112_v14  ;;  %v4899_v25 = vld [vmem:[#allocation5 + $0x290] sm:$0xff]  ;;  %v4900_v18 = vld [vmem:[#allocation5 + $0x298] sm:$0xff] }
 0x32b   :  { %8656 = vmatprep.subr.bf16.mxu1 %v8971_v34  ;;  %8770 = vmatprep.subr.bf16.mxu0 %v8971_v34  ;;  %v6762_v14 = vld [vmem:[#allocation5 + $0x570] sm:$0xff]  ;;  %v6763_v62 = vld [vmem:[#allocation5 + $0x578] sm:$0xff]  ;;  %v8732_v45 = vpack.c.bf16 %v4900_v18, %v4899_v25 }
 0x32c   :  { %v8870_v23 = vpack.c.bf16 %v6763_v62, %v6762_v14  ;;  %v5710_v25 = vld [vmem:[#allocation5 + $0x3d8] sm:$0xff]  ;;  %v5543_v18 = vld [vmem:[#allocation4 + $0x1c] ss:$50 sm:$0x3] }
 0x32d   :  { %8135 = vmatmul.mubr.msk.f32.vlgmr.msra.gmra.mrb[64].mxu1 %vm3174_vm8, %v3842_v26  ;;  %8333 = vmatmul.mubr.msk.f32.vlgmr.msra.gmra.mrb[112].mxu0 %vm3174_vm8, %v5300_v33  ;;  %v6274_v26 = vld [vmem:[#allocation5 + $0x4a0] sm:$0xff]  ;;  %v6275_v33 = vld [vmem:[#allocation5 + $0x4a8] sm:$0xff] }
 0x32e   :  { %8658 = vmatpush3.bf16.msra.mxu1 %v8657_v31  ;;  %8772 = vmatpush3.bf16.msra.mxu0 %v8771_v22  ;;  %v4166_v31 = vld [vmem:[#allocation4 + $0xb] ss:$50 sm:$0x3]  ;;  %v5948_v22 = vld [vmem:[#allocation4 + $0x21] ss:$50 sm:$0x3] }
 0x32f   :  { %8659 = vmatprep.subr.bf16.mxu1 %v8971_v34  ;;  %8773 = vmatprep.subr.bf16.mxu0 %v8971_v34  ;;  %v5869_v62 = vld [vmem:[#allocation5 + $0x400] sm:$0xff] }
 0x330   :  { %8145 = vmatprep.mubr.msk.f32.mxu1 %vm8972_vm2, %v8973_v41  ;;  %8354 = vmatprep.mubr.msk.f32.mxu0 %vm8972_vm2, %v8973_v41 }
 0x332   :  { %8661 = vmatpush3.bf16.msra.mxu1 %v8660_v32  ;;  %8775 = vmatpush3.bf16.msra.mxu0 %v8774_v15  ;;  %v8693_v32 = vpack.c.bf16 %v4412_v46, %v4411_v27  ;;  %v8831_v15 = vpack.c.bf16 %v6275_v33, %v6274_v26  ;;  %v5061_v27 = vld [vmem:[#allocation5 + $0x2d0] sm:$0xff]  ;;  %v5062_v46 = vld [vmem:[#allocation5 + $0x2d8] sm:$0xff] }
 0x333   :  { %8662 = vmatprep.subr.bf16.mxu1 %v8971_v34  ;;  %8782 = vmatprep.subr.bf16.mxu0 %v8971_v34  ;;  %v6924_v26 = vld [vmem:[#allocation5 + $0x5b0] sm:$0xff]  ;;  %v6925_v33 = vld [vmem:[#allocation5 + $0x5b8] sm:$0xff]  ;;  %v8744_v48 = vpack.c.bf16 %v5062_v46, %v5061_v27 }
 0x334   :  { %v8882_v30 = vpack.c.bf16 %v6925_v33, %v6924_v26  ;;  %v6034_v27 = vld [vmem:[#allocation5 + $0x458] sm:$0xff]  ;;  %v6193_v33 = vld [vmem:[#allocation5 + $0x480] sm:$0xff] }
 0x335   :  { %8146 = vmatmul.mubr.msk.f32.vlgmr.msra.gmra.mrb[66].mxu1 %vm3174_vm8, %v3923_v63  ;;  %8355 = vmatmul.mubr.msk.f32.vlgmr.msra.gmra.mrb[114].mxu0 %vm3174_vm8, %v5462_v51  ;;  %v6436_v63 = vld [vmem:[#allocation5 + $0x4e0] sm:$0xff]  ;;  %v6437_v51 = vld [vmem:[#allocation5 + $0x4e8] sm:$0xff] }
 0x336   :  { %8664 = vmatpush3.bf16.msra.mxu1 %v8663_v43  ;;  %8784 = vmatpush3.bf16.msra.mxu0 %v8783_v9  ;;  %v4247_v43 = vld [vmem:[#allocation4 + $0xc] ss:$50 sm:$0x3]  ;;  %v6110_v9 = vld [vmem:[#allocation4 + $0x23] ss:$50 sm:$0x3] }
 0x337   :  { %8665 = vmatprep.subr.bf16.mxu1 %v8971_v34  ;;  %8785 = vmatprep.subr.bf16.mxu0 %v8971_v34  ;;  %v5867_v46 = vld [vmem:[#allocation4 + $0x20] ss:$50 sm:$0x3] }
 0x338   :  { %8156 = vmatprep.mubr.msk.f32.mxu1 %vm8972_vm2, %v8973_v41  ;;  %8376 = vmatprep.mubr.msk.f32.mxu0 %vm8972_vm2, %v8973_v41 }
 0x33a   :  { %8667 = vmatpush3.bf16.msra.mxu1 %v8666_v10  ;;  %8787 = vmatpush3.bf16.msra.mxu0 %v8786_v55  ;;  %v8705_v10 = vpack.c.bf16 %v4574_v7, %v4573_v19  ;;  %v8843_v55 = vpack.c.bf16 %v6437_v51, %v6436_v63  ;;  %v5223_v19 = vld [vmem:[#allocation5 + $0x310] sm:$0xff]  ;;  %v5224_v7 = vld [vmem:[#allocation5 + $0x318] sm:$0xff] }
 0x33b   :  { %8668 = vmatprep.subr.bf16.mxu1 %v8971_v34  ;;  %8794 = vmatprep.subr.bf16.mxu0 %v8971_v34  ;;  %v7086_v63 = vld [vmem:[#allocation5 + $0x5f0] sm:$0xff]  ;;  %v7087_v51 = vld [vmem:[#allocation5 + $0x5f8] sm:$0xff]  ;;  %v8756_v42 = vpack.c.bf16 %v5224_v7, %v5223_v19 }
 0x33c   :  { %v8894_v37 = vpack.c.bf16 %v7087_v51, %v7086_v63  ;;  %v6358_v19 = vld [vmem:[#allocation5 + $0x4d8] sm:$0xff]  ;;  %v6517_v51 = vld [vmem:[#allocation5 + $0x500] sm:$0xff] }
 0x33d   :  { %8157 = vmatmul.mubr.msk.f32.vlgmr.msra.gmra.mrb[68].mxu1 %vm3174_vm8, %v4004_v5  ;;  %8377 = vmatmul.mubr.msk.f32.vlgmr.msra.gmra.mrb[116].mxu0 %vm3174_vm8, %v5624_v40  ;;  %v6598_v5 = vld [vmem:[#allocation5 + $0x520] sm:$0xff]  ;;  %v6599_v40 = vld [vmem:[#allocation5 + $0x528] sm:$0xff] }
 0x33e   :  { %8670 = vmatpush3.bf16.msra.mxu1 %v8669_v28  ;;  %8796 = vmatpush3.bf16.msra.mxu0 %v8795_v6  ;;  %v4409_v28 = vld [vmem:[#allocation4 + $0xe] ss:$50 sm:$0x3]  ;;  %v6272_v6 = vld [vmem:[#allocation4 + $0x25] ss:$50 sm:$0x3] }
 0x33f   :  { %8671 = vmatprep.subr.bf16.mxu1 %v8971_v34  ;;  %8797 = vmatprep.subr.bf16.mxu0 %v8971_v34  ;;  %v6191_v7 = vld [vmem:[#allocation4 + $0x24] ss:$50 sm:$0x3] }
 0x340   :  { %8167 = vmatprep.mubr.msk.f32.mxu1 %vm8972_vm2, %v8973_v41  ;;  %8398 = vmatprep.mubr.msk.f32.mxu0 %vm8972_vm2, %v8973_v41 }
 0x342   :  { %8673 = vmatpush3.bf16.msra.mxu1 %v8672_v16  ;;  %8799 = vmatpush3.bf16.msra.mxu0 %v8798_v59  ;;  %v8717_v16 = vpack.c.bf16 %v4736_v52, %v4735_v60  ;;  %v8855_v59 = vpack.c.bf16 %v6599_v40, %v6598_v5  ;;  %v5385_v60 = vld [vmem:[#allocation5 + $0x350] sm:$0xff]  ;;  %v5386_v52 = vld [vmem:[#allocation5 + $0x358] sm:$0xff] }
 0x343   :  { %8674 = vmatprep.subr.bf16.mxu1 %v8971_v34  ;;  %8806 = vmatprep.subr.bf16.mxu0 %v8971_v34  ;;  %v7248_v5 = vld [vmem:[#allocation5 + $0x630] sm:$0xff]  ;;  %v7249_v40 = vld [vmem:[#allocation5 + $0x638] sm:$0xff]  ;;  %v8768_v49 = vpack.c.bf16 %v5386_v52, %v5385_v60 }
 0x344   :  { %v8906_v53 = vpack.c.bf16 %v7249_v40, %v7248_v5  ;;  %v6682_v60 = vld [vmem:[#allocation5 + $0x558] sm:$0xff]  ;;  %v6515_v52 = vld [vmem:[#allocation4 + $0x28] ss:$50 sm:$0x3] }
 0x345   :  { %8168 = vmatmul.mubr.msk.f32.vlgmr.msra.gmra.mrb[70].mxu1 %vm3174_vm8, %v4085_v12  ;;  %8399 = vmatmul.mubr.msk.f32.vlgmr.msra.gmra.mrb[118].mxu0 %vm3174_vm8, %v5786_v39  ;;  %v6760_v12 = vld [vmem:[#allocation5 + $0x560] sm:$0xff]  ;;  %v6761_v39 = vld [vmem:[#allocation5 + $0x568] sm:$0xff] }
 0x346   :  { %8676 = vmatpush3.bf16.msra.mxu1 %v8675_v38  ;;  %8808 = vmatpush3.bf16.msra.mxu0 %v8807_v47  ;;  %v4571_v38 = vld [vmem:[#allocation4 + $0x10] ss:$50 sm:$0x3]  ;;  %v6434_v47 = vld [vmem:[#allocation4 + $0x27] ss:$50 sm:$0x3] }
 0x347   :  { %8677 = vmatprep.subr.bf16.mxu1 %v8971_v34  ;;  %8809 = vmatprep.subr.bf16.mxu0 %v8971_v34  ;;  %v6841_v40 = vld [vmem:[#allocation5 + $0x580] sm:$0xff] }
 0x348   :  { %8178 = vmatprep.mubr.msk.f32.mxu1 %vm8972_vm2, %v8973_v41  ;;  %8420 = vmatprep.mubr.msk.f32.mxu0 %vm8972_vm2, %v8973_v41 }
 0x34a   :  { %8679 = vmatpush3.bf16.msra.mxu1 %v8678_v35  ;;  %8811 = vmatpush3.bf16.msra.mxu0 %v8810_v11  ;;  %v8729_v35 = vpack.c.bf16 %v4898_v56, %v4897_v1  ;;  %v8867_v11 = vpack.c.bf16 %v6761_v39, %v6760_v12  ;;  %v7244_v1 = vld [vmem:[#allocation4 + $0x31] ss:$50 sm:$0x3]  ;;  %v5707_v12 = vld [vmem:[#allocation5 + $0x3c0] sm:$0xff] }
 0x34b   :  { %8680 = vmatprep.subr.bf16.mxu1 %v8971_v34  ;;  %8818 = vmatprep.subr.bf16.mxu0 %v8971_v34  ;;  %v5708_v39 = vld [vmem:[#allocation5 + $0x3c8] sm:$0xff] }
 0x34d   :  { %8179 = vmatmul.mubr.msk.f32.vlgmr.msra.gmra.mrb[72].mxu1 %vm3174_vm8, %v4166_v31  ;;  %8421 = vmatmul.mubr.msk.f32.vlgmr.msra.gmra.mrb[120].mxu0 %vm3174_vm8, %v5948_v22  ;;  %v6922_v31 = vld [vmem:[#allocation5 + $0x5a0] sm:$0xff]  ;;  %v6923_v22 = vld [vmem:[#allocation5 + $0x5a8] sm:$0xff] }
 0x34e   :  { %8682 = vmatpush3.bf16.msra.mxu1 %v8681_v29  ;;  %8820 = vmatpush3.bf16.msra.mxu0 %v8819_v24  ;;  %v4733_v29 = vld [vmem:[#allocation4 + $0x12] ss:$50 sm:$0x3]  ;;  %v6596_v24 = vld [vmem:[#allocation4 + $0x29] ss:$50 sm:$0x3] }
 0x34f   :  { %8683 = vmatprep.subr.bf16.mxu1 %v8971_v34  ;;  %8821 = vmatprep.subr.bf16.mxu0 %v8971_v34 }
 0x350   :  { %8189 = vmatprep.mubr.msk.f32.mxu1 %vm8972_vm2, %v8973_v41  ;;  %8442 = vmatprep.mubr.msk.f32.mxu0 %vm8972_vm2, %v8973_v41 }
 0x352   :  { %8685 = vmatpush3.bf16.msra.mxu1 %v8684_v54  ;;  %8823 = vmatpush3.bf16.msra.mxu0 %v8822_v17  ;;  %v8741_v54 = vpack.c.bf16 %v5060_v58, %v5059_v20  ;;  %v8879_v17 = vpack.c.bf16 %v6923_v22, %v6922_v31  ;;  %v5705_v20 = vld [vmem:[#allocation4 + $0x1e] ss:$50 sm:$0x3]  ;;  %v6031_v31 = vld [vmem:[#allocation5 + $0x440] sm:$0xff] }
 0x353   :  { %8692 = vmatprep.subr.bf16.mxu1 %v8971_v34  ;;  %8830 = vmatprep.subr.bf16.mxu0 %v8971_v34  ;;  %v6032_v22 = vld [vmem:[#allocation5 + $0x448] sm:$0xff] }
 0x355   :  { %8190 = vmatmul.mubr.msk.f32.vlgmr.msra.gmra.mrb[74].mxu1 %vm3174_vm8, %v4247_v43  ;;  %8443 = vmatmul.mubr.msk.f32.vlgmr.msra.gmra.mrb[122].mxu0 %vm3174_vm8, %v6110_v9  ;;  %v7084_v43 = vld [vmem:[#allocation5 + $0x5e0] sm:$0xff]  ;;  %v7085_v9 = vld [vmem:[#allocation5 + $0x5e8] sm:$0xff] }
 0x356   :  { %8694 = vmatpush3.bf16.msra.mxu1 %v8693_v32  ;;  %8832 = vmatpush3.bf16.msra.mxu0 %v8831_v15  ;;  %v4895_v32 = vld [vmem:[#allocation4 + $0x14] ss:$50 sm:$0x3]  ;;  %v6758_v15 = vld [vmem:[#allocation4 + $0x2b] ss:$50 sm:$0x3] }
 0x357   :  { %8695 = vmatprep.subr.bf16.mxu1 %v8971_v34  ;;  %8833 = vmatprep.subr.bf16.mxu0 %v8971_v34 }
 0x358   :  { %8211 = vmatprep.mubr.msk.f32.mxu1 %vm8972_vm2, %v8973_v41  ;;  %8464 = vmatprep.mubr.msk.f32.mxu0 %vm8972_vm2, %v8973_v41 }
 0x35a   :  { %8697 = vmatpush3.bf16.msra.mxu1 %v8696_v36  ;;  %8835 = vmatpush3.bf16.msra.mxu0 %v8834_v2  ;;  %v8753_v36 = vpack.c.bf16 %v5222_v8, %v5221_v61  ;;  %v8891_v2 = vpack.c.bf16 %v7085_v9, %v7084_v43  ;;  %v6029_v61 = vld [vmem:[#allocation4 + $0x22] ss:$50 sm:$0x3]  ;;  %v6355_v43 = vld [vmem:[#allocation5 + $0x4c0] sm:$0xff] }
 0x35b   :  { %8704 = vmatprep.subr.bf16.mxu1 %v8971_v34  ;;  %8842 = vmatprep.subr.bf16.mxu0 %v8971_v34  ;;  %v6356_v9 = vld [vmem:[#allocation5 + $0x4c8] sm:$0xff] }
 0x35d   :  { %8212 = vmatmul.mubr.msk.f32.vlgmr.msra.gmra.mrb[76].mxu1 %vm3174_vm8, %v4409_v28  ;;  %8465 = vmatmul.mubr.msk.f32.vlgmr.msra.gmra.mrb[124].mxu0 %vm3174_vm8, %v6272_v6  ;;  %v7246_v28 = vld [vmem:[#allocation5 + $0x620] sm:$0xff]  ;;  %v7247_v6 = vld [vmem:[#allocation5 + $0x628] sm:$0xff] }
 0x35e   :  { %8706 = vmatpush3.bf16.msra.mxu1 %v8705_v10  ;;  %8844 = vmatpush3.bf16.msra.mxu0 %v8843_v55  ;;  %v5057_v10 = vld [vmem:[#allocation4 + $0x16] ss:$50 sm:$0x3]  ;;  %v6920_v55 = vld [vmem:[#allocation4 + $0x2d] ss:$50 sm:$0x3] }
 0x35f   :  { %8707 = vmatprep.subr.bf16.mxu1 %v8971_v34  ;;  %8845 = vmatprep.subr.bf16.mxu0 %v8971_v34 }
 0x360   :  { %8233 = vmatprep.mubr.msk.f32.mxu1 %vm8972_vm2, %v8973_v41  ;;  %8486 = vmatprep.mubr.msk.f32.mxu0 %vm8972_vm2, %v8973_v41 }
 0x362   :  { %8709 = vmatpush3.bf16.msra.mxu1 %v8708_v3  ;;  %8847 = vmatpush3.bf16.msra.mxu0 %v8846_v21  ;;  %v8765_v3 = vpack.c.bf16 %v5384_v13, %v5383_v44  ;;  %v8903_v21 = vpack.c.bf16 %v7247_v6, %v7246_v28  ;;  %v6353_v44 = vld [vmem:[#allocation4 + $0x26] ss:$50 sm:$0x3]  ;;  %v6679_v28 = vld [vmem:[#allocation5 + $0x540] sm:$0xff]  ;;  %v6680_v6 = vld [vmem:[#allocation5 + $0x548] sm:$0xff] }
 0x363   :  { %8716 = vmatprep.subr.bf16.mxu1 %v8971_v34  ;;  %8854 = vmatprep.subr.bf16.mxu0 %v8971_v34 }
 0x365   :  { %8234 = vmatmul.mubr.msk.f32.vlgmr.msra.gmra.mrb[78].mxu1 %vm3174_vm8, %v4571_v38  ;;  %8487 = vmatmul.mubr.msk.f32.vlgmr.msra.gmra.mrb[126].mxu0 %vm3174_vm8, %v6434_v47  ;;  %v8777_v38 = vpack.c.bf16 %v5546_v4, %v5545_v0  ;;  %v5547_v47 = vld [vmem:[#allocation5 + $0x390] sm:$0xff]  ;;  %v6844_v4 = vld [vmem:[#allocation5 + $0x598] sm:$0xff] }
 0x366   :  { %8718 = vmatpush3.bf16.msra.mxu1 %v8717_v16  ;;  %8856 = vmatpush3.bf16.msra.mxu0 %v8855_v59  ;;  %v5219_v16 = vld [vmem:[#allocation4 + $0x18] ss:$50 sm:$0x3]  ;;  %v7082_v59 = vld [vmem:[#allocation4 + $0x2f] ss:$50 sm:$0x3] }
 0x367   :  { %8719 = vmatprep.subr.bf16.mxu1 %v8971_v34  ;;  %8857 = vmatprep.subr.bf16.mxu0 %v8971_v34  ;;  %v6843_v0 = vld [vmem:[#allocation5 + $0x590] sm:$0xff] }
 0x368   :  { %8255 = vmatprep.mubr.msk.f32.mxu1 %vm8972_vm2, %v8973_v41  ;;  %8508 = vmatprep.mubr.msk.f32.mxu0 %vm8972_vm2, %v8973_v41 }
 0x36a   :  { %8721 = vmatpush3.bf16.msra.mxu1 %v8720_v57  ;;  %8859 = vmatpush3.bf16.msra.mxu0 %v8858_v50  ;;  %v5548_v57 = vld [vmem:[#allocation5 + $0x398] sm:$0xff]  ;;  %v5381_v50 = vld [vmem:[#allocation4 + $0x1a] ss:$50 sm:$0x3] }
 0x36b   :  { %8728 = vmatprep.subr.bf16.mxu1 %v8971_v34  ;;  %8866 = vmatprep.subr.bf16.mxu0 %v8971_v34  ;;  %v8780_v56 = vpack.c.bf16 %v5548_v57, %v5547_v47  ;;  %v8876_v47 = vpack.c.bf16 %v6844_v4, %v6843_v0  ;;  %v7003_v57 = vld [vmem:[#allocation5 + $0x5c0] sm:$0xff] }
 0x36d   :  { %8256 = vmatmul.mubr.msk.f32.vlgmr.msra.gmra.mrb[80].mxu1 %vm3174_vm8, %v4733_v29  ;;  %8509 = vmatmul.mubr.msk.f32.vlgmr.msra.gmra.mrb[128].mxu0 %vm3174_vm8, %v6596_v24  ;;  %v5870_v29 = vld [vmem:[#allocation5 + $0x408] sm:$0xff] }
 0x36e   :  { %8730 = vmatpush3.bf16.msra.mxu1 %v8729_v35  ;;  %8868 = vmatpush3.bf16.msra.mxu0 %v8867_v11  ;;  %v8789_v35 = vpack.c.bf16 %v5708_v39, %v5707_v12  ;;  %v5709_v11 = vld [vmem:[#allocation5 + $0x3d0] sm:$0xff]  ;;  %v8801_v24 = vpack.c.bf16 %v5870_v29, %v5869_v62  ;;  %v7165_v29 = vld [vmem:[#allocation5 + $0x600] sm:$0xff] }
 0x36f   :  { %8731 = vmatprep.subr.bf16.mxu1 %v8971_v34  ;;  %8869 = vmatprep.subr.bf16.mxu0 %v8971_v34  ;;  %v8792_v14 = vpack.c.bf16 %v5710_v25, %v5709_v11  ;;  %v7005_v25 = vld [vmem:[#allocation5 + $0x5d0] sm:$0xff] }
 0x370   :  { %8277 = vmatprep.mubr.msk.f32.mxu1 %vm8972_vm2, %v8973_v41  ;;  %8530 = vmatprep.mubr.msk.f32.mxu0 %vm8972_vm2, %v8973_v41 }
 0x372   :  { %8733 = vmatpush3.bf16.msra.mxu1 %v8732_v45  ;;  %8871 = vmatpush3.bf16.msra.mxu0 %v8870_v23  ;;  %v5871_v45 = vld [vmem:[#allocation5 + $0x410] sm:$0xff]  ;;  %v5872_v23 = vld [vmem:[#allocation5 + $0x418] sm:$0xff] }
 0x373   :  { %8740 = vmatprep.subr.bf16.mxu1 %v8971_v34  ;;  %8878 = vmatprep.subr.bf16.mxu0 %v8971_v34  ;;  %v8804_v58 = vpack.c.bf16 %v5872_v23, %v5871_v45 }
 0x375   :  { %8278 = vmatmul.mubr.msk.f32.vlgmr.msra.gmra.mrb[82].mxu1 %vm3174_vm8, %v4895_v32  ;;  %8531 = vmatmul.mubr.msk.f32.vlgmr.msra.gmra.mrb[130].mxu0 %vm3174_vm8, %v6758_v15  ;;  %v6194_v32 = vld [vmem:[#allocation5 + $0x488] sm:$0xff] }
 0x376   :  { %8742 = vmatpush3.bf16.msra.mxu1 %v8741_v54  ;;  %8880 = vmatpush3.bf16.msra.mxu0 %v8879_v17  ;;  %v8813_v54 = vpack.c.bf16 %v6032_v22, %v6031_v31  ;;  %v6033_v17 = vld [vmem:[#allocation5 + $0x450] sm:$0xff]  ;;  %v8825_v15 = vpack.c.bf16 %v6194_v32, %v6193_v33 }
 0x377   :  { %8743 = vmatprep.subr.bf16.mxu1 %v8971_v34  ;;  %8881 = vmatprep.subr.bf16.mxu0 %v8971_v34  ;;  %v8816_v26 = vpack.c.bf16 %v6034_v27, %v6033_v17  ;;  %v7168_v17 = vld [vmem:[#allocation5 + $0x618] sm:$0xff] }
 0x378   :  { %8299 = vmatprep.mubr.msk.f32.mxu1 %vm8972_vm2, %v8973_v41  ;;  %8552 = vmatprep.mubr.msk.f32.mxu0 %vm8972_vm2, %v8973_v41  ;;  %v7001_v27 = vld [vmem:[#allocation4 + $0x2e] ss:$50 sm:$0x3] }
 0x37a   :  { %8745 = vmatpush3.bf16.msra.mxu1 %v8744_v48  ;;  %8883 = vmatpush3.bf16.msra.mxu0 %v8882_v30  ;;  %v6195_v48 = vld [vmem:[#allocation5 + $0x490] sm:$0xff]  ;;  %v6196_v30 = vld [vmem:[#allocation5 + $0x498] sm:$0xff] }
 0x37b   :  { %8752 = vmatprep.subr.bf16.mxu1 %v8971_v34  ;;  %8890 = vmatprep.subr.bf16.mxu0 %v8971_v34  ;;  %v8828_v8 = vpack.c.bf16 %v6196_v30, %v6195_v48  ;;  %v7163_v30 = vld [vmem:[#allocation4 + $0x30] ss:$50 sm:$0x3] }
 0x37d   :  { %8300 = vmatmul.mubr.msk.f32.vlgmr.msra.gmra.mrb[84].mxu1 %vm3174_vm8, %v5057_v10  ;;  %8553 = vmatmul.mubr.msk.f32.vlgmr.msra.gmra.mrb[132].mxu0 %vm3174_vm8, %v6920_v55  ;;  %v6518_v10 = vld [vmem:[#allocation5 + $0x508] sm:$0xff] }
 0x37e   :  { %8754 = vmatpush3.bf16.msra.mxu1 %v8753_v36  ;;  %8892 = vmatpush3.bf16.msra.mxu0 %v8891_v2  ;;  %v8837_v36 = vpack.c.bf16 %v6356_v9, %v6355_v43  ;;  %v6357_v2 = vld [vmem:[#allocation5 + $0x4d0] sm:$0xff]  ;;  %v8849_v55 = vpack.c.bf16 %v6518_v10, %v6517_v51 }
 0x37f   :  { %8755 = vmatprep.subr.bf16.mxu1 %v8971_v34  ;;  %8893 = vmatprep.subr.bf16.mxu0 %v8971_v34  ;;  %v8840_v63 = vpack.c.bf16 %v6358_v19, %v6357_v2 }
 0x380   :  { %8321 = vmatprep.mubr.msk.f32.mxu1 %vm8972_vm2, %v8973_v41  ;;  %8574 = vmatprep.mubr.msk.f32.mxu0 %vm8972_vm2, %v8973_v41 }
 0x382   :  { %8757 = vmatpush3.bf16.msra.mxu1 %v8756_v42  ;;  %8895 = vmatpush3.bf16.msra.mxu0 %v8894_v37  ;;  %v6519_v42 = vld [vmem:[#allocation5 + $0x510] sm:$0xff]  ;;  %v6520_v37 = vld [vmem:[#allocation5 + $0x518] sm:$0xff] }
 0x383   :  { %8764 = vmatprep.subr.bf16.mxu1 %v8971_v34  ;;  %8902 = vmatprep.subr.bf16.mxu0 %v8971_v34  ;;  %v8852_v13 = vpack.c.bf16 %v6520_v37, %v6519_v42 }
 0x385   :  { %8322 = vmatmul.mubr.msk.f32.vlgmr.msra.gmra.mrb[86].mxu1 %vm3174_vm8, %v5219_v16  ;;  %8575 = vmatmul.mubr.msk.f32.vlgmr.msra.gmra.mrb[134].mxu0 %vm3174_vm8, %v7082_v59  ;;  %v6842_v16 = vld [vmem:[#allocation5 + $0x588] sm:$0xff] }
 0x386   :  { %8766 = vmatpush3.bf16.msra.mxu1 %v8765_v3  ;;  %8904 = vmatpush3.bf16.msra.mxu0 %v8903_v21  ;;  %v8861_v3 = vpack.c.bf16 %v6680_v6, %v6679_v28  ;;  %v6681_v21 = vld [vmem:[#allocation5 + $0x550] sm:$0xff] }
 0x387   :  { %8767 = vmatprep.subr.bf16.mxu1 %v8971_v34  ;;  %8905 = vmatprep.subr.bf16.mxu0 %v8971_v34  ;;  %v8864_v5 = vpack.c.bf16 %v6682_v60, %v6681_v21 }
 0x388   :  { %8343 = vmatprep.mubr.msk.f32.mxu1 %vm8972_vm2, %v8973_v41  ;;  %8596 = vmatprep.mubr.msk.f32.mxu0 %vm8972_vm2, %v8973_v41 }
 0x38a   :  { %8769 = vmatpush3.bf16.msra.mxu1 %v8768_v49  ;;  %8907 = vmatpush3.bf16.msra.mxu0 %v8906_v53  ;;  %v8873_v53 = vpack.c.bf16 %v6842_v16, %v6841_v40 }
 0x38b   :  { %8776 = vmatprep.subr.bf16.mxu1 %v8971_v34 }
 0x38d   :  { %8344 = vmatmul.mubr.msk.f32.vlgmr.msra.gmra.mrb[88].mxu1 %vm3174_vm8, %v5381_v50  ;;  %8597 = vmatmul.mubr.msk.f32.vlgmr.msra.gmra.mrb[136].mxu0 %vm3174_vm8, %v7244_v1  ;;  %v7004_v50 = vld [vmem:[#allocation5 + $0x5c8] sm:$0xff] }
 0x38e   :  { %8778 = vmatpush3.bf16.msra.mxu1 %v8777_v38  ;;  %8365 = vmatprep.mubr.msk.f32.mxu1 %vm8972_vm2, %v8973_v41  ;;  %v6677_v38 = vld [vmem:[#allocation4 + $0x2a] ss:$50 sm:$0x3]  ;;  %v8885_v11 = vpack.c.bf16 %v7004_v50, %v7003_v57 }
 0x38f   :  { %8779 = vmatprep.subr.bf16.mxu1 %v8971_v34 }
 0x392   :  { %8781 = vmatpush3.bf16.msra.mxu1 %v8780_v56 }
 0x393   :  { %8788 = vmatprep.subr.bf16.mxu1 %v8971_v34 }
 0x395   :  { %8366 = vmatmul.mubr.msk.f32.vlgmr.msra.gmra.mrb[90].mxu1 %vm3174_vm8, %v5543_v18  ;;  %v7006_v18 = vld [vmem:[#allocation5 + $0x5d8] sm:$0xff] }
 0x396   :  { %8790 = vmatpush3.bf16.msra.mxu1 %v8789_v35  ;;  %8387 = vmatprep.mubr.msk.f32.mxu1 %vm8972_vm2, %v8973_v41  ;;  %v8888_v62 = vpack.c.bf16 %v7006_v18, %v7005_v25 }
 0x397   :  { %8791 = vmatprep.subr.bf16.mxu1 %v8971_v34 }
 0x39a   :  { %8793 = vmatpush3.bf16.msra.mxu1 %v8792_v14  ;;  %v6839_v14 = vld [vmem:[#allocation4 + $0x2c] ss:$50 sm:$0x3] }
 0x39b   :  { %8800 = vmatprep.subr.bf16.mxu1 %v8971_v34 }
 0x39d   :  { %8388 = vmatmul.mubr.msk.f32.vlgmr.msra.gmra.mrb[92].mxu1 %vm3174_vm8, %v5705_v20 }
 0x39e   :  { %8802 = vmatpush3.bf16.msra.mxu1 %v8801_v24  ;;  %8409 = vmatprep.mubr.msk.f32.mxu1 %vm8972_vm2, %v8973_v41  ;;  %v7166_v24 = vld [vmem:[#allocation5 + $0x608] sm:$0xff] }
 0x39f   :  { %8803 = vmatprep.subr.bf16.mxu1 %v8971_v34  ;;  %v8897_v22 = vpack.c.bf16 %v7166_v24, %v7165_v29 }
 0x3a2   :  { %8805 = vmatpush3.bf16.msra.mxu1 %v8804_v58 }
 0x3a3   :  { %8812 = vmatprep.subr.bf16.mxu1 %v8971_v34 }
 0x3a5   :  { %8410 = vmatmul.mubr.msk.f32.vlgmr.msra.gmra.mrb[94].mxu1 %vm3174_vm8, %v5867_v46 }
 0x3a6   :  { %8814 = vmatpush3.bf16.msra.mxu1 %v8813_v54  ;;  %8431 = vmatprep.mubr.msk.f32.mxu1 %vm8972_vm2, %v8973_v41  ;;  %v7167_v54 = vld [vmem:[#allocation5 + $0x610] sm:$0xff] }
 0x3a7   :  { %8815 = vmatprep.subr.bf16.mxu1 %v8971_v34  ;;  %v8900_v46 = vpack.c.bf16 %v7168_v17, %v7167_v54 }
 0x3aa   :  { %8817 = vmatpush3.bf16.msra.mxu1 %v8816_v26 }
 0x3ab   :  { %8824 = vmatprep.subr.bf16.mxu1 %v8971_v34 }
 0x3ad   :  { %8432 = vmatmul.mubr.msk.f32.vlgmr.msra.gmra.mrb[96].mxu1 %vm3174_vm8, %v6029_v61 }
 0x3ae   :  { %8826 = vmatpush3.bf16.msra.mxu1 %v8825_v15  ;;  %8453 = vmatprep.mubr.msk.f32.mxu1 %vm8972_vm2, %v8973_v41 }
 0x3af   :  { %8827 = vmatprep.subr.bf16.mxu1 %v8971_v34 }
 0x3b2   :  { %8829 = vmatpush3.bf16.msra.mxu1 %v8828_v8 }
 0x3b3   :  { %8836 = vmatprep.subr.bf16.mxu1 %v8971_v34 }
 0x3b5   :  { %8454 = vmatmul.mubr.msk.f32.vlgmr.msra.gmra.mrb[98].mxu1 %vm3174_vm8, %v6191_v7 }
 0x3b6   :  { %8838 = vmatpush3.bf16.msra.mxu1 %v8837_v36  ;;  %8475 = vmatprep.mubr.msk.f32.mxu1 %vm8972_vm2, %v8973_v41 }
 0x3b7   :  { %8839 = vmatprep.subr.bf16.mxu1 %v8971_v34 }
 0x3ba   :  { %8841 = vmatpush3.bf16.msra.mxu1 %v8840_v63 }
 0x3bb   :  { %8848 = vmatprep.subr.bf16.mxu1 %v8971_v34 }
 0x3bd   :  { %8476 = vmatmul.mubr.msk.f32.vlgmr.msra.gmra.mrb[100].mxu1 %vm3174_vm8, %v6353_v44 }
 0x3be   :  { %8850 = vmatpush3.bf16.msra.mxu1 %v8849_v55  ;;  %8497 = vmatprep.mubr.msk.f32.mxu1 %vm8972_vm2, %v8973_v41 }
 0x3bf   :  { %8851 = vmatprep.subr.bf16.mxu1 %v8971_v34 }
 0x3c2   :  { %8853 = vmatpush3.bf16.msra.mxu1 %v8852_v13 }
 0x3c3   :  { %8860 = vmatprep.subr.bf16.mxu1 %v8971_v34 }
 0x3c5   :  { %8498 = vmatmul.mubr.msk.f32.vlgmr.msra.gmra.mrb[102].mxu1 %vm3174_vm8, %v6515_v52 }
 0x3c6   :  { %8862 = vmatpush3.bf16.msra.mxu1 %v8861_v3  ;;  %8519 = vmatprep.mubr.msk.f32.mxu1 %vm8972_vm2, %v8973_v41 }
 0x3c7   :  { %8863 = vmatprep.subr.bf16.mxu1 %v8971_v34 }
 0x3c8   :  { %v3359_v59 = vpop.f32.mrb[50].mxu1 }
 0x3c9   :  { %v8059_v49 = vpop.f32.mrb[51].mxu1 }
 0x3ca   :  { %8865 = vmatpush3.bf16.msra.mxu1 %v8864_v5 }
 0x3cb   :  { %8872 = vmatprep.subr.bf16.mxu1 %v8971_v34 }
 0x3cd   :  { %8520 = vmatmul.mubr.msk.f32.vlgmr.msra.gmra.mrb[104].mxu1 %vm3174_vm8, %v6677_v38 }
 0x3ce   :  { %8874 = vmatpush3.bf16.msra.mxu1 %v8873_v53  ;;  %8541 = vmatprep.mubr.msk.f32.mxu1 %vm8972_vm2, %v8973_v41 }
 0x3cf   :  { %8875 = vmatprep.subr.bf16.mxu1 %v8971_v34 }
 0x3d0   :  { %v3432_v1 = vpop.f32.mrb[52].mxu1  ;;  %v10610_v56 = vpop.f32.mrb[100].mxu0 }
 0x3d1   :  { %v3433_v12 = vadd.f32 %v3432_v1, %v3359_v59  ;;  %v8070_v39 = vpop.f32.mrb[53].mxu1  ;;  %v8202_v35 = vpop.f32.mrb[101].mxu0 }
 0x3d2   :  { %8877 = vmatpush3.bf16.msra.mxu1 %v8876_v47 }
 0x3d3   :  { %8884 = vmatprep.subr.bf16.mxu1 %v8971_v34 }
 0x3d5   :  { %8542 = vmatmul.mubr.msk.f32.vlgmr.msra.gmra.mrb[106].mxu1 %vm3174_vm8, %v6839_v14 }
 0x3d6   :  { %8886 = vmatpush3.bf16.msra.mxu1 %v8885_v11  ;;  %8563 = vmatprep.mubr.msk.f32.mxu1 %vm8972_vm2, %v8973_v41 }
 0x3d7   :  { %8887 = vmatprep.subr.bf16.mxu1 %v8971_v34 }
 0x3d8   :  { %v3512_v45 = vpop.f32.mrb[54].mxu1  ;;  %v10617_v23 = vpop.f32.mrb[102].mxu0 }
 0x3d9   :  { %v3516_v20 = vadd.f32 %v3512_v45, %v3433_v12  ;;  %v8081_v58 = vpop.f32.mrb[55].mxu1  ;;  %v8224_v31 = vpop.f32.mrb[103].mxu0 }
 0x3da   :  { %8889 = vmatpush3.bf16.msra.mxu1 %v8888_v62 }
 0x3db   :  { %8896 = vmatprep.subr.bf16.mxu1 %v8971_v34 }
 0x3dd   :  { %8564 = vmatmul.mubr.msk.f32.vlgmr.msra.gmra.mrb[108].mxu1 %vm3174_vm8, %v7001_v27 }
 0x3de   :  { %8898 = vmatpush3.bf16.msra.mxu1 %v8897_v22  ;;  %8585 = vmatprep.mubr.msk.f32.mxu1 %vm8972_vm2, %v8973_v41 }
 0x3df   :  { %8899 = vmatprep.subr.bf16.mxu1 %v8971_v34 }
 0x3e0   :  { %v3593_v26 = vpop.f32.mrb[56].mxu1  ;;  %v10624_v33 = vpop.f32.mrb[104].mxu0 }
 0x3e1   :  { %v3597_v32 = vadd.f32 %v3593_v26, %v3516_v20  ;;  %v8092_v15 = vpop.f32.mrb[57].mxu1  ;;  %v8246_v48 = vpop.f32.mrb[105].mxu0 }
 0x3e2   :  { %8901 = vmatpush3.bf16.msra.mxu1 %v8900_v46 }
 0x3e5   :  { %8586 = vmatmul.mubr.msk.f32.vlgmr.msra.gmra.mrb[110].mxu1 %vm3174_vm8, %v7163_v30 }
 0x3e8   :  { %v3674_v61 = vpop.f32.mrb[58].mxu1  ;;  %v4889_v8 = vpop.f32.mrb[106].mxu0 }
 0x3e9   :  { %v3678_v43 = vadd.f32 %v3674_v61, %v3597_v32  ;;  %v8103_v9 = vpop.f32.mrb[59].mxu1  ;;  %v8268_v36 = vpop.f32.mrb[107].mxu0 }
 0x3f0   :  { %v3755_v2 = vpop.f32.mrb[60].mxu1  ;;  %v10627_v19 = vpop.f32.mrb[108].mxu0 }
 0x3f1   :  { %v3759_v41 = vadd.f32 %v3755_v2, %v3678_v43  ;;  %v8114_v34 = vpop.f32.mrb[61].mxu1  ;;  %v8290_v7 = vpop.f32.mrb[109].mxu0 }
 0x3f8   :  { %v3836_v63 = vpop.f32.mrb[62].mxu1  ;;  %v10629_v51 = vpop.f32.mrb[110].mxu0 }
 0x3f9   :  { %v3840_v10 = vadd.f32 %v3836_v63, %v3759_v41  ;;  %v8125_v55 = vpop.f32.mrb[63].mxu1  ;;  %v8312_v42 = vpop.f32.mrb[111].mxu0 }
 0x400   :  { %v3917_v37 = vpop.f32.mrb[64].mxu1  ;;  %v10631_v44 = vpop.f32.mrb[112].mxu0 }
 0x401   :  { %v3921_v13 = vadd.f32 %v3917_v37, %v3840_v10  ;;  %v8136_v28 = vpop.f32.mrb[65].mxu1  ;;  %v8334_v6 = vpop.f32.mrb[113].mxu0 }
 0x408   :  { %v3998_v3 = vpop.f32.mrb[66].mxu1  ;;  %v10633_v21 = vpop.f32.mrb[114].mxu0 }
 0x409   :  { %v4002_v60 = vadd.f32 %v3998_v3, %v3921_v13  ;;  %v8147_v52 = vpop.f32.mrb[67].mxu1  ;;  %v8356_v5 = vpop.f32.mrb[115].mxu0 }
 0x410   :  { %v4079_v40 = vpop.f32.mrb[68].mxu1  ;;  %v10635_v16 = vpop.f32.mrb[116].mxu0 }
 0x411   :  { %v4083_v59 = vadd.f32 %v4079_v40, %v4002_v60  ;;  %v8158_v49 = vpop.f32.mrb[69].mxu1  ;;  %v8378_v53 = vpop.f32.mrb[117].mxu0 }
 0x418   :  { %v4160_v0 = vpop.f32.mrb[70].mxu1  ;;  %v10637_v4 = vpop.f32.mrb[118].mxu0 }
 0x419   :  { %v4164_v38 = vadd.f32 %v4160_v0, %v4083_v59  ;;  %v8169_v47 = vpop.f32.mrb[71].mxu1  ;;  %v8400_v57 = vpop.f32.mrb[119].mxu0 }
 0x420   :  { %v4241_v50 = vpop.f32.mrb[72].mxu1  ;;  %v10639_v1 = vpop.f32.mrb[120].mxu0 }
 0x421   :  { %v4245_v12 = vadd.f32 %v4241_v50, %v4164_v38  ;;  %v8180_v39 = vpop.f32.mrb[73].mxu1  ;;  %v8422_v35 = vpop.f32.mrb[121].mxu0 }
 0x428   :  { %v4322_v11 = vpop.f32.mrb[74].mxu1  ;;  %v6185_v25 = vpop.f32.mrb[122].mxu0 }
 0x429   :  { %v4326_v18 = vadd.f32 %v4322_v11, %v4245_v12  ;;  %v8191_v14 = vpop.f32.mrb[75].mxu1  ;;  %v8444_v62 = vpop.f32.mrb[123].mxu0 }
 0x42b   :  { %v4407_v29 = vadd.f32 %v10610_v56, %v4326_v18 }
 0x430   :  { %v4484_v24 = vpop.f32.mrb[76].mxu1  ;;  %v6347_v45 = vpop.f32.mrb[124].mxu0 }
 0x431   :  { %v4488_v20 = vadd.f32 %v4484_v24, %v4407_v29  ;;  %v8213_v58 = vpop.f32.mrb[77].mxu1  ;;  %v8466_v31 = vpop.f32.mrb[125].mxu0 }
 0x433   :  { %v4569_v22 = vadd.f32 %v10617_v23, %v4488_v20 }
 0x438   :  { %v4646_v54 = vpop.f32.mrb[78].mxu1  ;;  %v6509_v17 = vpop.f32.mrb[126].mxu0 }
 0x439   :  { %v4650_v27 = vadd.f32 %v4646_v54, %v4569_v22  ;;  %v8235_v46 = vpop.f32.mrb[79].mxu1  ;;  %v8488_v26 = vpop.f32.mrb[127].mxu0 }
 0x43b   :  { %v4731_v32 = vadd.f32 %v10624_v33, %v4650_v27 }
 0x440   :  { %v4808_v15 = vpop.f32.mrb[80].mxu1  ;;  %v6671_v48 = vpop.f32.mrb[128].mxu0 }
 0x441   :  { %v4812_v30 = vadd.f32 %v4808_v15, %v4731_v32  ;;  %v8257_v61 = vpop.f32.mrb[81].mxu1  ;;  %v8510_v43 = vpop.f32.mrb[129].mxu0 }
 0x443   :  { %v4893_v56 = vadd.f32 %v4889_v8, %v4812_v30 }
 0x448   :  { %v4970_v9 = vpop.f32.mrb[82].mxu1  ;;  %v6833_v36 = vpop.f32.mrb[130].mxu0 }
 0x449   :  { %v4974_v2 = vadd.f32 %v4970_v9, %v4893_v56  ;;  %v8279_v41 = vpop.f32.mrb[83].mxu1  ;;  %v8532_v34 = vpop.f32.mrb[131].mxu0 }
 0x44b   :  { %v5055_v23 = vadd.f32 %v10627_v19, %v4974_v2 }
 0x450   :  { %v5132_v7 = vpop.f32.mrb[84].mxu1  ;;  %v6995_v63 = vpop.f32.mrb[132].mxu0 }
 0x451   :  { %v5136_v10 = vadd.f32 %v5132_v7, %v5055_v23  ;;  %v8301_v55 = vpop.f32.mrb[85].mxu1  ;;  %v8554_v42 = vpop.f32.mrb[133].mxu0 }
 0x453   :  { %v5217_v33 = vadd.f32 %v10629_v51, %v5136_v10 }
 0x458   :  { %v5294_v37 = vpop.f32.mrb[86].mxu1  ;;  %v7157_v13 = vpop.f32.mrb[134].mxu0 }
 0x459   :  { %v5298_v28 = vadd.f32 %v5294_v37, %v5217_v33  ;;  %v8323_v6 = vpop.f32.mrb[87].mxu1  ;;  %v8576_v3 = vpop.f32.mrb[135].mxu0 }
 0x45b   :  { %v5379_v8 = vadd.f32 %v10631_v44, %v5298_v28 }
 0x460   :  { %v5456_v60 = vpop.f32.mrb[88].mxu1  ;;  %v7319_v52 = vpop.f32.mrb[136].mxu0 }
 0x461   :  { %v5460_v5 = vadd.f32 %v5456_v60, %v5379_v8  ;;  %v8345_v40 = vpop.f32.mrb[89].mxu1  ;;  %v8598_v59 = vpop.f32.mrb[137].mxu0 }
 0x463   :  { %v5541_v19 = vadd.f32 %v10633_v21, %v5460_v5 }
 0x468   :  { %v5618_v49 = vpop.f32.mrb[90].mxu1 }
 0x469   :  { %v5622_v53 = vadd.f32 %v5618_v49, %v5541_v19  ;;  %v8367_v0 = vpop.f32.mrb[91].mxu1 }
 0x46b   :  { %v5703_v38 = vadd.f32 %v10635_v16, %v5622_v53 }
 0x470   :  { %v5780_v51 = vpop.f32.mrb[92].mxu1 }
 0x471   :  { %v5784_v47 = vadd.f32 %v5780_v51, %v5703_v38  ;;  %v8389_v57 = vpop.f32.mrb[93].mxu1 }
 0x473   :  { %v5865_v50 = vadd.f32 %v10637_v4, %v5784_v47 }
 0x478   :  { %v5942_v12 = vpop.f32.mrb[94].mxu1 }
 0x479   :  { %v5946_v39 = vadd.f32 %v5942_v12, %v5865_v50  ;;  %v8411_v44 = vpop.f32.mrb[95].mxu1 }
 0x47b   :  { %v6027_v35 = vadd.f32 %v10639_v1, %v5946_v39 }
 0x480   :  { %v6104_v11 = vpop.f32.mrb[96].mxu1 }
 0x481   :  { %v6108_v18 = vadd.f32 %v6104_v11, %v6027_v35  ;;  %v8433_v14 = vpop.f32.mrb[97].mxu1 }
 0x483   :  { %v6189_v62 = vadd.f32 %v6185_v25, %v6108_v18 }
 0x488   :  { %v6266_v21 = vpop.f32.mrb[98].mxu1 }
 0x489   :  { %v6270_v29 = vadd.f32 %v6266_v21, %v6189_v62  ;;  %v8455_v24 = vpop.f32.mrb[99].mxu1 }
 0x48b   :  { %v6351_v20 = vadd.f32 %v6347_v45, %v6270_v29 }
 0x490   :  { %v6428_v58 = vpop.f32.mrb[100].mxu1 }
 0x491   :  { %v6432_v16 = vadd.f32 %v6428_v58, %v6351_v20  ;;  %v8477_v31 = vpop.f32.mrb[101].mxu1 }
 0x493   :  { %v6513_v22 = vadd.f32 %v6509_v17, %v6432_v16  ;;  %v7480_v17 = vld [vmem:[%s10672_s6] ss:$0 sm:$0xff] }
 0x498   :  { %v6590_v54 = vpop.f32.mrb[102].mxu1 }
 0x499   :  { %v6594_v27 = vadd.f32 %v6590_v54, %v6513_v22  ;;  %v8499_v4 = vpop.f32.mrb[103].mxu1 }
 0x49b   :  { %v6675_v46 = vadd.f32 %v6671_v48, %v6594_v27 }
 0x4a0   :  { %v6752_v26 = vpop.f32.mrb[104].mxu1 }
 0x4a1   :  { %v6756_v32 = vadd.f32 %v6752_v26, %v6675_v46  ;;  %v8521_v15 = vpop.f32.mrb[105].mxu1 }
 0x4a3   :  { %v6837_v1 = vadd.f32 %v6833_v36, %v6756_v32 }
 0x4a8   :  { %v6914_v30 = vpop.f32.mrb[106].mxu1 }
 0x4a9   :  { %v6918_v61 = vadd.f32 %v6914_v30, %v6837_v1  ;;  %v8543_v43 = vpop.f32.mrb[107].mxu1 }
 0x4ab   :  { %v6999_v25 = vadd.f32 %v6995_v63, %v6918_v61 }
 0x4b0   :  { %v7076_v56 = vpop.f32.mrb[108].mxu1 }
 0x4b1   :  { %v7080_v9 = vadd.f32 %v7076_v56, %v6999_v25  ;;  %v8565_v2 = vpop.f32.mrb[109].mxu1 }
 0x4b3   :  { %v7161_v45 = vadd.f32 %v7157_v13, %v7080_v9 }
 0x4b8   :  { %v7238_v41 = vpop.f32.mrb[110].mxu1 }
 0x4b9   :  { %v7242_v34 = vadd.f32 %v7238_v41, %v7161_v45  ;;  %v8587_v23 = vpop.f32.mrb[111].mxu1 }
 0x4bb   :  { %v7323_v48 = vadd.f32 %v7319_v52, %v7242_v34 }
 0x4bd   :  { %v7331_v7 = vadd.f32 %v7480_v17, %v7323_v48 }
 0x4bf   :  { %v7332_v36 = vmax.f32 %v7331_v7, 0.0 }
 0x4c1   :  { %7333 = vst [vmem:[#allocation8] sm:$0x3] %v7332_v36 }
 0x4c2   :  { %8952 = shalt.err (!%p8949_p12)
}
 0x4c3   :  { %s8953_s3 = scalar_lea.hbm %s10673_s7, 32 }
 0x4c4   :  { %p8954_p13 = scmp.ne.s32.totalorder %s10673_s7, %s8953_s3  ;;  %p8957_p0 = scmp.lt.u32.totalorder %s8953_s3, %s10673_s7 }
 0x4c6   :  { %p8959_p1 = pnand %p8957_p0, %p8954_p13 }
 0x4c8   :  { %8962 = shalt.err (!%p8959_p1)
}
 0x4c9   :  { %7343 = dma.vmem_to_hbm [thread:$0]  %s7341_s11, 32, %s10673_s7, [#allocation7]  }
 0x4ca   :  { %8965 = dma.done.wait [#allocation7], 32  }
 0x4cb   :  { %8966 = vsyncadd [#allocation7], 4294967264 }
 0x4cc   :  { %7347 = vsyncpa [#allocation6], 1 }
 0x4cd   :  { %7348 = vsyncpa [#allocation7], 1 }

</bundles_post_ra>
